<compile_context>
chip_gen: v6e
topology: v6e:2x2x1
jax: 0.10.0
libtpu: 0.0.40
codegen_flags: <defaults>
</compile_context>

<pallas_src>
import functools

import jax
import jax.numpy as jnp
from jax.experimental import pallas as pl
from jax.experimental.pallas import tpu as pltpu

P_S = 16                 # patch size (p_h == p_w == 16 -> 1x1 code spatial)
B_N = 32                 # bits per patch
C_IN = 3                 # image channels
ENC_DIM = 512            # encoder feature dim (ConvBinarizer(in_dim=512))


def _calc_bnd(b_n, p_h, p_w):
    return b_n // ((p_w // 16) * (p_h // 16))


BND = _calc_bnd(B_N, P_S, P_S)       # 32
N_PATCH = 8                          # non-center patches actually decoded
CODE_DIM = N_PATCH * BND             # 256: dense concatenated code width
FEAT = C_IN * P_S * P_S              # 768 = flattened patch size
TB_MAX = 256                         # max batch rows per grid step
ROW_ALIGN = 16                       # bf16 sublane-tile alignment for tb
NON_CENTER = (0, 1, 2, 3, 5, 6, 7, 8)


# ----------------------------------------------------------------------------
# Fused Pallas kernel
# ----------------------------------------------------------------------------
def _fused_kernel(patches_ref, tgt_ref, w1_ref, b1_ref, w2_ref, b2_ref,
                  wd_ref, bd_ref, loss_ref, *, tb, n_rows, mask_rows):
    # patches : (8, tb, FEAT) bf16 (center patch dropped on the host)
    # tgt     : (tb, FEAT) bf16
    # w1 : (FEAT, 512) bf16            b1 : (1, 512) f32
    # w2 : (8, 512, CODE_DIM) bf16     b2 : (1, CODE_DIM) f32  (column-placed)
    # wd : (CODE_DIM, FEAT) bf16       bd : (1, FEAT) f32      (dense decoder)
    # loss: (1, 1, FEAT) f32 -- per-tile column sums of |pred - target|

    # ---- encoder, batched over the 8 patches (one big M=8*tb matmul) -------
    # tb is a multiple of 16, so this collapse is layout-preserving.
    x8 = patches_ref[...].reshape(N_PATCH * tb, FEAT)
    h = jnp.dot(x8, w1_ref[...], preferred_element_type=jnp.float32)
    h = jnp.maximum(h + b1_ref[...], 0.0).astype(jnp.bfloat16)   # (8*tb, 512)

    # ---- binarizer: per-patch column-placed weight block maps patch p's
    # encoder features to code columns [32p, 32p+32), so the +/-1 codes land
    # directly as one dense (tb, 256) matrix (no lane concat, no 32->128
    # zero padding).  MXU cost equals the lane-sparse (512, 32) form.
    z = jnp.broadcast_to(b2_ref[...], (tb, CODE_DIM))
    for p in range(N_PATCH):
        hp = h[p * tb:(p + 1) * tb, :]                           # aligned slice
        z = z + jnp.dot(hp, w2_ref[p], preferred_element_type=jnp.float32)
    # sign (tanh dropped; note sign(0) -> +1 here vs torch.sign(0) == 0)
    code = jnp.where(z >= 0.0, 1.0, -1.0).astype(jnp.bfloat16)   # (tb, 256)

    # ---- decoder: ONE dense K=256 matmul (center-code rows removed) --------
    pred = jnp.dot(code, wd_ref[...], preferred_element_type=jnp.float32)
    pred = pred + bd_ref[...]

    diff = jnp.abs(pred - tgt_ref[...].astype(jnp.float32))
    if mask_rows:
        row = (pl.program_id(0) * tb
               + jax.lax.broadcasted_iota(jnp.int32, (tb, 1), 0))
        diff = jnp.where(row < n_rows, diff, 0.0)
    loss_ref[...] = jnp.sum(diff, axis=0, keepdims=True).reshape(1, 1, FEAT)


# ----------------------------------------------------------------------------
# Params (bf16 matmul weights, f32 biases)
# ----------------------------------------------------------------------------
def init_params(key):
    k1, k2, k3 = jax.random.split(key, 3)
    scale = 0.02
    w1 = scale * jax.random.normal(k1, (FEAT, ENC_DIM), jnp.float32)
    w2 = scale * jax.random.normal(k2, (ENC_DIM, BND), jnp.float32)
    wd9 = scale * jax.random.normal(k3, (9 * BND, FEAT), jnp.float32)

    # Column-placed binarizer weight: block p applies the shared (512, 32) w2
    # and writes the result at code columns [32p, 32p+32).
    w2p = jnp.zeros((N_PATCH, ENC_DIM, CODE_DIM), jnp.float32)
    for i in range(N_PATCH):
        w2p = w2p.at[i, :, i * BND:(i + 1) * BND].set(w2)
    b2 = jnp.zeros((1, CODE_DIM), jnp.float32)   # bias tiled per code block

    # Dense decoder: drop the center patch's 32 rows (its code is zeroed in
    # the reference before the linear decode) and keep the remaining 8 row
    # blocks in the same order as the code columns.
    wd = jnp.concatenate([wd9[p * BND:(p + 1) * BND] for p in NON_CENTER],
                         axis=0)                                  # (256, FEAT)

    return {
        "w1": w1.astype(jnp.bfloat16),
        "b1": jnp.zeros((1, ENC_DIM), jnp.float32),
        "w2": w2p.astype(jnp.bfloat16),
        "b2": b2,
        "wd": wd.astype(jnp.bfloat16),
        "bd": jnp.zeros((1, FEAT), jnp.float32),
    }


# ----------------------------------------------------------------------------
# MaskedBINet forward
# ----------------------------------------------------------------------------
def _round_up(v, m):
    return ((v + m - 1) // m) * m


def _choose_tile(batch):
    # Multiple of 16 rows (bf16 sublane tile, so the in-kernel (8,tb,F) ->
    # (8*tb,F) collapse and the per-patch slices are layout-preserving),
    # capped at TB_MAX, and targeting >= 2 grid steps so v7x's two
    # TensorCores both get work under dimension_semantics=("parallel",).
    half = _round_up(max((batch + 1) // 2, 1), ROW_ALIGN)
    return min(TB_MAX, half)


@jax.jit
def masked_binet_forward(x, params):
    """x: (B, C, 3*p, 3*p) NCHW, returns scalar L1 loss (center-patch recon)."""
    B, C, H, W = x.shape
    p = P_S

    # L1 target: flattened NCHW center patch (shipped bf16, upcast in-kernel).
    target = x[:, :, p:-p, p:-p].reshape(B, FEAT).astype(jnp.bfloat16)

    # f.sliding_window(kernel=p, stride=p): non-overlapping 3x3 patch grid,
    # row-major, laid out patch-major (9, B, FEAT).  Patch 4 (center) is
    # dropped: its code is zeroed before the linear decode in the reference.
    patches = x.reshape(B, C, 3, p, 3, p).transpose(2, 4, 0, 1, 3, 5)
    patches = patches.reshape(9, B, FEAT)
    patches = jnp.concatenate([patches[:4], patches[5:]], axis=0)  # (8,B,FEAT)
    patches = patches.astype(jnp.bfloat16)

    tb = _choose_tile(B)
    b_pad = _round_up(B, tb)
    if b_pad != B:
        patches = jnp.pad(patches, ((0, 0), (0, b_pad - B), (0, 0)))
        target = jnp.pad(target, ((0, b_pad - B), (0, 0)))
    num_tiles = b_pad // tb

    kernel = functools.partial(_fused_kernel, tb=tb, n_rows=B,
                               mask_rows=(b_pad != B))

    partials = pl.pallas_call(
        kernel,
        out_shape=jax.ShapeDtypeStruct((num_tiles, 1, FEAT), jnp.float32),
        grid=(num_tiles,),
        in_specs=[
            pl.BlockSpec((N_PATCH, tb, FEAT), lambda i: (0, i, 0)),  # patches
            pl.BlockSpec((tb, FEAT), lambda i: (i, 0)),              # target
            # Weight index maps are constant -> each weight is DMA'd once and
            # stays resident across the whole grid.
            pl.BlockSpec((FEAT, ENC_DIM), lambda i: (0, 0)),         # w1
            pl.BlockSpec((1, ENC_DIM), lambda i: (0, 0)),            # b1
            pl.BlockSpec((N_PATCH, ENC_DIM, CODE_DIM),
                         lambda i: (0, 0, 0)),                       # w2 (placed)
            pl.BlockSpec((1, CODE_DIM), lambda i: (0, 0)),           # b2
            pl.BlockSpec((CODE_DIM, FEAT), lambda i: (0, 0)),        # wd (dense)
            pl.BlockSpec((1, FEAT), lambda i: (0, 0)),               # bd
        ],
        out_specs=pl.BlockSpec((1, 1, FEAT), lambda i: (i, 0, 0)),
        compiler_params=pltpu.CompilerParams(
            dimension_semantics=("parallel",),
            # v5e scoped default is 16 MiB; tb=256 needs ~20-24 MiB of VMEM,
            # well under v7x's 64 MiB physical capacity.
            vmem_limit_bytes=48 * 1024 * 1024),
    )(patches, target, params["w1"], params["b1"], params["w2"],
      params["b2"], params["wd"], params["bd"])

    # nn.L1Loss() default reduction = mean over all elements of the prediction
    return jnp.sum(partials) / (B * FEAT)


if __name__ == "__main__":
    key = jax.random.PRNGKey(0)
    k_param, k_data = jax.random.split(key)

    params = init_params(k_param)
    # input: batch of 2 RGB images of size (3*p_s, 3*p_s) = 48x48
    x = jax.random.uniform(k_data, (2, C_IN, 3 * P_S, 3 * P_S), jnp.float32)

    loss = masked_binet_forward(x, params)
    jax.block_until_ready(loss)
    assert loss.shape == () and jnp.isfinite(loss)
    print("KERNEL_OK")
</pallas_src>

<mosaic_0001>
module attributes {stable_mosaic.version = 11 : i64} {
  func.func @_fused_kernel(%arg0: i32, %arg1: memref<8x16x768xbf16, #tpu.memory_space<vmem>>, %arg2: memref<16x768xbf16, #tpu.memory_space<vmem>>, %arg3: memref<768x512xbf16, #tpu.memory_space<vmem>>, %arg4: memref<1x512xf32, #tpu.memory_space<vmem>>, %arg5: memref<8x512x256xbf16, #tpu.memory_space<vmem>>, %arg6: memref<1x256xf32, #tpu.memory_space<vmem>>, %arg7: memref<256x768xbf16, #tpu.memory_space<vmem>>, %arg8: memref<1x768xf32, #tpu.memory_space<vmem>>, %arg9: memref<1x1x768xf32, #tpu.memory_space<vmem>>) attributes {dimension_semantics = [#tpu.dimension_semantics<parallel>], iteration_bounds = array<i64: 1>, scalar_prefetch = 0 : i64, scratch_operands = 0 : i64, tpu.core_type = #tpu.core_type<tc>, window_params = [{transform_indices = @transform_0, window_bounds = array<i64: 8, 16, 768>}, {transform_indices = @transform_1, window_bounds = array<i64: 16, 768>}, {pipeline_mode = #tpu.pipeline_mode<synchronous>, transform_indices = @transform_2, window_bounds = array<i64: 768, 512>}, {pipeline_mode = #tpu.pipeline_mode<synchronous>, transform_indices = @transform_3, window_bounds = array<i64: 1, 512>}, {pipeline_mode = #tpu.pipeline_mode<synchronous>, transform_indices = @transform_4, window_bounds = array<i64: 8, 512, 256>}, {pipeline_mode = #tpu.pipeline_mode<synchronous>, transform_indices = @transform_5, window_bounds = array<i64: 1, 256>}, {pipeline_mode = #tpu.pipeline_mode<synchronous>, transform_indices = @transform_6, window_bounds = array<i64: 256, 768>}, {pipeline_mode = #tpu.pipeline_mode<synchronous>, transform_indices = @transform_7, window_bounds = array<i64: 1, 768>}, {transform_indices = @transform_8, window_bounds = array<i64: 1, 1, 768>}]} {
    %c0 = arith.constant 0 : index
    %c0_0 = arith.constant 0 : index
    %c0_1 = arith.constant 0 : index
    %0 = vector.load %arg1[%c0, %c0_0, %c0_1] : memref<8x16x768xbf16, #tpu.memory_space<vmem>>, vector<8x16x768xbf16>
    %1 = vector.shape_cast %0 : vector<8x16x768xbf16> to vector<128x768xbf16>
    %c0_2 = arith.constant 0 : index
    %c0_3 = arith.constant 0 : index
    %2 = vector.load %arg3[%c0_2, %c0_3] : memref<768x512xbf16, #tpu.memory_space<vmem>>, vector<768x512xbf16>
    %cst = arith.constant dense<0.000000e+00> : vector<128x512xf32>
    %3 = tpu.matmul %1, %2, %cst {dimension_numbers = #tpu.dot_dimension_numbers<[1], [0], [0], [1], [0, 0, 1, 1], [], []>} : vector<128x768xbf16>, vector<768x512xbf16>, vector<128x512xf32> -> vector<128x512xf32>
    %c0_4 = arith.constant 0 : index
    %c0_5 = arith.constant 0 : index
    %4 = vector.load %arg4[%c0_4, %c0_5] : memref<1x512xf32, #tpu.memory_space<vmem>>, vector<1x512xf32>
    %5 = vector.broadcast %4 : vector<1x512xf32> to vector<128x512xf32>
    %6 = arith.addf %3, %5 : vector<128x512xf32>
    %cst_6 = arith.constant 0.000000e+00 : f32
    %7 = vector.broadcast %cst_6 : f32 to vector<128x512xf32>
    %8 = arith.maximumf %6, %7 : vector<128x512xf32>
    %9 = arith.truncf %8 : vector<128x512xf32> to vector<128x512xbf16>
    %c0_7 = arith.constant 0 : index
    %c0_8 = arith.constant 0 : index
    %10 = vector.load %arg6[%c0_7, %c0_8] : memref<1x256xf32, #tpu.memory_space<vmem>>, vector<1x256xf32>
    %11 = vector.shape_cast %10 : vector<1x256xf32> to vector<1x256xf32>
    %12 = vector.broadcast %11 : vector<1x256xf32> to vector<16x256xf32>
    %13 = vector.extract_strided_slice %9 {offsets = [0, 0], sizes = [16, 512], strides = [1, 1]} : vector<128x512xbf16> to vector<16x512xbf16>
    %c0_9 = arith.constant 0 : index
    %c0_10 = arith.constant 0 : index
    %c0_11 = arith.constant 0 : index
    %14 = vector.load %arg5[%c0_9, %c0_10, %c0_11] : memref<8x512x256xbf16, #tpu.memory_space<vmem>>, vector<1x512x256xbf16>
    %15 = vector.shape_cast %14 : vector<1x512x256xbf16> to vector<512x256xbf16>
    %cst_12 = arith.constant dense<0.000000e+00> : vector<16x256xf32>
    %16 = tpu.matmul %13, %15, %cst_12 {dimension_numbers = #tpu.dot_dimension_numbers<[1], [0], [0], [1], [0, 0, 1, 1], [], []>} : vector<16x512xbf16>, vector<512x256xbf16>, vector<16x256xf32> -> vector<16x256xf32>
    %17 = arith.addf %12, %16 : vector<16x256xf32>
    %18 = vector.extract_strided_slice %9 {offsets = [16, 0], sizes = [16, 512], strides = [1, 1]} : vector<128x512xbf16> to vector<16x512xbf16>
    %c1 = arith.constant 1 : index
    %c0_13 = arith.constant 0 : index
    %c0_14 = arith.constant 0 : index
    %19 = vector.load %arg5[%c1, %c0_13, %c0_14] : memref<8x512x256xbf16, #tpu.memory_space<vmem>>, vector<1x512x256xbf16>
    %20 = vector.shape_cast %19 : vector<1x512x256xbf16> to vector<512x256xbf16>
    %cst_15 = arith.constant dense<0.000000e+00> : vector<16x256xf32>
    %21 = tpu.matmul %18, %20, %cst_15 {dimension_numbers = #tpu.dot_dimension_numbers<[1], [0], [0], [1], [0, 0, 1, 1], [], []>} : vector<16x512xbf16>, vector<512x256xbf16>, vector<16x256xf32> -> vector<16x256xf32>
    %22 = arith.addf %17, %21 : vector<16x256xf32>
    %23 = vector.extract_strided_slice %9 {offsets = [32, 0], sizes = [16, 512], strides = [1, 1]} : vector<128x512xbf16> to vector<16x512xbf16>
    %c2 = arith.constant 2 : index
    %c0_16 = arith.constant 0 : index
    %c0_17 = arith.constant 0 : index
    %24 = vector.load %arg5[%c2, %c0_16, %c0_17] : memref<8x512x256xbf16, #tpu.memory_space<vmem>>, vector<1x512x256xbf16>
    %25 = vector.shape_cast %24 : vector<1x512x256xbf16> to vector<512x256xbf16>
    %cst_18 = arith.constant dense<0.000000e+00> : vector<16x256xf32>
    %26 = tpu.matmul %23, %25, %cst_18 {dimension_numbers = #tpu.dot_dimension_numbers<[1], [0], [0], [1], [0, 0, 1, 1], [], []>} : vector<16x512xbf16>, vector<512x256xbf16>, vector<16x256xf32> -> vector<16x256xf32>
    %27 = arith.addf %22, %26 : vector<16x256xf32>
    %28 = vector.extract_strided_slice %9 {offsets = [48, 0], sizes = [16, 512], strides = [1, 1]} : vector<128x512xbf16> to vector<16x512xbf16>
    %c3 = arith.constant 3 : index
    %c0_19 = arith.constant 0 : index
    %c0_20 = arith.constant 0 : index
    %29 = vector.load %arg5[%c3, %c0_19, %c0_20] : memref<8x512x256xbf16, #tpu.memory_space<vmem>>, vector<1x512x256xbf16>
    %30 = vector.shape_cast %29 : vector<1x512x256xbf16> to vector<512x256xbf16>
    %cst_21 = arith.constant dense<0.000000e+00> : vector<16x256xf32>
    %31 = tpu.matmul %28, %30, %cst_21 {dimension_numbers = #tpu.dot_dimension_numbers<[1], [0], [0], [1], [0, 0, 1, 1], [], []>} : vector<16x512xbf16>, vector<512x256xbf16>, vector<16x256xf32> -> vector<16x256xf32>
    %32 = arith.addf %27, %31 : vector<16x256xf32>
    %33 = vector.extract_strided_slice %9 {offsets = [64, 0], sizes = [16, 512], strides = [1, 1]} : vector<128x512xbf16> to vector<16x512xbf16>
    %c4 = arith.constant 4 : index
    %c0_22 = arith.constant 0 : index
    %c0_23 = arith.constant 0 : index
    %34 = vector.load %arg5[%c4, %c0_22, %c0_23] : memref<8x512x256xbf16, #tpu.memory_space<vmem>>, vector<1x512x256xbf16>
    %35 = vector.shape_cast %34 : vector<1x512x256xbf16> to vector<512x256xbf16>
    %cst_24 = arith.constant dense<0.000000e+00> : vector<16x256xf32>
    %36 = tpu.matmul %33, %35, %cst_24 {dimension_numbers = #tpu.dot_dimension_numbers<[1], [0], [0], [1], [0, 0, 1, 1], [], []>} : vector<16x512xbf16>, vector<512x256xbf16>, vector<16x256xf32> -> vector<16x256xf32>
    %37 = arith.addf %32, %36 : vector<16x256xf32>
    %38 = vector.extract_strided_slice %9 {offsets = [80, 0], sizes = [16, 512], strides = [1, 1]} : vector<128x512xbf16> to vector<16x512xbf16>
    %c5 = arith.constant 5 : index
    %c0_25 = arith.constant 0 : index
    %c0_26 = arith.constant 0 : index
    %39 = vector.load %arg5[%c5, %c0_25, %c0_26] : memref<8x512x256xbf16, #tpu.memory_space<vmem>>, vector<1x512x256xbf16>
    %40 = vector.shape_cast %39 : vector<1x512x256xbf16> to vector<512x256xbf16>
    %cst_27 = arith.constant dense<0.000000e+00> : vector<16x256xf32>
    %41 = tpu.matmul %38, %40, %cst_27 {dimension_numbers = #tpu.dot_dimension_numbers<[1], [0], [0], [1], [0, 0, 1, 1], [], []>} : vector<16x512xbf16>, vector<512x256xbf16>, vector<16x256xf32> -> vector<16x256xf32>
    %42 = arith.addf %37, %41 : vector<16x256xf32>
    %43 = vector.extract_strided_slice %9 {offsets = [96, 0], sizes = [16, 512], strides = [1, 1]} : vector<128x512xbf16> to vector<16x512xbf16>
    %c6 = arith.constant 6 : index
    %c0_28 = arith.constant 0 : index
    %c0_29 = arith.constant 0 : index
    %44 = vector.load %arg5[%c6, %c0_28, %c0_29] : memref<8x512x256xbf16, #tpu.memory_space<vmem>>, vector<1x512x256xbf16>
    %45 = vector.shape_cast %44 : vector<1x512x256xbf16> to vector<512x256xbf16>
    %cst_30 = arith.constant dense<0.000000e+00> : vector<16x256xf32>
    %46 = tpu.matmul %43, %45, %cst_30 {dimension_numbers = #tpu.dot_dimension_numbers<[1], [0], [0], [1], [0, 0, 1, 1], [], []>} : vector<16x512xbf16>, vector<512x256xbf16>, vector<16x256xf32> -> vector<16x256xf32>
    %47 = arith.addf %42, %46 : vector<16x256xf32>
    %48 = vector.extract_strided_slice %9 {offsets = [112, 0], sizes = [16, 512], strides = [1, 1]} : vector<128x512xbf16> to vector<16x512xbf16>
    %c7 = arith.constant 7 : index
    %c0_31 = arith.constant 0 : index
    %c0_32 = arith.constant 0 : index
    %49 = vector.load %arg5[%c7, %c0_31, %c0_32] : memref<8x512x256xbf16, #tpu.memory_space<vmem>>, vector<1x512x256xbf16>
    %50 = vector.shape_cast %49 : vector<1x512x256xbf16> to vector<512x256xbf16>
    %cst_33 = arith.constant dense<0.000000e+00> : vector<16x256xf32>
    %51 = tpu.matmul %48, %50, %cst_33 {dimension_numbers = #tpu.dot_dimension_numbers<[1], [0], [0], [1], [0, 0, 1, 1], [], []>} : vector<16x512xbf16>, vector<512x256xbf16>, vector<16x256xf32> -> vector<16x256xf32>
    %52 = arith.addf %47, %51 : vector<16x256xf32>
    %cst_34 = arith.constant 0.000000e+00 : f32
    %53 = vector.broadcast %cst_34 : f32 to vector<16x256xf32>
    %54 = arith.cmpf oge, %52, %53 : vector<16x256xf32>
    %cst_35 = arith.constant 1.000000e+00 : f32
    %cst_36 = arith.constant -1.000000e+00 : f32
    %55 = vector.broadcast %cst_35 : f32 to vector<16x256xf32>
    %56 = vector.broadcast %cst_36 : f32 to vector<16x256xf32>
    %57 = arith.select %54, %55, %56 : vector<16x256xi1>, vector<16x256xf32>
    %58 = arith.truncf %57 : vector<16x256xf32> to vector<16x256xbf16>
    %c0_37 = arith.constant 0 : index
    %c0_38 = arith.constant 0 : index
    %59 = vector.load %arg7[%c0_37, %c0_38] : memref<256x768xbf16, #tpu.memory_space<vmem>>, vector<256x768xbf16>
    %cst_39 = arith.constant dense<0.000000e+00> : vector<16x768xf32>
    %60 = tpu.matmul %58, %59, %cst_39 {dimension_numbers = #tpu.dot_dimension_numbers<[1], [0], [0], [1], [0, 0, 1, 1], [], []>} : vector<16x256xbf16>, vector<256x768xbf16>, vector<16x768xf32> -> vector<16x768xf32>
    %c0_40 = arith.constant 0 : index
    %c0_41 = arith.constant 0 : index
    %61 = vector.load %arg8[%c0_40, %c0_41] : memref<1x768xf32, #tpu.memory_space<vmem>>, vector<1x768xf32>
    %62 = vector.broadcast %61 : vector<1x768xf32> to vector<16x768xf32>
    %63 = arith.addf %60, %62 : vector<16x768xf32>
    %c0_42 = arith.constant 0 : index
    %c0_43 = arith.constant 0 : index
    %64 = vector.load %arg2[%c0_42, %c0_43] : memref<16x768xbf16, #tpu.memory_space<vmem>>, vector<16x768xbf16>
    %65 = arith.extf %64 : vector<16x768xbf16> to vector<16x768xf32>
    %66 = arith.subf %63, %65 : vector<16x768xf32>
    %67 = math.absf %66 : vector<16x768xf32>
    %c16_i32 = arith.constant 16 : i32
    %68 = arith.muli %arg0, %c16_i32 : i32
    %69 = tpu.iota {dimensions = array<i32: 0>} : vector<16x1xi32>
    %70 = vector.broadcast %68 : i32 to vector<16x1xi32>
    %71 = arith.addi %70, %69 : vector<16x1xi32>
    %c2_i32 = arith.constant 2 : i32
    %72 = vector.broadcast %c2_i32 : i32 to vector<16x1xi32>
    %73 = arith.cmpi slt, %71, %72 : vector<16x1xi32>
    %cst_44 = arith.constant 0.000000e+00 : f32
    %74 = vector.shape_cast %73 : vector<16x1xi1> to vector<16x1xi1>
    %75 = vector.broadcast %74 : vector<16x1xi1> to vector<16x768xi1>
    %76 = vector.broadcast %cst_44 : f32 to vector<16x768xf32>
    %77 = arith.select %75, %67, %76 : vector<16x768xi1>, vector<16x768xf32>
    %cst_45 = arith.constant dense<0.000000e+00> : vector<768xf32>
    %78 = vector.multi_reduction <add>, %77, %cst_45 [0] : vector<16x768xf32> to vector<768xf32>
    %79 = vector.shape_cast %78 : vector<768xf32> to vector<1x768xf32>
    %80 = vector.shape_cast %79 : vector<1x768xf32> to vector<1x1x768xf32>
    %c0_46 = arith.constant 0 : index
    %c0_47 = arith.constant 0 : index
    %c0_48 = arith.constant 0 : index
    %81 = vector.load %arg9[%c0_46, %c0_47, %c0_48] : memref<1x1x768xf32, #tpu.memory_space<vmem>>, vector<1x1x768xf32>
    tpu.vector_store %arg9[%c0_46, %c0_47, %c0_48], %80 {strides = array<i32>} : memref<1x1x768xf32, #tpu.memory_space<vmem>>, vector<1x1x768xf32>,
    return
  }
  func.func @transform_0(%arg0: i32) -> (i32, i32, i32) {
    %c0_i32 = arith.constant 0 : i32
    %c0_i32_0 = arith.constant 0 : i32
    %c0_i32_1 = arith.constant 0 : i32
    return %c0_i32, %arg0, %c0_i32_0 : i32, i32, i32
  }
  func.func @transform_1(%arg0: i32) -> (i32, i32) {
    %c0_i32 = arith.constant 0 : i32
    %c0_i32_0 = arith.constant 0 : i32
    return %arg0, %c0_i32 : i32, i32
  }
  func.func @transform_2(%arg0: i32) -> (i32, i32) {
    %c0_i32 = arith.constant 0 : i32
    %c0_i32_0 = arith.constant 0 : i32
    %c0_i32_1 = arith.constant 0 : i32
    return %c0_i32, %c0_i32_0 : i32, i32
  }
  func.func @transform_3(%arg0: i32) -> (i32, i32) {
    %c0_i32 = arith.constant 0 : i32
    %c0_i32_0 = arith.constant 0 : i32
    %c0_i32_1 = arith.constant 0 : i32
    return %c0_i32, %c0_i32_0 : i32, i32
  }
  func.func @transform_4(%arg0: i32) -> (i32, i32, i32) {
    %c0_i32 = arith.constant 0 : i32
    %c0_i32_0 = arith.constant 0 : i32
    %c0_i32_1 = arith.constant 0 : i32
    %c0_i32_2 = arith.constant 0 : i32
    return %c0_i32, %c0_i32_0, %c0_i32_1 : i32, i32, i32
  }
  func.func @transform_5(%arg0: i32) -> (i32, i32) {
    %c0_i32 = arith.constant 0 : i32
    %c0_i32_0 = arith.constant 0 : i32
    %c0_i32_1 = arith.constant 0 : i32
    return %c0_i32, %c0_i32_0 : i32, i32
  }
  func.func @transform_6(%arg0: i32) -> (i32, i32) {
    %c0_i32 = arith.constant 0 : i32
    %c0_i32_0 = arith.constant 0 : i32
    %c0_i32_1 = arith.constant 0 : i32
    return %c0_i32, %c0_i32_0 : i32, i32
  }
  func.func @transform_7(%arg0: i32) -> (i32, i32) {
    %c0_i32 = arith.constant 0 : i32
    %c0_i32_0 = arith.constant 0 : i32
    %c0_i32_1 = arith.constant 0 : i32
    return %c0_i32, %c0_i32_0 : i32, i32
  }
  func.func @transform_8(%arg0: i32) -> (i32, i32, i32) {
    %c0_i32 = arith.constant 0 : i32
    %c0_i32_0 = arith.constant 0 : i32
    %c0_i32_1 = arith.constant 0 : i32
    return %arg0, %c0_i32, %c0_i32_0 : i32, i32, i32
  }
}

</mosaic_0001>

<bundles_post_ra>
// kernel: masked_binet_forward.1
= control target key start
LH: loop header
LB: loop body
LE: loop exit
PB: predicated region body
PF: predicated region fallthrough
CT: control target
= control target key end

     0   :  { %13 = vsyncpa [#allocation3], 0  ;;  %s10958_s0 = inlined_call_operand.vmem [shape: bf16[8,16,768], index: 0, kind: input, shape index: {}]   ;;  %s10959_s1 = inlined_call_operand.vmem [shape: bf16[16,768], index: 1, kind: input, shape index: {}]   ;;  %s10960_s2 = inlined_call_operand.vmem [shape: bf16[768,512], index: 2, kind: input, shape index: {}]   ;;  %s10961_s3 = inlined_call_operand.hbm [shape: f32[1,512], index: 3, kind: input, shape index: {}]   ;;  %s10962_s4 = inlined_call_operand.hbm [shape: bf16[8,512,256], index: 4, kind: input, shape index: {}]   ;;  %s10963_s5 = inlined_call_operand.hbm [shape: f32[1,256], index: 5, kind: input, shape index: {}]   ;;  %s10964_s6 = inlined_call_operand.vmem [shape: bf16[256,768], index: 6, kind: input, shape index: {}]   ;;  %s10965_s7 = inlined_call_operand.hbm [shape: f32[1,768], index: 7, kind: input, shape index: {}]   ;;  %s10966_s8 = inlined_call_operand.vmem [shape: f32[1,1,768], index: 8, kind: output, shape index: {}]  }
   0x1   :  { %14 = vsyncpa [#allocation5], 0 }
   0x2   :  { %15 = vsyncpa [#allocation8], 0  ;;  %s9270_s27 = smov [#allocation4]  }
   0x3   :  { %s37_s28 = sshll.u32 %s9270_s27, 4  ;;  %s38_s28 = int_to_ptr.vmem [resolvable:$true] %s37_s28 }
   0x4   :  { %s9192_s29 = scalar_lea.vmem %s38_s28, 65536  ;;  %p9197_p1 = scmp.lt.s32.totalorder %s38_s28, %s38_s28 }
   0x5   :  { %p9193_p0 = scmp.ne.s32.totalorder %s38_s28, %s9192_s29  ;;  %p9198_p2 = scmp.lt.s32.totalorder %s9192_s29, %s9192_s29 }
   0x7   :  { %p9199_p3 = por %p9198_p2, %p9197_p1 }
   0x9   :  { %p9200_p4 = pnand %p9199_p3, %p9193_p0 }
   0xb   :  { %9203 = shalt.err (!%p9200_p4)
}
   0xc   :  { %s9271_s30 = smov 128   ;;  %s9272_s9 = smov 8  }
   0xd   :  { %43 = dma.hbm_to_vmem [thread:$0]  %s10962_s4, 65536, %s38_s28, [#allocation5], %s9271_s30, %s9271_s30, %s9272_s9  }
   0xe   :  { %s9273_s12 = smov [#allocation2]   ;;  %s9274_s14 = smov [#allocation6]  }
   0xf   :  { %s28_s13 = sshll.u32 %s9273_s12, 4  ;;  %s50_s15 = sshll.u32 %s9274_s14, 4  ;;  %s29_s13 = int_to_ptr.vmem [resolvable:$true] %s28_s13  ;;  %s51_s15 = int_to_ptr.vmem [resolvable:$true] %s50_s15 }
  0x10   :  { %s9212_s16 = scalar_lea.vmem %s29_s13, 64  ;;  %p9217_p6 = scmp.lt.s32.totalorder %s29_s13, %s29_s13 }
  0x11   :  { %p9213_p5 = scmp.ne.s32.totalorder %s29_s13, %s9212_s16  ;;  %p9218_p7 = scmp.lt.s32.totalorder %s9212_s16, %s9212_s16 }
  0x13   :  { %p9219_p8 = por %p9218_p7, %p9217_p6 }
  0x15   :  { %p9220_p9 = pnand %p9219_p8, %p9213_p5 }
  0x17   :  { %9223 = shalt.err (!%p9220_p9)
}
  0x18   :  { %31 = dma.hbm_to_vmem [thread:$0]  %s10961_s3, 64, %s29_s13, [#allocation3]  }
  0x19   :  { %s9232_s19 = scalar_lea.vmem %s51_s15, 32  ;;  %p9237_p11 = scmp.lt.s32.totalorder %s51_s15, %s51_s15 }
  0x1a   :  { %p9233_p10 = scmp.ne.s32.totalorder %s51_s15, %s9232_s19  ;;  %p9238_p12 = scmp.lt.s32.totalorder %s9232_s19, %s9232_s19 }
  0x1c   :  { %p9239_p13 = por %p9238_p12, %p9237_p11 }
  0x1e   :  { %p9240_p0 = pnand %p9239_p13, %p9233_p10 }
  0x20   :  { %9243 = shalt.err (!%p9240_p0)
}
  0x21   :  { %53 = dma.hbm_to_vmem [thread:$0]  %s10963_s5, 32, %s51_s15, [#allocation5]  }
  0x22   :  { %s9275_s21 = smov [#allocation7]  }
  0x23   :  { %s62_s22 = sshll.u32 %s9275_s21, 4  ;;  %s63_s22 = int_to_ptr.vmem [resolvable:$true] %s62_s22 }
  0x24   :  { %s9252_s23 = scalar_lea.vmem %s63_s22, 96  ;;  %p9257_p2 = scmp.lt.s32.totalorder %s63_s22, %s63_s22 }
  0x25   :  { %p9253_p1 = scmp.ne.s32.totalorder %s63_s22, %s9252_s23  ;;  %p9258_p3 = scmp.lt.s32.totalorder %s9252_s23, %s9252_s23 }
  0x27   :  { %p9259_p4 = por %p9258_p3, %p9257_p2 }
  0x29   :  { %p9260_p5 = pnand %p9259_p4, %p9253_p1 }
  0x2b   :  { %9263 = shalt.err (!%p9260_p5)
}
  0x2c   :  { %65 = dma.hbm_to_vmem [thread:$0]  %s10965_s7, 96, %s63_s22, [#allocation8]  }
  0x2d   :  { %9264 = dma.done.wait [#allocation3], 64  }
  0x2e   :  { %9265 = vsyncadd [#allocation3], 4294967232 }
  0x2f   :  { %9266 = dma.done.wait [#allocation5], 65568  }
  0x30   :  { %9267 = vsyncadd [#allocation5], 4294901728 }
  0x31   :  { %9268 = dma.done.wait [#allocation8], 96  }
  0x32   :  { %9269 = vsyncadd [#allocation8], 4294967200  ;;  %v7896_v0 = vld [vmem:[%s10960_s2 + $0xe4] ss:$16 sps:$4 sm:$0xff]   ;;  %v7900_v2 = vld [vmem:[%s10960_s2 + $0xe0] ss:$16 sps:$4 sm:$0xff]  }
  0x33   :  { %v7898_v1 = vld [vmem:[%s10960_s2 + $0x2e4] ss:$16 sps:$4 sm:$0xff]   ;;  %1540 = vmatprep.subr.bf16.mxu0 %v7896_v0  ;;  %v7901_v3 = vld [vmem:[%s10960_s2 + $0x2e0] ss:$16 sps:$4 sm:$0xff]  }
  0x34   :  { %1653 = vmatprep.subr.bf16.mxu1 %v7898_v1  ;;  %v7902_v4 = vld [vmem:[%s10960_s2 + $0xc4] ss:$16 sps:$4 sm:$0xff]   ;;  %1541 = vmatpush1.bf16.msra.mxu0 %v7900_v2  ;;  %v7906_v6 = vld [vmem:[%s10960_s2 + $0xc0] ss:$16 sps:$4 sm:$0xff]  }
  0x35   :  { %1654 = vmatpush1.bf16.msra.mxu1 %v7901_v3  ;;  %v7904_v5 = vld [vmem:[%s10960_s2 + $0x2c4] ss:$16 sps:$4 sm:$0xff]   ;;  %1542 = vmatprep.subr.bf16.mxu0 %v7902_v4  ;;  %v7907_v7 = vld [vmem:[%s10960_s2 + $0x2c0] ss:$16 sps:$4 sm:$0xff]   ;;  %v8003_v3 = vld [vmem:[%s10960_s2 + $0xec] ss:$16 sps:$4 sm:$0xff]  }
  0x36   :  { %1655 = vmatprep.subr.bf16.mxu1 %v7904_v5  ;;  %v7908_v8 = vld [vmem:[%s10960_s2 + $0xa4] ss:$16 sps:$4 sm:$0xff]   ;;  %v7912_v10 = vld [vmem:[%s10960_s2 + $0xa0] ss:$16 sps:$4 sm:$0xff]  }
  0x37   :  { %v7910_v9 = vld [vmem:[%s10960_s2 + $0x2a4] ss:$16 sps:$4 sm:$0xff]   ;;  %v7913_v11 = vld [vmem:[%s10960_s2 + $0x2a0] ss:$16 sps:$4 sm:$0xff]  }
  0x38   :  { %1543 = vmatpush1.bf16.msra.mxu0 %v7906_v6  ;;  %v7914_v12 = vld [vmem:[%s10960_s2 + $0x84] ss:$16 sps:$4 sm:$0xff]   ;;  %v7918_v14 = vld [vmem:[%s10960_s2 + $0x80] ss:$16 sps:$4 sm:$0xff]  }
  0x39   :  { %1656 = vmatpush1.bf16.msra.mxu1 %v7907_v7  ;;  %1544 = vmatprep.subr.bf16.mxu0 %v7908_v8  ;;  %v7916_v13 = vld [vmem:[%s10960_s2 + $0x284] ss:$16 sps:$4 sm:$0xff]   ;;  %v7919_v15 = vld [vmem:[%s10960_s2 + $0x280] ss:$16 sps:$4 sm:$0xff]   ;;  %v8001_v7 = vld [vmem:[%s10960_s2 + $0xe8] ss:$16 sps:$4 sm:$0xff]  }
  0x3a   :  { %1657 = vmatprep.subr.bf16.mxu1 %v7910_v9  ;;  %v7920_v16 = vld [vmem:[%s10960_s2 + $0x64] ss:$16 sps:$4 sm:$0xff]   ;;  %v7924_v18 = vld [vmem:[%s10960_s2 + $0x60] ss:$16 sps:$4 sm:$0xff]   ;;  %v8009_v9 = vld [vmem:[%s10960_s2 + $0xcc] ss:$16 sps:$4 sm:$0xff]  }
  0x3b   :  { %v7922_v17 = vld [vmem:[%s10960_s2 + $0x264] ss:$16 sps:$4 sm:$0xff]   ;;  %v7925_v19 = vld [vmem:[%s10960_s2 + $0x260] ss:$16 sps:$4 sm:$0xff]  }
  0x3c   :  { %1545 = vmatpush1.bf16.msra.mxu0 %v7912_v10  ;;  %v7926_v20 = vld [vmem:[%s10960_s2 + $0x44] ss:$16 sps:$4 sm:$0xff]   ;;  %v7930_v22 = vld [vmem:[%s10960_s2 + $0x40] ss:$16 sps:$4 sm:$0xff]  }
  0x3d   :  { %1658 = vmatpush1.bf16.msra.mxu1 %v7913_v11  ;;  %1546 = vmatprep.subr.bf16.mxu0 %v7914_v12  ;;  %v7928_v21 = vld [vmem:[%s10960_s2 + $0x244] ss:$16 sps:$4 sm:$0xff]   ;;  %v7931_v23 = vld [vmem:[%s10960_s2 + $0x240] ss:$16 sps:$4 sm:$0xff]  }
  0x3e   :  { %1659 = vmatprep.subr.bf16.mxu1 %v7916_v13  ;;  %v7932_v24 = vld [vmem:[%s10960_s2 + $0x24] ss:$16 sps:$4 sm:$0xff]   ;;  %v7936_v26 = vld [vmem:[%s10960_s2 + $0x20] ss:$16 sps:$4 sm:$0xff]   ;;  %v8007_v13 = vld [vmem:[%s10960_s2 + $0xc8] ss:$16 sps:$4 sm:$0xff]  }
  0x3f   :  { %v7934_v25 = vld [vmem:[%s10960_s2 + $0x224] ss:$16 sps:$4 sm:$0xff]   ;;  %v7937_v27 = vld [vmem:[%s10960_s2 + $0x220] ss:$16 sps:$4 sm:$0xff]  }
  0x40   :  { %1547 = vmatpush1.bf16.msra.mxu0 %v7918_v14  ;;  %v7938_v28 = vld [vmem:[%s10960_s2 + $0x4] ss:$16 sps:$4 sm:$0xff]   ;;  %v7942_v30 = vld [vmem:[%s10960_s2] ss:$16 sps:$4 sm:$0xff]  }
  0x41   :  { %1660 = vmatpush1.bf16.msra.mxu1 %v7919_v15  ;;  %1548 = vmatprep.subr.bf16.mxu0 %v7920_v16  ;;  %v7940_v29 = vld [vmem:[%s10960_s2 + $0x204] ss:$16 sps:$4 sm:$0xff]   ;;  %v7943_v31 = vld [vmem:[%s10960_s2 + $0x200] ss:$16 sps:$4 sm:$0xff]   ;;  %v8021_v15 = vld [vmem:[%s10960_s2 + $0xac] ss:$16 sps:$4 sm:$0xff]  }
  0x42   :  { %1661 = vmatprep.subr.bf16.mxu1 %v7922_v17  ;;  %v7944_v32 = vld [vmem:[%s10960_s2 + $0x1e4] ss:$16 sps:$4 sm:$0xff]   ;;  %v7948_v34 = vld [vmem:[%s10960_s2 + $0x1e0] ss:$16 sps:$4 sm:$0xff]  }
  0x43   :  { %v7946_v33 = vld [vmem:[%s10960_s2 + $0x3e4] ss:$16 sps:$4 sm:$0xff]   ;;  %v7949_v35 = vld [vmem:[%s10960_s2 + $0x3e0] ss:$16 sps:$4 sm:$0xff]  }
  0x44   :  { %1549 = vmatpush1.bf16.msra.mxu0 %v7924_v18  ;;  %v7950_v36 = vld [vmem:[%s10960_s2 + $0x1c4] ss:$16 sps:$4 sm:$0xff]   ;;  %v7954_v38 = vld [vmem:[%s10960_s2 + $0x1c0] ss:$16 sps:$4 sm:$0xff]  }
  0x45   :  { %1662 = vmatpush1.bf16.msra.mxu1 %v7925_v19  ;;  %1550 = vmatprep.subr.bf16.mxu0 %v7926_v20  ;;  %v7952_v37 = vld [vmem:[%s10960_s2 + $0x3c4] ss:$16 sps:$4 sm:$0xff]   ;;  %v7955_v39 = vld [vmem:[%s10960_s2 + $0x3c0] ss:$16 sps:$4 sm:$0xff]   ;;  %v8019_v19 = vld [vmem:[%s10960_s2 + $0xa8] ss:$16 sps:$4 sm:$0xff]  }
  0x46   :  { %1663 = vmatprep.subr.bf16.mxu1 %v7928_v21  ;;  %v7956_v40 = vld [vmem:[%s10960_s2 + $0x1a4] ss:$16 sps:$4 sm:$0xff]   ;;  %v7960_v42 = vld [vmem:[%s10960_s2 + $0x1a0] ss:$16 sps:$4 sm:$0xff]   ;;  %v8027_v21 = vld [vmem:[%s10960_s2 + $0x8c] ss:$16 sps:$4 sm:$0xff]  }
  0x47   :  { %v7958_v41 = vld [vmem:[%s10960_s2 + $0x3a4] ss:$16 sps:$4 sm:$0xff]   ;;  %v7961_v43 = vld [vmem:[%s10960_s2 + $0x3a0] ss:$16 sps:$4 sm:$0xff]  }
  0x48   :  { %1551 = vmatpush1.bf16.msra.mxu0 %v7930_v22  ;;  %v7962_v44 = vld [vmem:[%s10960_s2 + $0x184] ss:$16 sps:$4 sm:$0xff]   ;;  %v7966_v46 = vld [vmem:[%s10960_s2 + $0x180] ss:$16 sps:$4 sm:$0xff]  }
  0x49   :  { %1664 = vmatpush1.bf16.msra.mxu1 %v7931_v23  ;;  %1552 = vmatprep.subr.bf16.mxu0 %v7932_v24  ;;  %v7964_v45 = vld [vmem:[%s10960_s2 + $0x384] ss:$16 sps:$4 sm:$0xff]   ;;  %v7967_v47 = vld [vmem:[%s10960_s2 + $0x380] ss:$16 sps:$4 sm:$0xff]  }
  0x4a   :  { %1665 = vmatprep.subr.bf16.mxu1 %v7934_v25  ;;  %v7968_v48 = vld [vmem:[%s10960_s2 + $0x164] ss:$16 sps:$4 sm:$0xff]   ;;  %v7972_v52 = vld [vmem:[%s10960_s2 + $0x160] ss:$16 sps:$4 sm:$0xff]   ;;  %v8025_v25 = vld [vmem:[%s10960_s2 + $0x88] ss:$16 sps:$4 sm:$0xff]  }
  0x4b   :  { %v9485_v49 = vld [vmem:[%s10958_s0 + $0x4] ss:$24 sps:$4 sm:$0xff]   ;;  %v7973_v53 = vld [vmem:[%s10960_s2 + $0x360] ss:$16 sps:$4 sm:$0xff]   ;;  %v9565_v10 = vld [vmem:[%s10958_s0 + $0x34] ss:$24 sps:$4 sm:$0xff]  }
  0x4c   :  { %1553 = vmatpush1.bf16.msra.mxu0 %v7936_v26  ;;  %v7970_v50 = vld [vmem:[%s10960_s2 + $0x364] ss:$16 sps:$4 sm:$0xff]   ;;  %1572 = vmatprep.mubr.bf16.mxu0 %v9485_v49  ;;  %v7978_v56 = vld [vmem:[%s10960_s2 + $0x140] ss:$16 sps:$4 sm:$0xff]  }
  0x4d   :  { %1666 = vmatpush1.bf16.msra.mxu1 %v7937_v27  ;;  %1554 = vmatprep.subr.bf16.mxu0 %v7938_v28  ;;  %v7997_v51 = vld [vmem:[%s10958_s0 + $0xc] ss:$24 sps:$4 sm:$0xff]   ;;  %v7979_v57 = vld [vmem:[%s10960_s2 + $0x340] ss:$16 sps:$4 sm:$0xff]   ;;  %v8012_v11 = vld [vmem:[%s10958_s0 + $0x3c] ss:$24 sps:$4 sm:$0xff]  }
  0x4e   :  { %1667 = vmatprep.subr.bf16.mxu1 %v7940_v29  ;;  %1685 = vmatprep.mubr.bf16.mxu1 %v7997_v51  ;;  %v7974_v54 = vld [vmem:[%s10960_s2 + $0x144] ss:$16 sps:$4 sm:$0xff]   ;;  %v7984_v60 = vld [vmem:[%s10960_s2 + $0x120] ss:$16 sps:$4 sm:$0xff]   ;;  %v8039_v27 = vld [vmem:[%s10960_s2 + $0x6c] ss:$16 sps:$4 sm:$0xff]  }
  0x4f   :  { %v7976_v55 = vld [vmem:[%s10960_s2 + $0x344] ss:$16 sps:$4 sm:$0xff]   ;;  %v7985_v61 = vld [vmem:[%s10960_s2 + $0x320] ss:$16 sps:$4 sm:$0xff]  }
  0x50   :  { %1555 = vmatpush1.bf16.msra.mxu0 %v7942_v30  ;;  %v7980_v58 = vld [vmem:[%s10960_s2 + $0x124] ss:$16 sps:$4 sm:$0xff]   ;;  %v7990_v0 = vld [vmem:[%s10960_s2 + $0x100] ss:$16 sps:$4 sm:$0xff]  }
  0x51   :  { %1668 = vmatpush1.bf16.msra.mxu1 %v7943_v31  ;;  %1556 = vmatprep.subr.bf16.mxu0 %v7944_v32  ;;  %v7982_v59 = vld [vmem:[%s10960_s2 + $0x324] ss:$16 sps:$4 sm:$0xff]   ;;  %v7991_v1 = vld [vmem:[%s10960_s2 + $0x300] ss:$16 sps:$4 sm:$0xff]   ;;  %v8037_v31 = vld [vmem:[%s10960_s2 + $0x68] ss:$16 sps:$4 sm:$0xff]  }
  0x52   :  { %1669 = vmatprep.subr.bf16.mxu1 %v7946_v33  ;;  %v7986_v62 = vld [vmem:[%s10960_s2 + $0x104] ss:$16 sps:$4 sm:$0xff]   ;;  %v9545_v4 = vld [vmem:[%s10958_s0] ss:$24 sps:$4 sm:$0xff]   ;;  %v9587_v16 = vld [vmem:[%s10958_s0 + $0x30] ss:$24 sps:$4 sm:$0xff]  }
  0x53   :  { %v7988_v63 = vld [vmem:[%s10960_s2 + $0x304] ss:$16 sps:$4 sm:$0xff]   ;;  %v7995_v5 = vld [vmem:[%s10958_s0 + $0x8] ss:$24 sps:$4 sm:$0xff]   ;;  %v8015_v17 = vld [vmem:[%s10958_s0 + $0x38] ss:$24 sps:$4 sm:$0xff]  }
  0x54   :  { %1557 = vmatpush2.bf16.msra.mxu0 %v7948_v34  ;;  %v8000_v2 = vld [vmem:[%s10960_s2 + $0x4e4] ss:$16 sps:$4 sm:$0xff]   ;;  %v7998_v6 = vld [vmem:[%s10960_s2 + $0x4e0] ss:$16 sps:$4 sm:$0xff]   ;;  %v8045_v33 = vld [vmem:[%s10960_s2 + $0x4c] ss:$16 sps:$4 sm:$0xff]  }
  0x55   :  { %1670 = vmatpush2.bf16.msra.mxu1 %v7949_v35  ;;  %1558 = vmatprep.subr.bf16.mxu0 %v7950_v36  ;;  %v8006_v8 = vld [vmem:[%s10960_s2 + $0x4c4] ss:$16 sps:$4 sm:$0xff]   ;;  %v8004_v12 = vld [vmem:[%s10960_s2 + $0x4c0] ss:$16 sps:$4 sm:$0xff]  }
  0x56   :  { %1671 = vmatprep.subr.bf16.mxu1 %v7952_v37  ;;  %v8018_v14 = vld [vmem:[%s10960_s2 + $0x4a4] ss:$16 sps:$4 sm:$0xff]   ;;  %v8016_v18 = vld [vmem:[%s10960_s2 + $0x4a0] ss:$16 sps:$4 sm:$0xff]   ;;  %v8043_v37 = vld [vmem:[%s10960_s2 + $0x48] ss:$16 sps:$4 sm:$0xff]  }
  0x57   :  { %v8024_v20 = vld [vmem:[%s10960_s2 + $0x484] ss:$16 sps:$4 sm:$0xff]   ;;  %v8022_v24 = vld [vmem:[%s10960_s2 + $0x480] ss:$16 sps:$4 sm:$0xff]  }
  0x58   :  { %1559 = vmatpush2.bf16.msra.mxu0 %v7954_v38  ;;  %v9607_v22 = vld [vmem:[%s10958_s0 + $0x64] ss:$24 sps:$4 sm:$0xff]   ;;  %v9629_v28 = vld [vmem:[%s10958_s0 + $0x60] ss:$24 sps:$4 sm:$0xff]   ;;  %v9649_v34 = vld [vmem:[%s10958_s0 + $0x94] ss:$24 sps:$4 sm:$0xff]  }
  0x59   :  { %1672 = vmatpush2.bf16.msra.mxu1 %v7955_v39  ;;  %1560 = vmatprep.subr.bf16.mxu0 %v7956_v40  ;;  %v8030_v23 = vld [vmem:[%s10958_s0 + $0x6c] ss:$24 sps:$4 sm:$0xff]   ;;  %v8033_v29 = vld [vmem:[%s10958_s0 + $0x68] ss:$24 sps:$4 sm:$0xff]   ;;  %v8048_v35 = vld [vmem:[%s10958_s0 + $0x9c] ss:$24 sps:$4 sm:$0xff]  }
  0x5a   :  { %1673 = vmatprep.subr.bf16.mxu1 %v7958_v41  ;;  %v8036_v26 = vld [vmem:[%s10960_s2 + $0x464] ss:$16 sps:$4 sm:$0xff]   ;;  %v8034_v30 = vld [vmem:[%s10960_s2 + $0x460] ss:$16 sps:$4 sm:$0xff]   ;;  %v8057_v39 = vld [vmem:[%s10960_s2 + $0x2c] ss:$16 sps:$4 sm:$0xff]  }
  0x5b   :  { %v8042_v32 = vld [vmem:[%s10960_s2 + $0x444] ss:$16 sps:$4 sm:$0xff]   ;;  %v8040_v36 = vld [vmem:[%s10960_s2 + $0x440] ss:$16 sps:$4 sm:$0xff]  }
  0x5c   :  { %1561 = vmatpush2.bf16.msra.mxu0 %v7960_v42  ;;  %v8054_v38 = vld [vmem:[%s10960_s2 + $0x424] ss:$16 sps:$4 sm:$0xff]   ;;  %v9671_v40 = vld [vmem:[%s10958_s0 + $0x90] ss:$24 sps:$4 sm:$0xff]  }
  0x5d   :  { %1674 = vmatpush2.bf16.msra.mxu1 %v7961_v43  ;;  %1562 = vmatprep.subr.bf16.mxu0 %v7962_v44  ;;  %v8051_v41 = vld [vmem:[%s10958_s0 + $0x98] ss:$24 sps:$4 sm:$0xff]   ;;  %v8060_v44 = vld [vmem:[%s10960_s2 + $0x404] ss:$16 sps:$4 sm:$0xff]  }
  0x5e   :  { %1675 = vmatprep.subr.bf16.mxu1 %v7964_v45  ;;  %v8052_v42 = vld [vmem:[%s10960_s2 + $0x420] ss:$16 sps:$4 sm:$0xff]   ;;  %v8055_v43 = vld [vmem:[%s10960_s2 + $0x28] ss:$16 sps:$4 sm:$0xff]   ;;  %v8063_v45 = vld [vmem:[%s10960_s2 + $0xc] ss:$16 sps:$4 sm:$0xff]  }
  0x5f   :  { %v8072_v51 = vld [vmem:[%s10960_s2 + $0x5e4] ss:$16 sps:$4 sm:$0xff]  }
  0x60   :  { %1563 = vmatpush2.bf16.msra.mxu0 %v7966_v46  ;;  %v9691_v46 = vld [vmem:[%s10958_s0 + $0xc4] ss:$24 sps:$4 sm:$0xff]  }
  0x61   :  { %1676 = vmatpush2.bf16.msra.mxu1 %v7967_v47  ;;  %1564 = vmatprep.subr.bf16.mxu0 %v7968_v48  ;;  %v8066_v47 = vld [vmem:[%s10958_s0 + $0xcc] ss:$24 sps:$4 sm:$0xff]   ;;  %v8058_v48 = vld [vmem:[%s10960_s2 + $0x400] ss:$16 sps:$4 sm:$0xff]  }
  0x62   :  { %1677 = vmatprep.subr.bf16.mxu1 %v7970_v50  ;;  %v8061_v50 = vld [vmem:[%s10960_s2 + $0x8] ss:$16 sps:$4 sm:$0xff]  }
  0x64   :  { %1565 = vmatpush2.bf16.msra.mxu0 %v7972_v52  ;;  %v8075_v52 = vld [vmem:[%s10960_s2 + $0x1ec] ss:$16 sps:$4 sm:$0xff]  }
  0x65   :  { %1678 = vmatpush2.bf16.msra.mxu1 %v7973_v53  ;;  %1566 = vmatprep.subr.bf16.mxu0 %v7974_v54  ;;  %v9713_v53 = vld [vmem:[%s10958_s0 + $0xc0] ss:$24 sps:$4 sm:$0xff]  }
  0x66   :  { %1679 = vmatprep.subr.bf16.mxu1 %v7976_v55  ;;  %v8069_v54 = vld [vmem:[%s10958_s0 + $0xc8] ss:$24 sps:$4 sm:$0xff]  }
  0x67   :  { %v8070_v55 = vld [vmem:[%s10960_s2 + $0x5e0] ss:$16 sps:$4 sm:$0xff]  }
  0x68   :  { %1567 = vmatpush2.bf16.msra.mxu0 %v7978_v56  ;;  %v8073_v56 = vld [vmem:[%s10960_s2 + $0x1e8] ss:$16 sps:$4 sm:$0xff]  }
  0x69   :  { %1680 = vmatpush2.bf16.msra.mxu1 %v7979_v57  ;;  %1568 = vmatprep.subr.bf16.mxu0 %v7980_v58  ;;  %v8078_v57 = vld [vmem:[%s10960_s2 + $0x5c4] ss:$16 sps:$4 sm:$0xff]   ;;  %v8081_v58 = vld [vmem:[%s10960_s2 + $0x1cc] ss:$16 sps:$4 sm:$0xff]  }
  0x6a   :  { %1681 = vmatprep.subr.bf16.mxu1 %v7982_v59  ;;  %v9733_v59 = vld [vmem:[%s10958_s0 + $0xf4] ss:$24 sps:$4 sm:$0xff]  }
  0x6c   :  { %1569 = vmatpush2.bf16.msra.mxu0 %v7984_v60  ;;  %v8084_v60 = vld [vmem:[%s10958_s0 + $0xfc] ss:$24 sps:$4 sm:$0xff]  }
  0x6d   :  { %1682 = vmatpush2.bf16.msra.mxu1 %v7985_v61  ;;  %1570 = vmatprep.subr.bf16.mxu0 %v7986_v62  ;;  %v8076_v61 = vld [vmem:[%s10960_s2 + $0x5c0] ss:$16 sps:$4 sm:$0xff]   ;;  %v8079_v62 = vld [vmem:[%s10960_s2 + $0x1c8] ss:$16 sps:$4 sm:$0xff]  }
  0x6e   :  { %1683 = vmatprep.subr.bf16.mxu1 %v7988_v63  ;;  %v8090_v63 = vld [vmem:[%s10960_s2 + $0x5a4] ss:$16 sps:$4 sm:$0xff]  }
  0x70   :  { %1571 = vmatpush2.bf16.msra.mxu0 %v7990_v0  ;;  %v8093_v0 = vld [vmem:[%s10960_s2 + $0x1ac] ss:$16 sps:$4 sm:$0xff]  }
  0x71   :  { %1684 = vmatpush2.bf16.msra.mxu1 %v7991_v1  ;;  %1766 = vmatprep.subr.bf16.mxu0 %v8000_v2  ;;  %v9755_v1 = vld [vmem:[%s10958_s0 + $0xf0] ss:$24 sps:$4 sm:$0xff]  }
  0x72   :  { %1879 = vmatprep.subr.bf16.mxu1 %v8003_v3  ;;  %v8087_v2 = vld [vmem:[%s10958_s0 + $0xf8] ss:$24 sps:$4 sm:$0xff]  }
  0x73   :  { %1573 = vmatmul.mubr.bf16.vlgmr.msra.gmra.mxu0 %v9545_v4  ;;  %v8088_v3 = vld [vmem:[%s10960_s2 + $0x5a0] ss:$16 sps:$4 sm:$0xff]  }
  0x74   :  { %1686 = vmatmul.mubr.bf16.vlgmr.msra.gmra.mxu1 %v7995_v5  ;;  %1767 = vmatpush1.bf16.msra.mxu0 %v7998_v6  ;;  %v8091_v5 = vld [vmem:[%s10960_s2 + $0x1a8] ss:$16 sps:$4 sm:$0xff]   ;;  %v8096_v6 = vld [vmem:[%s10960_s2 + $0x584] ss:$16 sps:$4 sm:$0xff]  }
  0x75   :  { %1880 = vmatpush1.bf16.msra.mxu1 %v8001_v7  ;;  %1768 = vmatprep.subr.bf16.mxu0 %v8006_v8  ;;  %v8099_v7 = vld [vmem:[%s10960_s2 + $0x18c] ss:$16 sps:$4 sm:$0xff]  }
  0x76   :  { %1881 = vmatprep.subr.bf16.mxu1 %v8009_v9  ;;  %1582 = vmatprep.mubr.bf16.mxu0 %v9565_v10  ;;  %v9775_v8 = vld [vmem:[%s10958_s0 + $0x124] ss:$24 sps:$4 sm:$0xff]  }
  0x77   :  { %1695 = vmatprep.mubr.bf16.mxu1 %v8012_v11  ;;  %v8102_v9 = vld [vmem:[%s10958_s0 + $0x12c] ss:$24 sps:$4 sm:$0xff]   ;;  %v8094_v11 = vld [vmem:[%s10960_s2 + $0x580] ss:$16 sps:$4 sm:$0xff]  }
  0x78   :  { %1769 = vmatpush1.bf16.msra.mxu0 %v8004_v12  ;;  %v8097_v12 = vld [vmem:[%s10960_s2 + $0x188] ss:$16 sps:$4 sm:$0xff]  }
  0x79   :  { %1882 = vmatpush1.bf16.msra.mxu1 %v8007_v13  ;;  %1770 = vmatprep.subr.bf16.mxu0 %v8018_v14  ;;  %v8108_v13 = vld [vmem:[%s10960_s2 + $0x564] ss:$16 sps:$4 sm:$0xff]   ;;  %v8111_v14 = vld [vmem:[%s10960_s2 + $0x16c] ss:$16 sps:$4 sm:$0xff]  }
  0x7a   :  { %1883 = vmatprep.subr.bf16.mxu1 %v8021_v15  ;;  %v9797_v15 = vld [vmem:[%s10958_s0 + $0x120] ss:$24 sps:$4 sm:$0xff]  }
  0x7b   :  { %1583 = vmatmul.mubr.bf16.gmra.mxu0 %v9587_v16 }
  0x7c   :  { %1696 = vmatmul.mubr.bf16.gmra.mxu1 %v8015_v17  ;;  %1771 = vmatpush1.bf16.msra.mxu0 %v8016_v18  ;;  %v8105_v17 = vld [vmem:[%s10958_s0 + $0x128] ss:$24 sps:$4 sm:$0xff]  }
  0x7d   :  { %1884 = vmatpush1.bf16.msra.mxu1 %v8019_v19  ;;  %1772 = vmatprep.subr.bf16.mxu0 %v8024_v20  ;;  %v8106_v18 = vld [vmem:[%s10960_s2 + $0x560] ss:$16 sps:$4 sm:$0xff]   ;;  %v8109_v19 = vld [vmem:[%s10960_s2 + $0x168] ss:$16 sps:$4 sm:$0xff]   ;;  %v8114_v20 = vld [vmem:[%s10960_s2 + $0x544] ss:$16 sps:$4 sm:$0xff]  }
  0x7e   :  { %1885 = vmatprep.subr.bf16.mxu1 %v8027_v21  ;;  %1592 = vmatprep.mubr.bf16.mxu0 %v9607_v22  ;;  %v8117_v21 = vld [vmem:[%s10960_s2 + $0x14c] ss:$16 sps:$4 sm:$0xff]  }
  0x7f   :  { %1705 = vmatprep.mubr.bf16.mxu1 %v8030_v23  ;;  %v9817_v23 = vld [vmem:[%s10958_s0 + $0x154] ss:$24 sps:$4 sm:$0xff]  }
  0x80   :  { %1773 = vmatpush1.bf16.msra.mxu0 %v8022_v24  ;;  %v8120_v24 = vld [vmem:[%s10958_s0 + $0x15c] ss:$24 sps:$4 sm:$0xff]  }
  0x81   :  { %1886 = vmatpush1.bf16.msra.mxu1 %v8025_v25  ;;  %1774 = vmatprep.subr.bf16.mxu0 %v8036_v26  ;;  %v8112_v25 = vld [vmem:[%s10960_s2 + $0x540] ss:$16 sps:$4 sm:$0xff]   ;;  %v8115_v26 = vld [vmem:[%s10960_s2 + $0x148] ss:$16 sps:$4 sm:$0xff]  }
  0x82   :  { %1887 = vmatprep.subr.bf16.mxu1 %v8039_v27  ;;  %v8126_v27 = vld [vmem:[%s10960_s2 + $0x524] ss:$16 sps:$4 sm:$0xff]  }
  0x83   :  { %1593 = vmatmul.mubr.bf16.gmra.mxu0 %v9629_v28 }
  0x84   :  { %1706 = vmatmul.mubr.bf16.gmra.mxu1 %v8033_v29  ;;  %1775 = vmatpush1.bf16.msra.mxu0 %v8034_v30  ;;  %v8129_v29 = vld [vmem:[%s10960_s2 + $0x12c] ss:$16 sps:$4 sm:$0xff]   ;;  %v9839_v30 = vld [vmem:[%s10958_s0 + $0x150] ss:$24 sps:$4 sm:$0xff]  }
  0x85   :  { %1888 = vmatpush1.bf16.msra.mxu1 %v8037_v31  ;;  %1776 = vmatprep.subr.bf16.mxu0 %v8042_v32  ;;  %v8123_v31 = vld [vmem:[%s10958_s0 + $0x158] ss:$24 sps:$4 sm:$0xff]  }
  0x86   :  { %1889 = vmatprep.subr.bf16.mxu1 %v8045_v33  ;;  %1602 = vmatprep.mubr.bf16.mxu0 %v9649_v34  ;;  %v8124_v32 = vld [vmem:[%s10960_s2 + $0x520] ss:$16 sps:$4 sm:$0xff]   ;;  %v8127_v33 = vld [vmem:[%s10960_s2 + $0x128] ss:$16 sps:$4 sm:$0xff]  }
  0x87   :  { %1715 = vmatprep.mubr.bf16.mxu1 %v8048_v35  ;;  %v8132_v35 = vld [vmem:[%s10960_s2 + $0x504] ss:$16 sps:$4 sm:$0xff]  }
  0x88   :  { %1777 = vmatpush1.bf16.msra.mxu0 %v8040_v36  ;;  %v8135_v36 = vld [vmem:[%s10960_s2 + $0x10c] ss:$16 sps:$4 sm:$0xff]  }
  0x89   :  { %1890 = vmatpush1.bf16.msra.mxu1 %v8043_v37  ;;  %1778 = vmatprep.subr.bf16.mxu0 %v8054_v38  ;;  %v9859_v37 = vld [vmem:[%s10958_s0 + $0x14] ss:$24 sps:$4 sm:$0xff]   ;;  %v8130_v38 = vld [vmem:[%s10960_s2 + $0x500] ss:$16 sps:$4 sm:$0xff]  }
  0x8a   :  { %1891 = vmatprep.subr.bf16.mxu1 %v8057_v39  ;;  %v8133_v39 = vld [vmem:[%s10960_s2 + $0x108] ss:$16 sps:$4 sm:$0xff]  }
  0x8b   :  { %1603 = vmatmul.mubr.bf16.gmra.mxu0 %v9671_v40 }
  0x8c   :  { %1716 = vmatmul.mubr.bf16.gmra.mxu1 %v8051_v41  ;;  %1779 = vmatpush1.bf16.msra.mxu0 %v8052_v42  ;;  %v8141_v41 = vld [vmem:[%s10960_s2 + $0x2ec] ss:$16 sps:$4 sm:$0xff]  }
  0x8d   :  { %1892 = vmatpush1.bf16.msra.mxu1 %v8055_v43  ;;  %1780 = vmatprep.subr.bf16.mxu0 %v8060_v44  ;;  %v8144_v42 = vld [vmem:[%s10960_s2 + $0x4ec] ss:$16 sps:$4 sm:$0xff]   ;;  %v9877_v43 = vld [vmem:[%s10958_s0 + $0x10] ss:$24 sps:$4 sm:$0xff]  }
  0x8e   :  { %1893 = vmatprep.subr.bf16.mxu1 %v8063_v45  ;;  %1612 = vmatprep.mubr.bf16.mxu0 %v9691_v46  ;;  %v8139_v44 = vld [vmem:[%s10960_s2 + $0x2e8] ss:$16 sps:$4 sm:$0xff]  }
  0x8f   :  { %1725 = vmatprep.mubr.bf16.mxu1 %v8066_v47  ;;  %v8142_v45 = vld [vmem:[%s10960_s2 + $0x4e8] ss:$16 sps:$4 sm:$0xff]   ;;  %v8147_v47 = vld [vmem:[%s10960_s2 + $0x2cc] ss:$16 sps:$4 sm:$0xff]  }
  0x90   :  { %1781 = vmatpush1.bf16.msra.mxu0 %v8058_v48  ;;  %v9896_v48 = vld [vmem:[%s10958_s0 + $0x44] ss:$24 sps:$4 sm:$0xff]  }
  0x91   :  { %1894 = vmatpush1.bf16.msra.mxu1 %v8061_v50  ;;  %1782 = vmatprep.subr.bf16.mxu0 %v8072_v51  ;;  %v8145_v50 = vld [vmem:[%s10960_s2 + $0x2c8] ss:$16 sps:$4 sm:$0xff]  }
  0x92   :  { %1895 = vmatprep.subr.bf16.mxu1 %v8075_v52  ;;  %v8148_v51 = vld [vmem:[%s10960_s2 + $0x4c8] ss:$16 sps:$4 sm:$0xff]   ;;  %v8156_v52 = vld [vmem:[%s10960_s2 + $0x2ac] ss:$16 sps:$4 sm:$0xff]  }
  0x93   :  { %1613 = vmatmul.mubr.bf16.gmra.mxu0 %v9713_v53 }
  0x94   :  { %1726 = vmatmul.mubr.bf16.gmra.mxu1 %v8069_v54  ;;  %1783 = vmatpush2.bf16.msra.mxu0 %v8070_v55  ;;  %v9917_v54 = vld [vmem:[%s10958_s0 + $0x40] ss:$24 sps:$4 sm:$0xff]  }
  0x95   :  { %1896 = vmatpush2.bf16.msra.mxu1 %v8073_v56  ;;  %1784 = vmatprep.subr.bf16.mxu0 %v8078_v57  ;;  %v8154_v55 = vld [vmem:[%s10960_s2 + $0x2a8] ss:$16 sps:$4 sm:$0xff]   ;;  %v8162_v57 = vld [vmem:[%s10960_s2 + $0x28c] ss:$16 sps:$4 sm:$0xff]  }
  0x96   :  { %1897 = vmatprep.subr.bf16.mxu1 %v8081_v58  ;;  %1622 = vmatprep.mubr.bf16.mxu0 %v9733_v59  ;;  %v8157_v56 = vld [vmem:[%s10960_s2 + $0x4a8] ss:$16 sps:$4 sm:$0xff]   ;;  %v9934_v58 = vld [vmem:[%s10958_s0 + $0x74] ss:$24 sps:$4 sm:$0xff]  }
  0x97   :  { %1735 = vmatprep.mubr.bf16.mxu1 %v8084_v60  ;;  %v8160_v60 = vld [vmem:[%s10960_s2 + $0x288] ss:$16 sps:$4 sm:$0xff]  }
  0x98   :  { %1785 = vmatpush2.bf16.msra.mxu0 %v8076_v61  ;;  %v8163_v61 = vld [vmem:[%s10960_s2 + $0x488] ss:$16 sps:$4 sm:$0xff]  }
  0x99   :  { %1898 = vmatpush2.bf16.msra.mxu1 %v8079_v62  ;;  %1786 = vmatprep.subr.bf16.mxu0 %v8090_v63  ;;  %v8171_v62 = vld [vmem:[%s10960_s2 + $0x26c] ss:$16 sps:$4 sm:$0xff]   ;;  %v9955_v63 = vld [vmem:[%s10958_s0 + $0x70] ss:$24 sps:$4 sm:$0xff]  }
  0x9a   :  { %1899 = vmatprep.subr.bf16.mxu1 %v8093_v0  ;;  %v8169_v0 = vld [vmem:[%s10960_s2 + $0x268] ss:$16 sps:$4 sm:$0xff]  }
  0x9b   :  { %1623 = vmatmul.mubr.bf16.gmra.mxu0 %v9755_v1 }
  0x9c   :  { %1736 = vmatmul.mubr.bf16.gmra.mxu1 %v8087_v2  ;;  %1787 = vmatpush2.bf16.msra.mxu0 %v8088_v3  ;;  %v8172_v2 = vld [vmem:[%s10960_s2 + $0x468] ss:$16 sps:$4 sm:$0xff]   ;;  %v8177_v3 = vld [vmem:[%s10960_s2 + $0x24c] ss:$16 sps:$4 sm:$0xff]  }
  0x9d   :  { %1900 = vmatpush2.bf16.msra.mxu1 %v8091_v5  ;;  %1788 = vmatprep.subr.bf16.mxu0 %v8096_v6  ;;  %v9972_v5 = vld [vmem:[%s10958_s0 + $0xa4] ss:$24 sps:$4 sm:$0xff]   ;;  %v8175_v6 = vld [vmem:[%s10960_s2 + $0x248] ss:$16 sps:$4 sm:$0xff]  }
  0x9e   :  { %1901 = vmatprep.subr.bf16.mxu1 %v8099_v7  ;;  %1632 = vmatprep.mubr.bf16.mxu0 %v9775_v8  ;;  %v8178_v7 = vld [vmem:[%s10960_s2 + $0x448] ss:$16 sps:$4 sm:$0xff]  }
  0x9f   :  { %1745 = vmatprep.mubr.bf16.mxu1 %v8102_v9  ;;  %v8186_v9 = vld [vmem:[%s10960_s2 + $0x22c] ss:$16 sps:$4 sm:$0xff]  }
  0xa0   :  { %1789 = vmatpush2.bf16.msra.mxu0 %v8094_v11  ;;  %v9993_v11 = vld [vmem:[%s10958_s0 + $0xa0] ss:$24 sps:$4 sm:$0xff]  }
  0xa1   :  { %1902 = vmatpush2.bf16.msra.mxu1 %v8097_v12  ;;  %1790 = vmatprep.subr.bf16.mxu0 %v8108_v13  ;;  %v8184_v12 = vld [vmem:[%s10960_s2 + $0x228] ss:$16 sps:$4 sm:$0xff]  }
  0xa2   :  { %1903 = vmatprep.subr.bf16.mxu1 %v8111_v14  ;;  %v8187_v13 = vld [vmem:[%s10960_s2 + $0x428] ss:$16 sps:$4 sm:$0xff]   ;;  %v8192_v14 = vld [vmem:[%s10960_s2 + $0x20c] ss:$16 sps:$4 sm:$0xff]  }
  0xa3   :  { %1633 = vmatmul.mubr.bf16.gmra.mxu0 %v9797_v15 }
  0xa4   :  { %1746 = vmatmul.mubr.bf16.gmra.mxu1 %v8105_v17  ;;  %1791 = vmatpush2.bf16.msra.mxu0 %v8106_v18  ;;  %v10010_v17 = vld [vmem:[%s10958_s0 + $0xd4] ss:$24 sps:$4 sm:$0xff]   ;;  %v8190_v18 = vld [vmem:[%s10960_s2 + $0x208] ss:$16 sps:$4 sm:$0xff]  }
  0xa5   :  { %1904 = vmatpush2.bf16.msra.mxu1 %v8109_v19  ;;  %1792 = vmatprep.subr.bf16.mxu0 %v8114_v20  ;;  %v8193_v19 = vld [vmem:[%s10960_s2 + $0x408] ss:$16 sps:$4 sm:$0xff]   ;;  %v8201_v20 = vld [vmem:[%s10960_s2 + $0x3ec] ss:$16 sps:$4 sm:$0xff]  }
  0xa6   :  { %1905 = vmatprep.subr.bf16.mxu1 %v8117_v21  ;;  %1642 = vmatprep.mubr.bf16.mxu0 %v9817_v23  ;;  %v10031_v21 = vld [vmem:[%s10958_s0 + $0xd0] ss:$24 sps:$4 sm:$0xff]  }
  0xa7   :  { %1755 = vmatprep.mubr.bf16.mxu1 %v8120_v24  ;;  %v8199_v24 = vld [vmem:[%s10960_s2 + $0x3e8] ss:$16 sps:$4 sm:$0xff]  }
  0xa8   :  { %1793 = vmatpush2.bf16.msra.mxu0 %v8112_v25  ;;  %v8202_v25 = vld [vmem:[%s10960_s2 + $0x5e8] ss:$16 sps:$4 sm:$0xff]  }
  0xa9   :  { %1906 = vmatpush2.bf16.msra.mxu1 %v8115_v26  ;;  %1794 = vmatprep.subr.bf16.mxu0 %v8126_v27  ;;  %v8210_v26 = vld [vmem:[%s10960_s2 + $0x5cc] ss:$16 sps:$4 sm:$0xff]  }
  0xaa   :  { %1907 = vmatprep.subr.bf16.mxu1 %v8129_v29  ;;  %v10048_v27 = vld [vmem:[%s10958_s0 + $0x104] ss:$24 sps:$4 sm:$0xff]   ;;  %v8205_v29 = vld [vmem:[%s10960_s2 + $0x3c8] ss:$16 sps:$4 sm:$0xff]  }
  0xab   :  { %1643 = vmatmul.mubr.bf16.gmra.mxu0 %v9839_v30 }
  0xac   :  { %1756 = vmatmul.mubr.bf16.gmra.mxu1 %v8123_v31  ;;  %1795 = vmatpush2.bf16.msra.mxu0 %v8124_v32  ;;  %v8208_v31 = vld [vmem:[%s10960_s2 + $0x5c8] ss:$16 sps:$4 sm:$0xff]   ;;  %v8216_v32 = vld [vmem:[%s10960_s2 + $0x3ac] ss:$16 sps:$4 sm:$0xff]  }
  0xad   :  { %1908 = vmatpush2.bf16.msra.mxu1 %v8127_v33  ;;  %1796 = vmatprep.subr.bf16.mxu0 %v8132_v35  ;;  %v10069_v33 = vld [vmem:[%s10958_s0 + $0x100] ss:$24 sps:$4 sm:$0xff]  }
  0xae   :  { %1909 = vmatprep.subr.bf16.mxu1 %v8135_v36  ;;  %1798 = vmatprep.mubr.bf16.mxu0 %v9859_v37  ;;  %v8214_v35 = vld [vmem:[%s10960_s2 + $0x3a8] ss:$16 sps:$4 sm:$0xff]  }
  0xaf   :  { %1911 = vmatprep.mubr.bf16.mxu1 %v9485_v49  ;;  %v8150_v49 = vld [vmem:[%s10960_s2 + $0x4cc] ss:$16 sps:$4 sm:$0xff]   ;;  %v8217_v36 = vld [vmem:[%s10960_s2 + $0x5a8] ss:$16 sps:$4 sm:$0xff]  }
  0xb0   :  { %1797 = vmatpush2.bf16.msra.mxu0 %v8130_v38  ;;  %v8225_v38 = vld [vmem:[%s10960_s2 + $0x58c] ss:$16 sps:$4 sm:$0xff]  }
  0xb1   :  { %1910 = vmatpush2.bf16.msra.mxu1 %v8133_v39  ;;  %1992 = vmatprep.subr.bf16.mxu0 %v8141_v41  ;;  %v8220_v39 = vld [vmem:[%s10960_s2 + $0x388] ss:$16 sps:$4 sm:$0xff]  }
  0xb2   :  { %2105 = vmatprep.subr.bf16.mxu1 %v8144_v42  ;;  %v8223_v41 = vld [vmem:[%s10960_s2 + $0x588] ss:$16 sps:$4 sm:$0xff]   ;;  %v10092_v42 = vld [vmem:[%s10958_s0 + $0x134] ss:$24 sps:$4 sm:$0xff]  }
  0xb3   :  { %1799 = vmatmul.mubr.bf16.vlgmr.msra.gmra.mxu0 %v9877_v43 }
  0xb4   :  { %1912 = vmatmul.mubr.bf16.vlgmr.msra.gmra.mxu1 %v9545_v4  ;;  %1993 = vmatpush1.bf16.msra.mxu0 %v8139_v44  ;;  %v8159_v4 = vld [vmem:[%s10960_s2 + $0x4ac] ss:$16 sps:$4 sm:$0xff]  }
  0xb5   :  { %2106 = vmatpush1.bf16.msra.mxu1 %v8142_v45  ;;  %1994 = vmatprep.subr.bf16.mxu0 %v8147_v47  ;;  %v8231_v44 = vld [vmem:[%s10960_s2 + $0x36c] ss:$16 sps:$4 sm:$0xff]   ;;  %v10105_v47 = vld [vmem:[%s10958_s0 + $0x130] ss:$24 sps:$4 sm:$0xff]  }
  0xb6   :  { %2107 = vmatprep.subr.bf16.mxu1 %v8150_v49  ;;  %1808 = vmatprep.mubr.bf16.mxu0 %v9896_v48  ;;  %v8234_v45 = vld [vmem:[%s10960_s2 + $0x56c] ss:$16 sps:$4 sm:$0xff]   ;;  %v8232_v49 = vld [vmem:[%s10960_s2 + $0x568] ss:$16 sps:$4 sm:$0xff]  }
  0xb7   :  { %1921 = vmatprep.mubr.bf16.mxu1 %v9565_v10  ;;  %v8165_v10 = vld [vmem:[%s10960_s2 + $0x48c] ss:$16 sps:$4 sm:$0xff]  }
  0xb8   :  { %1995 = vmatpush1.bf16.msra.mxu0 %v8145_v50  ;;  %v8237_v50 = vld [vmem:[%s10960_s2 + $0x34c] ss:$16 sps:$4 sm:$0xff]  }
  0xb9   :  { %2108 = vmatpush1.bf16.msra.mxu1 %v8148_v51  ;;  %1996 = vmatprep.subr.bf16.mxu0 %v8156_v52  ;;  %v8240_v51 = vld [vmem:[%s10960_s2 + $0x54c] ss:$16 sps:$4 sm:$0xff]   ;;  %v8238_v52 = vld [vmem:[%s10960_s2 + $0x548] ss:$16 sps:$4 sm:$0xff]  }
  0xba   :  { %2109 = vmatprep.subr.bf16.mxu1 %v8159_v4  ;;  %v10130_v4 = vld [vmem:[%s10958_s0 + $0x164] ss:$24 sps:$4 sm:$0xff]  }
  0xbb   :  { %1809 = vmatmul.mubr.bf16.gmra.mxu0 %v9917_v54 }
  0xbc   :  { %1922 = vmatmul.mubr.bf16.gmra.mxu1 %v9587_v16  ;;  %1997 = vmatpush1.bf16.msra.mxu0 %v8154_v55  ;;  %v8174_v16 = vld [vmem:[%s10960_s2 + $0x46c] ss:$16 sps:$4 sm:$0xff]  }
  0xbd   :  { %2110 = vmatpush1.bf16.msra.mxu1 %v8157_v56  ;;  %1998 = vmatprep.subr.bf16.mxu0 %v8162_v57  ;;  %v8246_v55 = vld [vmem:[%s10960_s2 + $0x32c] ss:$16 sps:$4 sm:$0xff]   ;;  %v10143_v57 = vld [vmem:[%s10958_s0 + $0x160] ss:$24 sps:$4 sm:$0xff]  }
  0xbe   :  { %2111 = vmatprep.subr.bf16.mxu1 %v8165_v10  ;;  %1818 = vmatprep.mubr.bf16.mxu0 %v9934_v58  ;;  %v8249_v56 = vld [vmem:[%s10960_s2 + $0x52c] ss:$16 sps:$4 sm:$0xff]   ;;  %v8247_v10 = vld [vmem:[%s10960_s2 + $0x528] ss:$16 sps:$4 sm:$0xff]  }
  0xbf   :  { %1931 = vmatprep.mubr.bf16.mxu1 %v9607_v22  ;;  %v8180_v22 = vld [vmem:[%s10960_s2 + $0x44c] ss:$16 sps:$4 sm:$0xff]  }
  0xc0   :  { %1999 = vmatpush1.bf16.msra.mxu0 %v8160_v60  ;;  %v8252_v60 = vld [vmem:[%s10960_s2 + $0x30c] ss:$16 sps:$4 sm:$0xff]  }
  0xc1   :  { %2112 = vmatpush1.bf16.msra.mxu1 %v8163_v61  ;;  %2000 = vmatprep.subr.bf16.mxu0 %v8171_v62  ;;  %v8255_v61 = vld [vmem:[%s10960_s2 + $0x50c] ss:$16 sps:$4 sm:$0xff]   ;;  %v8253_v62 = vld [vmem:[%s10960_s2 + $0x508] ss:$16 sps:$4 sm:$0xff]  }
  0xc2   :  { %2113 = vmatprep.subr.bf16.mxu1 %v8174_v16  ;;  %v8258_v16 = vld [vmem:[#allocation4 + $0x74] ss:$8 sps:$4 sm:$0xff]  }
  0xc3   :  { %1819 = vmatmul.mubr.bf16.gmra.mxu0 %v9955_v63 }
  0xc4   :  { %1932 = vmatmul.mubr.bf16.gmra.mxu1 %v9629_v28  ;;  %2001 = vmatpush1.bf16.msra.mxu0 %v8169_v0  ;;  %v8189_v28 = vld [vmem:[%s10960_s2 + $0x42c] ss:$16 sps:$4 sm:$0xff]  }
  0xc5   :  { %2114 = vmatpush1.bf16.msra.mxu1 %v8172_v2  ;;  %2002 = vmatprep.subr.bf16.mxu0 %v8177_v3  ;;  %v9168_v0 = vld [vmem:[%s10958_s0 + $0xc] ss:$24 sps:$4 sm:$0xff]   ;;  %v8256_v2 = vld [vmem:[#allocation4 + $0x70] ss:$8 sps:$4 sm:$0xff]   ;;  %v8261_v3 = vld [vmem:[#allocation4 + $0x64] ss:$8 sps:$4 sm:$0xff]  }
  0xc6   :  { %2115 = vmatprep.subr.bf16.mxu1 %v8180_v22  ;;  %1828 = vmatprep.mubr.bf16.mxu0 %v9972_v5  ;;  %v8259_v22 = vld [vmem:[#allocation4 + $0x60] ss:$8 sps:$4 sm:$0xff]  }
  0xc7   :  { %1941 = vmatprep.mubr.bf16.mxu1 %v9649_v34  ;;  %v8195_v34 = vld [vmem:[%s10960_s2 + $0x40c] ss:$16 sps:$4 sm:$0xff]  }
  0xc8   :  { %2003 = vmatpush1.bf16.msra.mxu0 %v8175_v6  ;;  %v9170_v6 = vld [vmem:[%s10958_s0 + $0x3c] ss:$24 sps:$4 sm:$0xff]  }
  0xc9   :  { %2116 = vmatpush1.bf16.msra.mxu1 %v8178_v7  ;;  %2004 = vmatprep.subr.bf16.mxu0 %v8186_v9  ;;  %v8262_v7 = vld [vmem:[#allocation4 + $0x50] ss:$8 sps:$4 sm:$0xff]   ;;  %v8267_v9 = vld [vmem:[#allocation4 + $0x44] ss:$8 sps:$4 sm:$0xff]  }
  0xca   :  { %2117 = vmatprep.subr.bf16.mxu1 %v8189_v28  ;;  %v9171_v28 = vld [vmem:[%s10958_s0 + $0x38] ss:$24 sps:$4 sm:$0xff]  }
  0xcb   :  { %1829 = vmatmul.mubr.bf16.gmra.mxu0 %v9993_v11 }
  0xcc   :  { %1942 = vmatmul.mubr.bf16.gmra.mxu1 %v9671_v40  ;;  %2005 = vmatpush1.bf16.msra.mxu0 %v8184_v12  ;;  %v8204_v40 = vld [vmem:[%s10960_s2 + $0x5ec] ss:$16 sps:$4 sm:$0xff]  }
  0xcd   :  { %2118 = vmatpush1.bf16.msra.mxu1 %v8187_v13  ;;  %2006 = vmatprep.subr.bf16.mxu0 %v8192_v14  ;;  %v9172_v12 = vld [vmem:[%s10958_s0 + $0x6c] ss:$24 sps:$4 sm:$0xff]   ;;  %v8268_v13 = vld [vmem:[#allocation4 + $0x30] ss:$8 sps:$4 sm:$0xff]   ;;  %v8273_v14 = vld [vmem:[#allocation4 + $0x24] ss:$8 sps:$4 sm:$0xff]  }
  0xce   :  { %2119 = vmatprep.subr.bf16.mxu1 %v8195_v34  ;;  %1838 = vmatprep.mubr.bf16.mxu0 %v10010_v17  ;;  %v8309_v34 = vld [vmem:[#allocation4 + $0x174] ss:$8 sps:$4 sm:$0xff]  }
  0xcf   :  { %1951 = vmatprep.mubr.bf16.mxu1 %v9691_v46  ;;  %v8207_v46 = vld [vmem:[%s10960_s2 + $0x3cc] ss:$16 sps:$4 sm:$0xff]  }
  0xd0   :  { %2007 = vmatpush1.bf16.msra.mxu0 %v8190_v18  ;;  %v8307_v18 = vld [vmem:[#allocation4 + $0x170] ss:$8 sps:$4 sm:$0xff]  }
  0xd1   :  { %2120 = vmatpush1.bf16.msra.mxu1 %v8193_v19  ;;  %2008 = vmatprep.subr.bf16.mxu0 %v8201_v20  ;;  %v8271_v19 = vld [vmem:[#allocation4 + $0x20] ss:$8 sps:$4 sm:$0xff]   ;;  %v8276_v20 = vld [vmem:[#allocation4 + $0x14] ss:$8 sps:$4 sm:$0xff]  }
  0xd2   :  { %2121 = vmatprep.subr.bf16.mxu1 %v8204_v40  ;;  %v8315_v40 = vld [vmem:[#allocation4 + $0x164] ss:$8 sps:$4 sm:$0xff]  }
  0xd3   :  { %1839 = vmatmul.mubr.bf16.gmra.mxu0 %v10031_v21 }
  0xd4   :  { %1952 = vmatmul.mubr.bf16.gmra.mxu1 %v9713_v53  ;;  %2009 = vmatpush2.bf16.msra.mxu0 %v8199_v24  ;;  %v8219_v53 = vld [vmem:[%s10960_s2 + $0x5ac] ss:$16 sps:$4 sm:$0xff]  }
  0xd5   :  { %2122 = vmatpush2.bf16.msra.mxu1 %v8202_v25  ;;  %2010 = vmatprep.subr.bf16.mxu0 %v8207_v46  ;;  %v8313_v24 = vld [vmem:[#allocation4 + $0x160] ss:$8 sps:$4 sm:$0xff]   ;;  %v8274_v25 = vld [vmem:[#allocation4 + $0x10] ss:$8 sps:$4 sm:$0xff]   ;;  %v8279_v46 = vld [vmem:[#allocation4 + $0x4] ss:$8 sps:$4 sm:$0xff]  }
  0xd6   :  { %2123 = vmatprep.subr.bf16.mxu1 %v8210_v26  ;;  %1848 = vmatprep.mubr.bf16.mxu0 %v10048_v27  ;;  %v8319_v26 = vld [vmem:[#allocation4 + $0x150] ss:$8 sps:$4 sm:$0xff]  }
  0xd7   :  { %1961 = vmatprep.mubr.bf16.mxu1 %v9733_v59  ;;  %v8222_v59 = vld [vmem:[%s10960_s2 + $0x38c] ss:$16 sps:$4 sm:$0xff]  }
  0xd8   :  { %2011 = vmatpush2.bf16.msra.mxu0 %v8205_v29  ;;  %v9175_v29 = vld [vmem:[%s10958_s0 + $0x98] ss:$24 sps:$4 sm:$0xff]  }
  0xd9   :  { %2124 = vmatpush2.bf16.msra.mxu1 %v8208_v31  ;;  %2012 = vmatprep.subr.bf16.mxu0 %v8216_v32  ;;  %v9176_v31 = vld [vmem:[%s10958_s0 + $0xcc] ss:$24 sps:$4 sm:$0xff]   ;;  %v8282_v32 = vld [vmem:[#allocation4 + $0xf4] ss:$8 sps:$4 sm:$0xff]  }
  0xda   :  { %2125 = vmatprep.subr.bf16.mxu1 %v8219_v53  ;;  %v8327_v53 = vld [vmem:[#allocation4 + $0x144] ss:$8 sps:$4 sm:$0xff]  }
  0xdb   :  { %1849 = vmatmul.mubr.bf16.gmra.mxu0 %v10069_v33 }
  0xdc   :  { %1962 = vmatmul.mubr.bf16.gmra.mxu1 %v9755_v1  ;;  %2013 = vmatpush2.bf16.msra.mxu0 %v8214_v35  ;;  %v8229_v1 = vld [vmem:[%s10960_s2 + $0x368] ss:$16 sps:$4 sm:$0xff]   ;;  %v8325_v35 = vld [vmem:[#allocation4 + $0x140] ss:$8 sps:$4 sm:$0xff]  }
  0xdd   :  { %2126 = vmatpush2.bf16.msra.mxu1 %v8217_v36  ;;  %2014 = vmatprep.subr.bf16.mxu0 %v8222_v59  ;;  %v8280_v36 = vld [vmem:[#allocation4 + $0xf0] ss:$8 sps:$4 sm:$0xff]   ;;  %v8285_v59 = vld [vmem:[#allocation4 + $0xe4] ss:$8 sps:$4 sm:$0xff]  }
  0xde   :  { %2127 = vmatprep.subr.bf16.mxu1 %v8225_v38  ;;  %1858 = vmatprep.mubr.bf16.mxu0 %v10092_v42  ;;  %v8331_v38 = vld [vmem:[#allocation4 + $0x130] ss:$8 sps:$4 sm:$0xff]  }
  0xdf   :  { %1971 = vmatprep.mubr.bf16.mxu1 %v9775_v8  ;;  %v8235_v8 = vld [vmem:[%s10960_s2 + $0x348] ss:$16 sps:$4 sm:$0xff]  }
  0xe0   :  { %2015 = vmatpush2.bf16.msra.mxu0 %v8220_v39  ;;  %v9177_v39 = vld [vmem:[%s10958_s0 + $0xc8] ss:$24 sps:$4 sm:$0xff]  }
  0xe1   :  { %2128 = vmatpush2.bf16.msra.mxu1 %v8223_v41  ;;  %2016 = vmatprep.subr.bf16.mxu0 %v8231_v44  ;;  %v9178_v41 = vld [vmem:[%s10958_s0 + $0xfc] ss:$24 sps:$4 sm:$0xff]   ;;  %v8288_v44 = vld [vmem:[#allocation4 + $0xd4] ss:$8 sps:$4 sm:$0xff]  }
  0xe2   :  { %2129 = vmatprep.subr.bf16.mxu1 %v8234_v45  ;;  %v8339_v45 = vld [vmem:[#allocation4 + $0x124] ss:$8 sps:$4 sm:$0xff]  }
  0xe3   :  { %1859 = vmatmul.mubr.bf16.gmra.mxu0 %v10105_v47 }
  0xe4   :  { %1972 = vmatmul.mubr.bf16.gmra.mxu1 %v9797_v15  ;;  %2017 = vmatpush2.bf16.msra.mxu0 %v8229_v1  ;;  %v8244_v15 = vld [vmem:[%s10960_s2 + $0x328] ss:$16 sps:$4 sm:$0xff]   ;;  %v8337_v1 = vld [vmem:[#allocation4 + $0x120] ss:$8 sps:$4 sm:$0xff]  }
  0xe5   :  { %2130 = vmatpush2.bf16.msra.mxu1 %v8232_v49  ;;  %2018 = vmatprep.subr.bf16.mxu0 %v8237_v50  ;;  %v8286_v49 = vld [vmem:[#allocation4 + $0xd0] ss:$8 sps:$4 sm:$0xff]   ;;  %v8291_v50 = vld [vmem:[#allocation4 + $0xc4] ss:$8 sps:$4 sm:$0xff]  }
  0xe6   :  { %2131 = vmatprep.subr.bf16.mxu1 %v8240_v51  ;;  %1868 = vmatprep.mubr.bf16.mxu0 %v10130_v4  ;;  %v8343_v51 = vld [vmem:[#allocation4 + $0x110] ss:$8 sps:$4 sm:$0xff]  }
  0xe7   :  { %1981 = vmatprep.mubr.bf16.mxu1 %v9817_v23  ;;  %v8250_v23 = vld [vmem:[%s10960_s2 + $0x308] ss:$16 sps:$4 sm:$0xff]  }
  0xe8   :  { %2019 = vmatpush2.bf16.msra.mxu0 %v8235_v8  ;;  %v9179_v8 = vld [vmem:[%s10958_s0 + $0xf8] ss:$24 sps:$4 sm:$0xff]  }
  0xe9   :  { %2132 = vmatpush2.bf16.msra.mxu1 %v8238_v52  ;;  %2020 = vmatprep.subr.bf16.mxu0 %v8246_v55  ;;  %v9180_v52 = vld [vmem:[%s10958_s0 + $0x12c] ss:$24 sps:$4 sm:$0xff]   ;;  %v8294_v55 = vld [vmem:[#allocation4 + $0xb4] ss:$8 sps:$4 sm:$0xff]  }
  0xea   :  { %2133 = vmatprep.subr.bf16.mxu1 %v8249_v56  ;;  %v8351_v56 = vld [vmem:[#allocation4 + $0x104] ss:$8 sps:$4 sm:$0xff]  }
  0xeb   :  { %1869 = vmatmul.mubr.bf16.gmra.mxu0 %v10143_v57 }
  0xec   :  { %1982 = vmatmul.mubr.bf16.gmra.mxu1 %v9839_v30  ;;  %2021 = vmatpush2.bf16.msra.mxu0 %v8244_v15  ;;  %v9169_v30 = vld [vmem:[%s10958_s0 + $0x8] ss:$24 sps:$4 sm:$0xff]   ;;  %v8349_v15 = vld [vmem:[#allocation4 + $0x100] ss:$8 sps:$4 sm:$0xff]  }
  0xed   :  { %2134 = vmatpush2.bf16.msra.mxu1 %v8247_v10  ;;  %2022 = vmatprep.subr.bf16.mxu0 %v8252_v60  ;;  %v8292_v10 = vld [vmem:[#allocation4 + $0xb0] ss:$8 sps:$4 sm:$0xff]   ;;  %v8297_v60 = vld [vmem:[#allocation4 + $0xa4] ss:$8 sps:$4 sm:$0xff]  }
  0xee   :  { %2135 = vmatprep.subr.bf16.mxu1 %v8255_v61  ;;  %2024 = vmatprep.mubr.bf16.mxu0 %v9168_v0  ;;  %v8355_v61 = vld [vmem:[#allocation4 + $0x1f0] ss:$8 sps:$4 sm:$0xff]   ;;  %v8300_v0 = vld [vmem:[#allocation4 + $0x94] ss:$8 sps:$4 sm:$0xff]  }
  0xef   :  { %2137 = vmatprep.mubr.bf16.mxu1 %v9859_v37  ;;  %v8264_v37 = vld [vmem:[#allocation4 + $0x54] ss:$8 sps:$4 sm:$0xff]  }
  0xf0   :  { %2023 = vmatpush2.bf16.msra.mxu0 %v8250_v23  ;;  %v9181_v23 = vld [vmem:[%s10958_s0 + $0x128] ss:$24 sps:$4 sm:$0xff]  }
  0xf1   :  { %2136 = vmatpush2.bf16.msra.mxu1 %v8253_v62  ;;  %2710 = vmatprep.subr.bf16.mxu0 %v8258_v16  ;;  %v9182_v62 = vld [vmem:[%s10958_s0 + $0x15c] ss:$24 sps:$4 sm:$0xff]   ;;  %v10967_v16 = vlaneseq }
  0xf2   :  { %2753 = vmatprep.subr.bf16.mxu1 %v8309_v34 }
  0xf3   :  { %2025 = vmatmul.mubr.bf16.vlgmr.msra.gmra.mxu0 %v9169_v30  ;;  %v8298_v30 = vld [vmem:[#allocation4 + $0x90] ss:$8 sps:$4 sm:$0xff]  }
  0xf4   :  { %2138 = vmatmul.mubr.bf16.vlgmr.msra.gmra.mxu1 %v9877_v43  ;;  %2034 = vmatprep.mubr.bf16.mxu0 %v9170_v6  ;;  %v8265_v43 = vld [vmem:[#allocation4 + $0x40] ss:$8 sps:$4 sm:$0xff]   ;;  %v8369_v6 = vld [vmem:[#allocation4 + $0x1d4] ss:$8 sps:$4 sm:$0xff]  }
  0xf5   :  { %2147 = vmatprep.mubr.bf16.mxu1 %v9896_v48  ;;  %2711 = vmatpush1.bf16.msra.mxu0 %v8256_v2  ;;  %v8270_v48 = vld [vmem:[#allocation4 + $0x34] ss:$8 sps:$4 sm:$0xff]   ;;  %v8363_v2 = vld [vmem:[#allocation4 + $0x1e4] ss:$8 sps:$4 sm:$0xff]  }
  0xf6   :  { %2712 = vmatprep.subr.bf16.mxu0 %v8261_v3  ;;  %2754 = vmatpush1.bf16.msra.mxu1 %v8307_v18  ;;  %v8361_v3 = vld [vmem:[#allocation4 + $0x1e0] ss:$8 sps:$4 sm:$0xff]  }
  0xf7   :  { %2755 = vmatprep.subr.bf16.mxu1 %v8315_v40 }
  0xf9   :  { %2713 = vmatpush1.bf16.msra.mxu0 %v8259_v22  ;;  %v8303_v22 = vld [vmem:[#allocation4 + $0x84] ss:$8 sps:$4 sm:$0xff]  }
  0xfa   :  { %2714 = vmatprep.subr.bf16.mxu0 %v8264_v37  ;;  %2756 = vmatpush1.bf16.msra.mxu1 %v8313_v24  ;;  %v8367_v37 = vld [vmem:[#allocation4 + $0x1d0] ss:$8 sps:$4 sm:$0xff]   ;;  %v8385_v24 = vld [vmem:[#allocation4 + $0x1a0] ss:$8 sps:$4 sm:$0xff]  }
  0xfb   :  { %2035 = vmatmul.mubr.bf16.gmra.mxu0 %v9171_v28 }
  0xfc   :  { %2148 = vmatmul.mubr.bf16.gmra.mxu1 %v9917_v54  ;;  %2044 = vmatprep.mubr.bf16.mxu0 %v9172_v12  ;;  %v9173_v54 = vld [vmem:[%s10958_s0 + $0x68] ss:$24 sps:$4 sm:$0xff]  }
  0xfd   :  { %2157 = vmatprep.mubr.bf16.mxu1 %v9934_v58  ;;  %2715 = vmatpush1.bf16.msra.mxu0 %v8262_v7  ;;  %v9174_v58 = vld [vmem:[%s10958_s0 + $0x9c] ss:$24 sps:$4 sm:$0xff]   ;;  %v10234_v7 = vld [vmem:[#allocation2] sm:$0xf]  ;;  %v8375_v12 = vld [vmem:[#allocation4 + $0x1c4] ss:$8 sps:$4 sm:$0xff]  }
  0xfe   :  { %2716 = vmatprep.subr.bf16.mxu0 %v8267_v9  ;;  %v8301_v9 = vld [vmem:[#allocation4 + $0x80] ss:$8 sps:$4 sm:$0xff]  }
 0x101   :  { %2717 = vmatpush1.bf16.msra.mxu0 %v8265_v43  ;;  %v8306_v43 = vld [vmem:[#allocation4 + $0x274] ss:$8 sps:$4 sm:$0xff]  }
 0x102   :  { %2718 = vmatprep.subr.bf16.mxu0 %v8270_v48  ;;  %v8373_v48 = vld [vmem:[#allocation4 + $0x1c0] ss:$8 sps:$4 sm:$0xff]  }
 0x103   :  { %2045 = vmatmul.mubr.bf16.gmra.mxu0 %v9173_v54 }
 0x104   :  { %2158 = vmatmul.mubr.bf16.gmra.mxu1 %v9955_v63  ;;  %2054 = vmatprep.mubr.bf16.mxu0 %v9174_v58  ;;  %v8321_v63 = vld [vmem:[#allocation4 + $0x154] ss:$8 sps:$4 sm:$0xff]  }
 0x105   :  { %2167 = vmatprep.mubr.bf16.mxu1 %v9972_v5  ;;  %2719 = vmatpush1.bf16.msra.mxu0 %v8268_v13  ;;  %v8277_v5 = vld [vmem:[#allocation4] ss:$8 sps:$4 sm:$0xff]  }
 0x106   :  { %2720 = vmatprep.subr.bf16.mxu0 %v8273_v14  ;;  %2757 = vmatprep.subr.bf16.mxu1 %v8321_v63  ;;  %v8379_v14 = vld [vmem:[#allocation4 + $0x1b0] ss:$8 sps:$4 sm:$0xff]  }
 0x107   :  { %2758 = vmatpush1.bf16.msra.mxu1 %v8319_v26 }
 0x108   :  { %2759 = vmatprep.subr.bf16.mxu1 %v8327_v53 }
 0x109   :  { %2721 = vmatpush1.bf16.msra.mxu0 %v8271_v19 }
 0x10a   :  { %2722 = vmatprep.subr.bf16.mxu0 %v8276_v20  ;;  %v8387_v20 = vld [vmem:[#allocation4 + $0x1a4] ss:$8 sps:$4 sm:$0xff]  }
 0x10b   :  { %2055 = vmatmul.mubr.bf16.gmra.mxu0 %v9175_v29  ;;  %2760 = vmatpush1.bf16.msra.mxu1 %v8325_v35  ;;  %v8393_v29 = vld [vmem:[#allocation4 + $0x194] ss:$8 sps:$4 sm:$0xff]  }
 0x10c   :  { %2168 = vmatmul.mubr.bf16.gmra.mxu1 %v9993_v11  ;;  %2064 = vmatprep.mubr.bf16.mxu0 %v9176_v31  ;;  %v8333_v11 = vld [vmem:[#allocation4 + $0x134] ss:$8 sps:$4 sm:$0xff]  }
 0x10d   :  { %2177 = vmatprep.mubr.bf16.mxu1 %v10010_v17  ;;  %2723 = vmatpush1.bf16.msra.mxu0 %v8274_v25  ;;  %v8283_v17 = vld [vmem:[#allocation4 + $0xe0] ss:$8 sps:$4 sm:$0xff]  }
 0x10e   :  { %2724 = vmatprep.subr.bf16.mxu0 %v8279_v46  ;;  %2761 = vmatprep.subr.bf16.mxu1 %v8333_v11 }
 0x10f   :  { %2762 = vmatpush1.bf16.msra.mxu1 %v8331_v38  ;;  %v8397_v38 = vld [vmem:[#allocation4 + $0x180] ss:$8 sps:$4 sm:$0xff]  }
 0x110   :  { %2763 = vmatprep.subr.bf16.mxu1 %v8339_v45 }
 0x111   :  { %2725 = vmatpush1.bf16.msra.mxu0 %v8277_v5  ;;  %v8391_v5 = vld [vmem:[#allocation4 + $0x190] ss:$8 sps:$4 sm:$0xff]  }
 0x112   :  { %2726 = vmatprep.subr.bf16.mxu0 %v8282_v32 }
 0x113   :  { %2065 = vmatmul.mubr.bf16.gmra.mxu0 %v9177_v39  ;;  %2764 = vmatpush1.bf16.msra.mxu1 %v8337_v1 }
 0x114   :  { %2178 = vmatmul.mubr.bf16.gmra.mxu1 %v10031_v21  ;;  %2074 = vmatprep.mubr.bf16.mxu0 %v9178_v41  ;;  %v8345_v21 = vld [vmem:[#allocation4 + $0x114] ss:$8 sps:$4 sm:$0xff]  }
 0x115   :  { %2187 = vmatprep.mubr.bf16.mxu1 %v10048_v27  ;;  %2727 = vmatpush2.bf16.msra.mxu0 %v8280_v36  ;;  %v8289_v27 = vld [vmem:[#allocation4 + $0xc0] ss:$8 sps:$4 sm:$0xff]  }
 0x116   :  { %2728 = vmatprep.subr.bf16.mxu0 %v8285_v59  ;;  %2765 = vmatprep.subr.bf16.mxu1 %v8345_v21  ;;  %v8399_v59 = vld [vmem:[#allocation4 + $0x184] ss:$8 sps:$4 sm:$0xff]  }
 0x117   :  { %2766 = vmatpush1.bf16.msra.mxu1 %v8343_v51 }
 0x118   :  { %2767 = vmatprep.subr.bf16.mxu1 %v8351_v56 }
 0x119   :  { %2729 = vmatpush2.bf16.msra.mxu0 %v8283_v17 }
 0x11a   :  { %2730 = vmatprep.subr.bf16.mxu0 %v8288_v44 }
 0x11b   :  { %2075 = vmatmul.mubr.bf16.gmra.mxu0 %v9179_v8  ;;  %2768 = vmatpush1.bf16.msra.mxu1 %v8349_v15 }
 0x11c   :  { %2188 = vmatmul.mubr.bf16.gmra.mxu1 %v10069_v33  ;;  %2084 = vmatprep.mubr.bf16.mxu0 %v9180_v52  ;;  %v8357_v33 = vld [vmem:[#allocation4 + $0x1f4] ss:$8 sps:$4 sm:$0xff]  }
 0x11d   :  { %2197 = vmatprep.mubr.bf16.mxu1 %v10092_v42  ;;  %2731 = vmatpush2.bf16.msra.mxu0 %v8286_v49  ;;  %v8295_v42 = vld [vmem:[#allocation4 + $0xa0] ss:$8 sps:$4 sm:$0xff]   ;;  %v8405_v49 = vld [vmem:[#allocation4 + $0x374] ss:$8 sps:$4 sm:$0xff]  }
 0x11e   :  { %2732 = vmatprep.subr.bf16.mxu0 %v8291_v50  ;;  %2769 = vmatprep.subr.bf16.mxu1 %v8357_v33 }
 0x11f   :  { %2770 = vmatpush2.bf16.msra.mxu1 %v8355_v61 }
 0x120   :  { %2771 = vmatprep.subr.bf16.mxu1 %v8363_v2 }
 0x121   :  { %2733 = vmatpush2.bf16.msra.mxu0 %v8289_v27 }
 0x122   :  { %2734 = vmatprep.subr.bf16.mxu0 %v8294_v55 }
 0x123   :  { %2085 = vmatmul.mubr.bf16.gmra.mxu0 %v9181_v23  ;;  %2772 = vmatpush2.bf16.msra.mxu1 %v8361_v3 }
 0x124   :  { %2198 = vmatmul.mubr.bf16.gmra.mxu1 %v10105_v47  ;;  %2094 = vmatprep.mubr.bf16.mxu0 %v9182_v62  ;;  %v10228_v47 = vshrl.u32 %v10967_v16, 7 }
 0x125   :  { %2207 = vmatprep.mubr.bf16.mxu1 %v10130_v4  ;;  %2735 = vmatpush2.bf16.msra.mxu0 %v8292_v10  ;;  %v9183_v4 = vld [vmem:[%s10958_s0 + $0x158] ss:$24 sps:$4 sm:$0xff]  }
 0x126   :  { %2736 = vmatprep.subr.bf16.mxu0 %v8297_v60  ;;  %10976 = vst [vmem:[#allocation12_spill] sm:$0xff] %v10228_v47  ;;  %v10237_v28 = vsub.s32 0, %v10228_v47  ;;  %2773 = vmatprep.subr.bf16.mxu1 %v8369_v6  ;;  %v10266_v41 = vsub.s32 1, %v10228_v47 }
 0x127   :  { %2774 = vmatpush2.bf16.msra.mxu1 %v8367_v37 }
 0x128   :  { %10977 = vst [vmem:[#allocation13_spill] sm:$0xff] %v10237_v28  ;;  %2775 = vmatprep.subr.bf16.mxu1 %v8375_v12  ;;  %v10241_v13 = vrot.slane %v10234_v7, %v10237_v28  ;;  %10978 = vst [vmem:[#allocation14_spill] sm:$0xff] %v10266_v41  ;;  %v10277_v8 = vrot.slane %v10234_v7, %v10266_v41 }
 0x129   :  { %2737 = vmatpush2.bf16.msra.mxu0 %v8295_v42 }
 0x12a   :  { %2738 = vmatprep.subr.bf16.mxu0 %v8300_v0 }
 0x12b   :  { %2095 = vmatmul.mubr.bf16.gmra.mxu0 %v9183_v4  ;;  %2776 = vmatpush2.bf16.msra.mxu1 %v8373_v48 }
 0x12c   :  { %2208 = vmatmul.mubr.bf16.gmra.mxu1 %v10143_v57  ;;  %v8381_v57 = vld [vmem:[#allocation4 + $0x1b4] ss:$8 sps:$4 sm:$0xff]  }
 0x12d   :  { %2739 = vmatpush2.bf16.msra.mxu0 %v8298_v30  ;;  %2777 = vmatprep.subr.bf16.mxu1 %v8381_v57 }
 0x12e   :  { %2740 = vmatprep.subr.bf16.mxu0 %v8303_v22 }
 0x12f   :  { %2778 = vmatpush2.bf16.msra.mxu1 %v8379_v14 }
 0x130   :  { %2779 = vmatprep.subr.bf16.mxu1 %v8387_v20 }
 0x131   :  { %2741 = vmatpush2.bf16.msra.mxu0 %v8301_v9 }
 0x132   :  { %3185 = vmatprep.subr.bf16.mxu0 %v8306_v43 }
 0x133   :  { %v1574_v34 = vpop.f32.mrf.mxu0  ;;  %2780 = vmatpush2.bf16.msra.mxu1 %v8385_v24 }
 0x134   :  { %v1687_v18 = vpop.f32.mrf.mxu1  ;;  %v1575_v54 = vadd.f32 %v1574_v34, %v10241_v13  ;;  %2781 = vmatprep.subr.bf16.mxu1 %v8393_v29 }
 0x135   :  { %v10244_v19 = vpop.f32.mrf.mxu0 }
 0x136   :  { %v10246_v58 = vpop.f32.mrf.mxu1  ;;  %v10248_v40 = vadd.f32 %v1687_v18, %v1575_v54 }
 0x137   :  { %v10250_v25 = vpop.f32.mrf.mxu0  ;;  %2782 = vmatpush2.bf16.msra.mxu1 %v8391_v5 }
 0x138   :  { %v10252_v46 = vpop.f32.mrf.mxu1  ;;  %2783 = vmatprep.subr.bf16.mxu1 %v8399_v59 }
 0x139   :  { %v10254_v63 = vpop.f32.mrf.mxu0 }
 0x13a   :  { %v10256_v26 = vpop.f32.mrf.mxu1 }
 0x13b   :  { %v1584_v31 = vpop.f32.mrf.mxu0  ;;  %2784 = vmatpush2.bf16.msra.mxu1 %v8397_v38 }
 0x13c   :  { %v1697_v32 = vpop.f32.mrf.mxu1  ;;  %v1585_v53 = vadd.f32 %v1584_v31, %v10241_v13  ;;  %3228 = vmatprep.subr.bf16.mxu1 %v8405_v49 }
 0x13d   :  { %v10259_v35 = vpop.f32.mrf.mxu0 }
 0x13e   :  { %v10261_v36 = vpop.f32.mrf.mxu1  ;;  %v10263_v11 = vadd.f32 %v1697_v32, %v1585_v53 }
 0x13f   :  { %v1588_v39 = vpop.f32.mrf.mxu0 }
 0x140   :  { %v1701_v17 = vpop.f32.mrf.mxu1  ;;  %v1589_v44 = vadd.f32 %v1588_v39, %v10241_v13 }
 0x141   :  { %v10269_v45 = vpop.f32.mrf.mxu0 }
 0x142   :  { %v10271_v1 = vpop.f32.mrf.mxu1  ;;  %v10273_v50 = vadd.f32 %v1701_v17, %v1589_v44 }
 0x143   :  { %v1594_v21 = vpop.f32.mrf.mxu0 }
 0x144   :  { %v1707_v51 = vpop.f32.mrf.mxu1  ;;  %v1595_v27 = vadd.f32 %v1594_v21, %v10241_v13 }
 0x145   :  { %v1596_v52 = vpop.f32.mrf.mxu0 }
 0x146   :  { %v1709_v55 = vpop.f32.mrf.mxu1  ;;  %v10280_v56 = vadd.f32 %v1707_v51, %v1595_v27  ;;  %v1597_v15 = vadd.f32 %v1596_v52, %v10277_v8 }
 0x147   :  { %v1598_v10 = vpop.f32.mrf.mxu0 }
 0x148   :  { %v1711_v60 = vpop.f32.mrf.mxu1  ;;  %v10283_v33 = vadd.f32 %v1709_v55, %v1597_v15  ;;  %v1599_v61 = vadd.f32 %v1598_v10, %v10241_v13 }
 0x149   :  { %v10286_v23 = vpop.f32.mrf.mxu0 }
 0x14a   :  { %v10288_v42 = vpop.f32.mrf.mxu1  ;;  %v10290_v62 = vadd.f32 %v1711_v60, %v1599_v61 }
 0x14b   :  { %v1604_v0 = vpop.f32.mrf.mxu0 }
 0x14c   :  { %v1717_v2 = vpop.f32.mrf.mxu1  ;;  %v1605_v3 = vadd.f32 %v1604_v0, %v10241_v13 }
 0x14d   :  { %v1606_v30 = vpop.f32.mrf.mxu0 }
 0x14e   :  { %v1719_v22 = vpop.f32.mrf.mxu1  ;;  %v10293_v6 = vadd.f32 %v1717_v2, %v1605_v3  ;;  %v1607_v37 = vadd.f32 %v1606_v30, %v10277_v8 }
 0x14f   :  { %v1608_v4 = vpop.f32.mrf.mxu0 }
 0x150   :  { %v1721_v9 = vpop.f32.mrf.mxu1  ;;  %v10296_v43 = vadd.f32 %v1719_v22, %v1607_v37  ;;  %v1609_v12 = vadd.f32 %v1608_v4, %v10241_v13 }
 0x151   :  { %v10299_v48 = vpop.f32.mrf.mxu0 }
 0x152   :  { %v10301_v57 = vpop.f32.mrf.mxu1  ;;  %v10303_v14 = vadd.f32 %v1721_v9, %v1609_v12 }
 0x153   :  { %v1614_v34 = vpop.f32.mrf.mxu0 }
 0x154   :  { %v1727_v18 = vpop.f32.mrf.mxu1  ;;  %v1615_v54 = vadd.f32 %v1614_v34, %v10241_v13 }
 0x155   :  { %v1616_v20 = vpop.f32.mrf.mxu0 }
 0x156   :  { %v1729_v24 = vpop.f32.mrf.mxu1  ;;  %v10306_v29 = vadd.f32 %v1727_v18, %v1615_v54  ;;  %v1617_v5 = vadd.f32 %v1616_v20, %v10277_v8 }
 0x157   :  { %v1618_v31 = vpop.f32.mrf.mxu0 }
 0x158   :  { %v1731_v32 = vpop.f32.mrf.mxu1  ;;  %v10309_v53 = vadd.f32 %v1729_v24, %v1617_v5  ;;  %v1619_v59 = vadd.f32 %v1618_v31, %v10241_v13 }
 0x159   :  { %v10312_v38 = vpop.f32.mrf.mxu0 }
 0x15a   :  { %v10314_v39 = vpop.f32.mrf.mxu1  ;;  %v10316_v17 = vadd.f32 %v1731_v32, %v1619_v59 }
 0x15b   :  { %v1624_v44 = vpop.f32.mrf.mxu0 }
 0x15c   :  { %v1737_v49 = vpop.f32.mrf.mxu1  ;;  %v1625_v21 = vadd.f32 %v1624_v44, %v10241_v13 }
 0x15d   :  { %v1626_v51 = vpop.f32.mrf.mxu0 }
 0x15e   :  { %v1739_v27 = vpop.f32.mrf.mxu1  ;;  %v10319_v52 = vadd.f32 %v1737_v49, %v1625_v21  ;;  %v1627_v55 = vadd.f32 %v1626_v51, %v10277_v8 }
 0x15f   :  { %v1628_v15 = vpop.f32.mrf.mxu0 }
 0x160   :  { %v1741_v10 = vpop.f32.mrf.mxu1  ;;  %v10322_v60 = vadd.f32 %v1739_v27, %v1627_v55  ;;  %v1629_v61 = vadd.f32 %v1628_v15, %v10241_v13  ;;  %v10969_v15 = vsub.s32 2, %v10228_v47 }
 0x161   :  { %v1630_v0 = vpop.f32.mrf.mxu0 }
 0x162   :  { %v1743_v2 = vpop.f32.mrf.mxu1  ;;  %v10325_v3 = vadd.f32 %v1741_v10, %v1629_v61  ;;  %v1631_v30 = vadd.f32 %v1630_v0, %v10277_v8  ;;  %v10968_v0 = vsub.s32 3, %v10228_v47 }
 0x163   :  { %v1634_v22 = vpop.f32.mrf.mxu0 }
 0x164   :  { %v1747_v37 = vpop.f32.mrf.mxu1  ;;  %v10328_v4 = vadd.f32 %v1743_v2, %v1631_v30  ;;  %v1635_v9 = vadd.f32 %v1634_v22, %v10241_v13 }
 0x165   :  { %v1636_v12 = vpop.f32.mrf.mxu0 }
 0x166   :  { %v1749_v34 = vpop.f32.mrf.mxu1  ;;  %v10331_v18 = vadd.f32 %v1747_v37, %v1635_v9  ;;  %v1637_v54 = vadd.f32 %v1636_v12, %v10277_v8 }
 0x167   :  { %v1638_v20 = vpop.f32.mrf.mxu0 }
 0x168   :  { %v1751_v24 = vpop.f32.mrf.mxu1  ;;  %v10334_v5 = vadd.f32 %v1749_v34, %v1637_v54  ;;  %v1639_v31 = vadd.f32 %v1638_v20, %v10241_v13  ;;  %v10354_v34 = vrot.slane %v10234_v7, %v10969_v15 }
 0x169   :  { %v1640_v32 = vpop.f32.mrf.mxu0 }
 0x16a   :  { %v1753_v59 = vpop.f32.mrf.mxu1  ;;  %v10337_v44 = vadd.f32 %v1751_v24, %v1639_v31  ;;  %v1641_v49 = vadd.f32 %v1640_v32, %v10277_v8  ;;  %v10359_v24 = vrot.slane %v10234_v7, %v10968_v0  ;;  %v1577_v31 = vadd.f32 %v10244_v19, %v10277_v8 }
 0x16b   :  { %v1644_v21 = vpop.f32.mrf.mxu0  ;;  %v1579_v32 = vadd.f32 %v10250_v25, %v10241_v13 }
 0x16c   :  { %v1757_v51 = vpop.f32.mrf.mxu1  ;;  %v10340_v27 = vadd.f32 %v1753_v59, %v1641_v49  ;;  %v1645_v55 = vadd.f32 %v1644_v21, %v10241_v13  ;;  %v1690_v19 = vadd.f32 %v10246_v58, %v1577_v31 }
 0x16d   :  { %v1646_v10 = vpop.f32.mrf.mxu0 }
 0x16e   :  { %v1759_v61 = vpop.f32.mrf.mxu1  ;;  %v10345_v2 = vadd.f32 %v1757_v51, %v1645_v55  ;;  %v1647_v30 = vadd.f32 %v1646_v10, %v10277_v8  ;;  %v1581_v55 = vadd.f32 %v10254_v63, %v10277_v8 }
 0x16f   :  { %v1648_v22 = vpop.f32.mrf.mxu0 }
 0x170   :  { %v1761_v37 = vpop.f32.mrf.mxu1  ;;  %v10348_v9 = vadd.f32 %v1759_v61, %v1647_v30  ;;  %v1649_v12 = vadd.f32 %v1648_v22, %v10241_v13  ;;  %v1692_v13 = vadd.f32 %v10252_v46, %v1579_v32 }
 0x171   :  { %v1650_v54 = vpop.f32.mrf.mxu0 }
 0x172   :  { %v1763_v20 = vpop.f32.mrf.mxu1  ;;  %v10365_v59 = vadd.f32 %v1761_v37, %v1649_v12  ;;  %v1651_v49 = vadd.f32 %v1650_v54, %v10277_v8  ;;  %v1694_v12 = vadd.f32 %v10256_v26, %v1581_v55 }
 0x173   :  { %v1800_v21 = vpop.f32.mrf.mxu0 }
 0x174   :  { %v1913_v51 = vpop.f32.mrf.mxu1  ;;  %v10370_v10 = vadd.f32 %v1763_v20, %v1651_v49  ;;  %v1587_v20 = vadd.f32 %v10259_v35, %v10277_v8  ;;  %v1801_v49 = vadd.f32 %v1800_v21, %v10248_v40 }
 0x175   :  { %v10373_v7 = vadd.f32 %v1913_v51, %v10354_v34  ;;  %v1802_v61 = vpop.f32.mrf.mxu0 }
 0x176   :  { %v1915_v30 = vpop.f32.mrf.mxu1  ;;  %v1803_v63 = vadd.f32 %v1802_v61, %v1690_v19  ;;  %v1700_v55 = vadd.f32 %v10261_v36, %v1587_v20  ;;  %v2218_v35 = vmax.f32 %v1801_v49, 0.0 }
 0x177   :  { %v10378_v25 = vadd.f32 %v1915_v30, %v10359_v24  ;;  %v1804_v22 = vpop.f32.mrf.mxu0  ;;  %v1591_v30 = vadd.f32 %v10269_v45, %v10277_v8 }
 0x178   :  { %v10380_v37 = vpop.f32.mrf.mxu1  ;;  %v1805_v54 = vadd.f32 %v1804_v22, %v1692_v13  ;;  %v2219_v0 = vmax.f32 %v1803_v63, 0.0  ;;  %v8304_v22 = vld [vmem:[#allocation4 + $0x270] ss:$8 sps:$4 sm:$0xff]  }
 0x179   :  { %v1806_v51 = vpop.f32.mrf.mxu0 }
 0x17a   :  { %v10386_v16 = vpop.f32.mrf.mxu1  ;;  %v1807_v58 = vadd.f32 %v1806_v51, %v1694_v12  ;;  %v2222_v46 = vmax.f32 %v1805_v54, 0.0  ;;  %v8312_v12 = vld [vmem:[#allocation4 + $0x264] ss:$8 sps:$4 sm:$0xff]  }
 0x17b   :  { %v1810_v31 = vpop.f32.mrf.mxu0 }
 0x17c   :  { %v1923_v32 = vpop.f32.mrf.mxu1  ;;  %v2223_v15 = vmax.f32 %v1807_v58, 0.0  ;;  %v1811_v19 = vadd.f32 %v1810_v31, %v10263_v11  ;;  %v2282_v54 = vpack.c.bf16 %v2222_v46, %v2218_v35  ;;  %v1704_v58 = vadd.f32 %v10271_v1, %v1591_v30  ;;  %v8310_v46 = vld [vmem:[#allocation4 + $0x260] ss:$8 sps:$4 sm:$0xff]  }
 0x17d   :  { %v10391_v26 = vadd.f32 %v1923_v32, %v10354_v34  ;;  %v1812_v61 = vpop.f32.mrf.mxu0  ;;  %v1601_v31 = vadd.f32 %v10286_v23, %v10277_v8  ;;  %v8316_v23 = vld [vmem:[#allocation4 + $0x250] ss:$8 sps:$4 sm:$0xff]  }
 0x17e   :  { %v1925_v40 = vpop.f32.mrf.mxu1  ;;  %v2283_v21 = vpack.c.bf16 %v2223_v15, %v2219_v0  ;;  %v1813_v45 = vadd.f32 %v1812_v61, %v1700_v55  ;;  %v2226_v11 = vmax.f32 %v1811_v19, 0.0 }
 0x17f   :  { %v10396_v13 = vadd.f32 %v1925_v40, %v10359_v24  ;;  %v1814_v63 = vpop.f32.mrf.mxu0 }
 0x180   :  { %v1927_v51 = vpop.f32.mrf.mxu1  ;;  %v1815_v32 = vadd.f32 %v1814_v63, %v10273_v50  ;;  %2742 = vmatprep.mubr.bf16.mxu0 %v2283_v21  ;;  %v2227_v55 = vmax.f32 %v1813_v45, 0.0  ;;  %v8318_v50 = vld [vmem:[#allocation4 + $0x254] ss:$8 sps:$4 sm:$0xff]   ;;  %v8324_v45 = vld [vmem:[#allocation4 + $0x244] ss:$8 sps:$4 sm:$0xff]  }
 0x181   :  { %v10401_v36 = vadd.f32 %v1927_v51, %v10354_v34  ;;  %v1816_v15 = vpop.f32.mrf.mxu0  ;;  %2743 = vmatmul.mubr.bf16.vlgmr.msra.gmra.mxu0 %v2282_v54 }
 0x182   :  { %v10403_v0 = vpop.f32.mrf.mxu1  ;;  %v2230_v20 = vmax.f32 %v1815_v32, 0.0  ;;  %v1817_v49 = vadd.f32 %v1816_v15, %v1704_v58  ;;  %3186 = vmatpush1.bf16.msra.mxu0 %v8304_v22  ;;  %v1714_v32 = vadd.f32 %v10288_v42, %v1601_v31  ;;  %v1611_v42 = vadd.f32 %v10299_v48, %v10277_v8 }
 0x183   :  { %v1820_v1 = vpop.f32.mrf.mxu0  ;;  %3187 = vmatprep.subr.bf16.mxu0 %v8312_v12 }
 0x184   :  { %v1933_v30 = vpop.f32.mrf.mxu1  ;;  %v10407_v35 = vpack.c.bf16 %v2230_v20, %v2226_v11  ;;  %v2231_v61 = vmax.f32 %v1817_v49, 0.0  ;;  %v1821_v40 = vadd.f32 %v1820_v1, %v10280_v56  ;;  %v8322_v49 = vld [vmem:[#allocation4 + $0x240] ss:$8 sps:$4 sm:$0xff]  }
 0x185   :  { %v10411_v21 = vadd.f32 %v1933_v30, %v10354_v34  ;;  %v1822_v19 = vpop.f32.mrf.mxu0 }
 0x186   :  { %v1935_v54 = vpop.f32.mrf.mxu1  ;;  %v2287_v22 = vpack.c.bf16 %v2231_v61, %v2227_v55  ;;  %3188 = vmatpush1.bf16.msra.mxu0 %v8310_v46  ;;  %v1823_v12 = vadd.f32 %v1822_v19, %v10283_v33  ;;  %v2234_v55 = vmax.f32 %v1821_v40, 0.0  ;;  %v8330_v33 = vld [vmem:[#allocation4 + $0x234] ss:$8 sps:$4 sm:$0xff]  }
 0x187   :  { %v10414_v63 = vadd.f32 %v1935_v54, %v10359_v24  ;;  %v1824_v51 = vpop.f32.mrf.mxu0  ;;  %3189 = vmatprep.subr.bf16.mxu0 %v8318_v50 }
 0x188   :  { %v1937_v58 = vpop.f32.mrf.mxu1  ;;  %v1825_v56 = vadd.f32 %v1824_v51, %v10290_v62  ;;  %3217 = vmatprep.mubr.bf16.mxu0 %v2287_v22  ;;  %v2235_v31 = vmax.f32 %v1823_v12, 0.0  ;;  %v8328_v12 = vld [vmem:[#allocation4 + $0x230] ss:$8 sps:$4 sm:$0xff]  }
 0x189   :  { %v10420_v15 = vadd.f32 %v1937_v58, %v10354_v34  ;;  %v1826_v11 = vpop.f32.mrf.mxu0 }
 0x18a   :  { %v1939_v20 = vpop.f32.mrf.mxu1  ;;  %v2238_v46 = vmax.f32 %v1825_v56, 0.0  ;;  %v1827_v1 = vadd.f32 %v1826_v11, %v1714_v32  ;;  %3190 = vmatpush1.bf16.msra.mxu0 %v8316_v23 }
 0x18b   :  { %v10423_v30 = vadd.f32 %v1939_v20, %v10359_v24  ;;  %v1830_v62 = vpop.f32.mrf.mxu0  ;;  %3191 = vmatprep.subr.bf16.mxu0 %v8324_v45  ;;  %v8336_v45 = vld [vmem:[#allocation4 + $0x224] ss:$8 sps:$4 sm:$0xff]  }
 0x18c   :  { %v1943_v50 = vpop.f32.mrf.mxu1  ;;  %v10427_v61 = vpack.c.bf16 %v2238_v46, %v2234_v55  ;;  %v2239_v19 = vmax.f32 %v1827_v1, 0.0  ;;  %v1831_v54 = vadd.f32 %v1830_v62, %v10293_v6  ;;  %v1724_v6 = vadd.f32 %v10301_v57, %v1611_v42  ;;  %v8334_v1 = vld [vmem:[#allocation4 + $0x220] ss:$8 sps:$4 sm:$0xff]  }
 0x18d   :  { %v10431_v40 = vadd.f32 %v1943_v50, %v10354_v34  ;;  %v1832_v22 = vpop.f32.mrf.mxu0  ;;  %v8342_v50 = vld [vmem:[#allocation4 + $0x214] ss:$8 sps:$4 sm:$0xff]  }
 0x18e   :  { %v1945_v51 = vpop.f32.mrf.mxu1  ;;  %v10433_v58 = vpack.c.bf16 %v2239_v19, %v2235_v31  ;;  %v1833_v23 = vadd.f32 %v1832_v22, %v10296_v43  ;;  %3192 = vmatpush1.bf16.msra.mxu0 %v8322_v49  ;;  %v2242_v43 = vmax.f32 %v1831_v54, 0.0 }
 0x18f   :  { %v10437_v48 = vadd.f32 %v1945_v51, %v10359_v24  ;;  %v1834_v32 = vpop.f32.mrf.mxu0  ;;  %3193 = vmatprep.subr.bf16.mxu0 %v8330_v33  ;;  %v1621_v33 = vadd.f32 %v10312_v38, %v10277_v8  ;;  %v8340_v38 = vld [vmem:[#allocation4 + $0x210] ss:$8 sps:$4 sm:$0xff]  }
 0x190   :  { %v1947_v56 = vpop.f32.mrf.mxu1  ;;  %v1835_v11 = vadd.f32 %v1834_v32, %v10303_v14  ;;  %v2243_v57 = vmax.f32 %v1833_v23, 0.0  ;;  %v8348_v23 = vld [vmem:[#allocation4 + $0x204] ss:$8 sps:$4 sm:$0xff]  }
 0x191   :  { %v10442_v20 = vadd.f32 %v1947_v56, %v10354_v34  ;;  %v1836_v55 = vpop.f32.mrf.mxu0 }
 0x192   :  { %v1949_v46 = vpop.f32.mrf.mxu1  ;;  %v2246_v31 = vmax.f32 %v1835_v11, 0.0  ;;  %v1837_v62 = vadd.f32 %v1836_v55, %v1724_v6  ;;  %3194 = vmatpush1.bf16.msra.mxu0 %v8328_v12 }
 0x193   :  { %v10445_v49 = vadd.f32 %v1949_v46, %v10359_v24  ;;  %v1840_v42 = vpop.f32.mrf.mxu0  ;;  %3195 = vmatprep.subr.bf16.mxu0 %v8336_v45 }
 0x194   :  { %v1953_v14 = vpop.f32.mrf.mxu1  ;;  %v10449_v19 = vpack.c.bf16 %v2246_v31, %v2242_v43  ;;  %v2247_v22 = vmax.f32 %v1837_v62, 0.0  ;;  %v1841_v51 = vadd.f32 %v1840_v42, %v10306_v29  ;;  %v1734_v29 = vadd.f32 %v10314_v39, %v1621_v33  ;;  %v8346_v62 = vld [vmem:[#allocation4 + $0x200] ss:$8 sps:$4 sm:$0xff]  }
 0x195   :  { %v10453_v54 = vadd.f32 %v1953_v14, %v10354_v34  ;;  %v1842_v32 = vpop.f32.mrf.mxu0  ;;  %v8354_v14 = vld [vmem:[#allocation4 + $0x2f4] ss:$8 sps:$4 sm:$0xff]  }
 0x196   :  { %v1955_v56 = vpop.f32.mrf.mxu1  ;;  %v10455_v6 = vpack.c.bf16 %v2247_v22, %v2243_v57  ;;  %v1843_v12 = vadd.f32 %v1842_v32, %v10309_v53  ;;  %3196 = vmatpush1.bf16.msra.mxu0 %v8334_v1  ;;  %v2250_v53 = vmax.f32 %v1841_v51, 0.0 }
 0x197   :  { %v10459_v8 = vadd.f32 %v1955_v56, %v10359_v24  ;;  %v1844_v45 = vpop.f32.mrf.mxu0  ;;  %3197 = vmatprep.subr.bf16.mxu0 %v8342_v50 }
 0x198   :  { %v1957_v11 = vpop.f32.mrf.mxu1  ;;  %v1845_v55 = vadd.f32 %v1844_v45, %v10316_v17  ;;  %v2251_v22 = vmax.f32 %v1843_v12, 0.0  ;;  %v8352_v12 = vld [vmem:[#allocation4 + $0x2f0] ss:$8 sps:$4 sm:$0xff]  }
 0x199   :  { %v10464_v46 = vadd.f32 %v1957_v11, %v10354_v34  ;;  %v1846_v43 = vpop.f32.mrf.mxu0 }
 0x19a   :  { %v1959_v31 = vpop.f32.mrf.mxu1  ;;  %v2254_v57 = vmax.f32 %v1845_v55, 0.0  ;;  %v1847_v42 = vadd.f32 %v1846_v43, %v1734_v29  ;;  %3198 = vmatpush1.bf16.msra.mxu0 %v8340_v38 }
 0x19b   :  { %v10467_v1 = vadd.f32 %v1959_v31, %v10359_v24  ;;  %v1850_v50 = vpop.f32.mrf.mxu0  ;;  %3199 = vmatprep.subr.bf16.mxu0 %v8348_v23  ;;  %v8360_v23 = vld [vmem:[#allocation4 + $0x2e4] ss:$8 sps:$4 sm:$0xff]  }
 0x19c   :  { %v1963_v32 = vpop.f32.mrf.mxu1  ;;  %v10469_v39 = vpack.c.bf16 %v2254_v57, %v2250_v53  ;;  %v2255_v17 = vmax.f32 %v1847_v42, 0.0  ;;  %v1851_v33 = vadd.f32 %v1850_v50, %v10319_v52  ;;  %v8358_v42 = vld [vmem:[#allocation4 + $0x2e0] ss:$8 sps:$4 sm:$0xff]  }
 0x19d   :  { %v10473_v56 = vadd.f32 %v1963_v32, %v10354_v34  ;;  %v1852_v51 = vpop.f32.mrf.mxu0 }
 0x19e   :  { %v1965_v45 = vpop.f32.mrf.mxu1  ;;  %v10475_v11 = vpack.c.bf16 %v2255_v17, %v2251_v22  ;;  %v1853_v29 = vadd.f32 %v1852_v51, %v10322_v60  ;;  %3200 = vmatpush1.bf16.msra.mxu0 %v8346_v62  ;;  %v2258_v22 = vmax.f32 %v1851_v33, 0.0  ;;  %v8366_v62 = vld [vmem:[#allocation4 + $0x2d4] ss:$8 sps:$4 sm:$0xff]  }
 0x19f   :  { %v10479_v38 = vadd.f32 %v1965_v45, %v10359_v24  ;;  %v1854_v55 = vpop.f32.mrf.mxu0  ;;  %3201 = vmatprep.subr.bf16.mxu0 %v8354_v14 }
 0x1a0   :  { %v1967_v43 = vpop.f32.mrf.mxu1  ;;  %v1855_v52 = vadd.f32 %v1854_v55, %v10325_v3  ;;  %v2259_v17 = vmax.f32 %v1853_v29, 0.0  ;;  %v8364_v29 = vld [vmem:[#allocation4 + $0x2d0] ss:$8 sps:$4 sm:$0xff]  }
 0x1a1   :  { %v10483_v31 = vadd.f32 %v1967_v43, %v10354_v34  ;;  %v1856_v53 = vpop.f32.mrf.mxu0 }
 0x1a2   :  { %v1969_v57 = vpop.f32.mrf.mxu1  ;;  %v2262_v50 = vmax.f32 %v1855_v52, 0.0  ;;  %v1857_v60 = vadd.f32 %v1856_v53, %v10328_v4  ;;  %3202 = vmatpush2.bf16.msra.mxu0 %v8352_v12 }
 0x1a3   :  { %v10487_v32 = vadd.f32 %v1969_v57, %v10359_v24  ;;  %v1860_v51 = vpop.f32.mrf.mxu0  ;;  %3203 = vmatprep.subr.bf16.mxu0 %v8360_v23  ;;  %v8372_v23 = vld [vmem:[#allocation4 + $0x2c4] ss:$8 sps:$4 sm:$0xff]  }
 0x1a4   :  { %v1973_v14 = vpop.f32.mrf.mxu1  ;;  %v10489_v3 = vpack.c.bf16 %v2262_v50, %v2258_v22  ;;  %v2263_v45 = vmax.f32 %v1857_v60, 0.0  ;;  %v1861_v55 = vadd.f32 %v1860_v51, %v10331_v18 }
 0x1a5   :  { %v10493_v43 = vadd.f32 %v1973_v14, %v10354_v34  ;;  %v1862_v33 = vpop.f32.mrf.mxu0 }
 0x1a6   :  { %10979 = vst [vmem:[#allocation15_spill] sm:$0xff] %v10489_v3  ;;  %v1975_v52 = vpop.f32.mrf.mxu1  ;;  %v10495_v4 = vpack.c.bf16 %v2263_v45, %v2259_v17  ;;  %v1863_v53 = vadd.f32 %v1862_v33, %v10334_v5  ;;  %3204 = vmatpush2.bf16.msra.mxu0 %v8358_v42  ;;  %v8370_v17 = vld [vmem:[#allocation4 + $0x2c0] ss:$8 sps:$4 sm:$0xff]   ;;  %v2266_v14 = vmax.f32 %v1861_v55, 0.0  ;;  %v8378_v42 = vld [vmem:[#allocation4 + $0x2b4] ss:$8 sps:$4 sm:$0xff]  }
 0x1a7   :  { %v10499_v12 = vadd.f32 %v1975_v52, %v10359_v24  ;;  %v1864_v57 = vpop.f32.mrf.mxu0  ;;  %3205 = vmatprep.subr.bf16.mxu0 %v8366_v62 }
 0x1a8   :  { %v1977_v22 = vpop.f32.mrf.mxu1  ;;  %v1865_v18 = vadd.f32 %v1864_v57, %v10337_v44  ;;  %v2267_v52 = vmax.f32 %v1863_v53, 0.0  ;;  %v8376_v53 = vld [vmem:[#allocation4 + $0x2b0] ss:$8 sps:$4 sm:$0xff]  }
 0x1a9   :  { %v10503_v50 = vadd.f32 %v1977_v22, %v10354_v34  ;;  %v1866_v60 = vpop.f32.mrf.mxu0 }
 0x1aa   :  { %v1979_v51 = vpop.f32.mrf.mxu1  ;;  %v2270_v45 = vmax.f32 %v1865_v18, 0.0  ;;  %v1867_v5 = vadd.f32 %v1866_v60, %v10340_v27  ;;  %3206 = vmatpush2.bf16.msra.mxu0 %v8364_v29 }
 0x1ab   :  { %v10507_v33 = vadd.f32 %v1979_v51, %v10359_v24  ;;  %v1870_v47 = vpop.f32.mrf.mxu0  ;;  %3207 = vmatprep.subr.bf16.mxu0 %v8372_v23  ;;  %v8384_v23 = vld [vmem:[#allocation4 + $0x2a4] ss:$8 sps:$4 sm:$0xff]  }
 0x1ac   :  { %v1983_v62 = vpop.f32.mrf.mxu1  ;;  %v10509_v44 = vpack.c.bf16 %v2270_v45, %v2266_v14  ;;  %v2271_v57 = vmax.f32 %v1867_v5, 0.0  ;;  %v1871_v22 = vadd.f32 %v1870_v47, %v10345_v2 }
 0x1ad   :  { %v10513_v28 = vadd.f32 %v1983_v62, %v10354_v34  ;;  %v1872_v55 = vpop.f32.mrf.mxu0 }
 0x1ae   :  { %10980 = vst [vmem:[#allocation16_spill] sm:$0xff] %v10509_v44  ;;  %v1985_v18 = vpop.f32.mrf.mxu1  ;;  %v10515_v27 = vpack.c.bf16 %v2271_v57, %v2267_v52  ;;  %v1873_v60 = vadd.f32 %v1872_v55, %v10348_v9  ;;  %3208 = vmatpush2.bf16.msra.mxu0 %v8370_v17  ;;  %v8382_v52 = vld [vmem:[#allocation4 + $0x2a0] ss:$8 sps:$4 sm:$0xff]   ;;  %v2274_v62 = vmax.f32 %v1871_v22, 0.0  ;;  %v8390_v17 = vld [vmem:[#allocation4 + $0x294] ss:$8 sps:$4 sm:$0xff]   ;;  %v1918_v22 = vadd.f32 %v10380_v37, %v10354_v34 }
 0x1af   :  { %v10519_v29 = vadd.f32 %v1985_v18, %v10359_v24  ;;  %v1874_v51 = vpop.f32.mrf.mxu0  ;;  %3209 = vmatprep.subr.bf16.mxu0 %v8378_v42  ;;  %v8394_v37 = vld [vmem:[#allocation4 + $0x280] ss:$8 sps:$4 sm:$0xff]  }
 0x1b0   :  { %10981 = vst [vmem:[#allocation17_spill] sm:$0xff] %v10515_v27  ;;  %v1987_v14 = vpop.f32.mrf.mxu1  ;;  %v1875_v47 = vadd.f32 %v1874_v51, %v10365_v59  ;;  %v2275_v42 = vmax.f32 %v1873_v60, 0.0  ;;  %v1920_v60 = vadd.f32 %v10386_v16, %v10359_v24 }
 0x1b1   :  { %v10523_v2 = vadd.f32 %v1987_v14, %v10354_v34  ;;  %v1876_v45 = vpop.f32.mrf.mxu0 }
 0x1b2   :  { %v1989_v5 = vpop.f32.mrf.mxu1  ;;  %v2278_v57 = vmax.f32 %v1875_v47, 0.0  ;;  %v1877_v9 = vadd.f32 %v1876_v45, %v10370_v10  ;;  %3210 = vmatpush2.bf16.msra.mxu0 %v8376_v53  ;;  %v8388_v53 = vld [vmem:[#allocation4 + $0x290] ss:$8 sps:$4 sm:$0xff]   ;;  %v8396_v45 = vld [vmem:[#allocation4 + $0x284] ss:$8 sps:$4 sm:$0xff]  }
 0x1b3   :  { %v10527_v55 = vadd.f32 %v1989_v5, %v10359_v24  ;;  %v2026_v18 = vpop.f32.mrf.mxu0  ;;  %3211 = vmatprep.subr.bf16.mxu0 %v8384_v23 }
 0x1b4   :  { %v2139_v41 = vpop.f32.mrf.mxu1  ;;  %v10529_v59 = vpack.c.bf16 %v2278_v57, %v2274_v62  ;;  %v2279_v51 = vmax.f32 %v1877_v9, 0.0  ;;  %v2027_v14 = vadd.f32 %v2026_v18, %v10373_v7 }
 0x1b5   :  { %v2028_v44 = vpop.f32.mrf.mxu0 }
 0x1b6   :  { %10982 = vst [vmem:[#allocation18_spill] sm:$0xff] %v10529_v59  ;;  %v2141_v27 = vpop.f32.mrf.mxu1  ;;  %v10534_v10 = vpack.c.bf16 %v2279_v51, %v2275_v42  ;;  %v2029_v47 = vadd.f32 %v2028_v44, %v10378_v25  ;;  %3212 = vmatpush2.bf16.msra.mxu0 %v8382_v52  ;;  %v2140_v62 = vadd.f32 %v2139_v41, %v2027_v14  ;;  %v8402_v42 = vld [vmem:[#allocation4 + $0x474] ss:$8 sps:$4 sm:$0xff]   ;;  %v8400_v41 = vld [vmem:[#allocation4 + $0x470] ss:$8 sps:$4 sm:$0xff]  }
 0x1b7   :  { %v2030_v5 = vpop.f32.mrf.mxu0  ;;  %3213 = vmatprep.subr.bf16.mxu0 %v8390_v17 }
 0x1b8   :  { %10983 = vst [vmem:[#allocation19_spill] sm:$0xff] %v10534_v10  ;;  %v2143_v23 = vpop.f32.mrf.mxu1  ;;  %v2031_v7 = vadd.f32 %v2030_v5, %v1918_v22  ;;  %v2142_v18 = vadd.f32 %v2141_v27, %v2029_v47  ;;  %v2220_v52 = vmax.f32 %v2140_v62, 0.0  ;;  %v8408_v47 = vld [vmem:[#allocation4 + $0x464] ss:$8 sps:$4 sm:$0xff]   ;;  %v8403_v62 = vld [vmem:[#allocation4 + $0x370] ss:$8 sps:$4 sm:$0xff]  }
 0x1b9   :  { %v2032_v57 = vpop.f32.mrf.mxu0 }
 0x1ba   :  { %v2145_v9 = vpop.f32.mrf.mxu1  ;;  %v2144_v59 = vadd.f32 %v2143_v23, %v2031_v7  ;;  %v2033_v34 = vadd.f32 %v2032_v57, %v1920_v60  ;;  %3214 = vmatpush2.bf16.msra.mxu0 %v8388_v53  ;;  %v2221_v14 = vmax.f32 %v2142_v18, 0.0  ;;  %v8411_v18 = vld [vmem:[#allocation4 + $0x364] ss:$8 sps:$4 sm:$0xff]  }
 0x1bb   :  { %v2036_v25 = vpop.f32.mrf.mxu0  ;;  %3215 = vmatprep.subr.bf16.mxu0 %v8396_v45  ;;  %v1930_v45 = vadd.f32 %v10403_v0, %v10359_v24  ;;  %v8414_v0 = vld [vmem:[#allocation4 + $0x454] ss:$8 sps:$4 sm:$0xff]  }
 0x1bc   :  { %v2149_v44 = vpop.f32.mrf.mxu1  ;;  %v2224_v51 = vmax.f32 %v2144_v59, 0.0  ;;  %v2146_v10 = vadd.f32 %v2145_v9, %v2033_v34  ;;  %v2037_v17 = vadd.f32 %v2036_v25, %v10391_v26  ;;  %v8406_v9 = vld [vmem:[#allocation4 + $0x460] ss:$8 sps:$4 sm:$0xff]  }
 0x1bd   :  { %v2038_v3 = vpop.f32.mrf.mxu0 }
 0x1be   :  { %v2151_v16 = vpop.f32.mrf.mxu1  ;;  %v2284_v22 = vpack.c.bf16 %v2224_v51, %v2220_v52  ;;  %v2225_v5 = vmax.f32 %v2146_v10, 0.0  ;;  %v2039_v27 = vadd.f32 %v2038_v3, %v10396_v13  ;;  %3216 = vmatpush2.bf16.msra.mxu0 %v8394_v37  ;;  %v2150_v60 = vadd.f32 %v2149_v44, %v2037_v17  ;;  %v8412_v17 = vld [vmem:[#allocation4 + $0x450] ss:$8 sps:$4 sm:$0xff]  }
 0x1bf   :  { %v2040_v53 = vpop.f32.mrf.mxu0  ;;  %3660 = vmatprep.subr.bf16.mxu0 %v8402_v42 }
 0x1c0   :  { %v2153_v23 = vpop.f32.mrf.mxu1  ;;  %v2285_v59 = vpack.c.bf16 %v2225_v5, %v2221_v14  ;;  %v2041_v26 = vadd.f32 %v2040_v53, %v10401_v36  ;;  %v2152_v7 = vadd.f32 %v2151_v16, %v2039_v27  ;;  %v2228_v37 = vmax.f32 %v2150_v60, 0.0  ;;  %v8417_v5 = vld [vmem:[#allocation4 + $0x354] ss:$8 sps:$4 sm:$0xff]   ;;  %v8420_v27 = vld [vmem:[#allocation4 + $0x444] ss:$8 sps:$4 sm:$0xff]  }
 0x1c1   :  { %3218 = vmatmul.mubr.bf16.vlgmr.msra.gmra.mxu0 %v10407_v35  ;;  %v2042_v57 = vpop.f32.mrf.mxu0  ;;  %v8409_v35 = vld [vmem:[#allocation4 + $0x360] ss:$8 sps:$4 sm:$0xff]  }
 0x1c2   :  { %v2155_v10 = vpop.f32.mrf.mxu1  ;;  %v2043_v13 = vadd.f32 %v2042_v57, %v1930_v45  ;;  %v2154_v3 = vadd.f32 %v2153_v23, %v2041_v26  ;;  %3661 = vmatpush1.bf16.msra.mxu0 %v8400_v41  ;;  %3692 = vmatprep.mubr.bf16.mxu0 %v10433_v58  ;;  %v2229_v44 = vmax.f32 %v2152_v7, 0.0  ;;  %v8415_v23 = vld [vmem:[#allocation4 + $0x350] ss:$8 sps:$4 sm:$0xff]   ;;  %v8418_v26 = vld [vmem:[#allocation4 + $0x440] ss:$8 sps:$4 sm:$0xff]  }
 0x1c3   :  { %2785 = vmatprep.mubr.bf16.mxu1 %v2285_v59  ;;  %v2046_v34 = vpop.f32.mrf.mxu0  ;;  %3662 = vmatprep.subr.bf16.mxu0 %v8408_v47  ;;  %v8423_v7 = vld [vmem:[#allocation4 + $0x344] ss:$8 sps:$4 sm:$0xff]   ;;  %v8426_v57 = vld [vmem:[#allocation4 + $0x434] ss:$8 sps:$4 sm:$0xff]  }
 0x1c4   :  { %v2159_v24 = vpop.f32.mrf.mxu1  ;;  %v2232_v36 = vmax.f32 %v2154_v3, 0.0  ;;  %v2047_v42 = vadd.f32 %v2046_v34, %v10411_v21  ;;  %v2156_v25 = vadd.f32 %v2155_v10, %v2043_v13  ;;  %2786 = vmatmul.mubr.bf16.vlgmr.msra.gmra.mxu1 %v2284_v22  ;;  %v8421_v34 = vld [vmem:[#allocation4 + $0x340] ss:$8 sps:$4 sm:$0xff]  }
 0x1c5   :  { %3229 = vmatpush1.bf16.msra.mxu1 %v8403_v62  ;;  %v2048_v52 = vpop.f32.mrf.mxu0 }
 0x1c6   :  { %v2161_v51 = vpop.f32.mrf.mxu1  ;;  %v10547_v16 = vpack.c.bf16 %v2232_v36, %v2228_v37  ;;  %v2233_v58 = vmax.f32 %v2156_v25, 0.0  ;;  %v2049_v41 = vadd.f32 %v2048_v52, %v10414_v63  ;;  %v2160_v14 = vadd.f32 %v2159_v24, %v2047_v42  ;;  %3663 = vmatpush1.bf16.msra.mxu0 %v8406_v9  ;;  %3230 = vmatprep.subr.bf16.mxu1 %v8411_v18  ;;  %v8432_v52 = vld [vmem:[#allocation4 + $0x424] ss:$8 sps:$4 sm:$0xff]  }
 0x1c7   :  { %v2050_v47 = vpop.f32.mrf.mxu0  ;;  %3664 = vmatprep.subr.bf16.mxu0 %v8414_v0 }
 0x1c8   :  { %v2163_v21 = vpop.f32.mrf.mxu1  ;;  %v2289_v22 = vpack.c.bf16 %v2233_v58, %v2229_v44  ;;  %v2051_v53 = vadd.f32 %v2050_v47, %v10420_v15  ;;  %v2162_v45 = vadd.f32 %v2161_v51, %v2049_v41  ;;  %v2236_v13 = vmax.f32 %v2160_v14, 0.0  ;;  %v8429_v44 = vld [vmem:[#allocation4 + $0x334] ss:$8 sps:$4 sm:$0xff]   ;;  %v8427_v41 = vld [vmem:[#allocation4 + $0x330] ss:$8 sps:$4 sm:$0xff]  }
 0x1c9   :  { %3231 = vmatpush1.bf16.msra.mxu1 %v8409_v35  ;;  %v2052_v59 = vpop.f32.mrf.mxu0  ;;  %v8430_v47 = vld [vmem:[#allocation4 + $0x420] ss:$8 sps:$4 sm:$0xff]  }
 0x1ca   :  { %v2165_v60 = vpop.f32.mrf.mxu1  ;;  %v2053_v62 = vadd.f32 %v2052_v59, %v10423_v30  ;;  %v2164_v63 = vadd.f32 %v2163_v21, %v2051_v53  ;;  %3665 = vmatpush1.bf16.msra.mxu0 %v8412_v17  ;;  %3232 = vmatprep.subr.bf16.mxu1 %v8417_v5  ;;  %v2237_v24 = vmax.f32 %v2162_v45, 0.0  ;;  %v8424_v30 = vld [vmem:[#allocation4 + $0x430] ss:$8 sps:$4 sm:$0xff]   ;;  %v8438_v53 = vld [vmem:[#allocation4 + $0x414] ss:$8 sps:$4 sm:$0xff]  }
 0x1cb   :  { %3260 = vmatprep.mubr.bf16.mxu1 %v2289_v22  ;;  %v2056_v10 = vpop.f32.mrf.mxu0  ;;  %3666 = vmatprep.subr.bf16.mxu0 %v8420_v27  ;;  %v8435_v22 = vld [vmem:[#allocation4 + $0x324] ss:$8 sps:$4 sm:$0xff]  }
 0x1cc   :  { %v2169_v9 = vpop.f32.mrf.mxu1  ;;  %v2240_v3 = vmax.f32 %v2164_v63, 0.0  ;;  %v2057_v15 = vadd.f32 %v2056_v10, %v10431_v40  ;;  %v2166_v18 = vadd.f32 %v2165_v60, %v2053_v62  ;;  %v8433_v62 = vld [vmem:[#allocation4 + $0x320] ss:$8 sps:$4 sm:$0xff]   ;;  %v8436_v10 = vld [vmem:[#allocation4 + $0x410] ss:$8 sps:$4 sm:$0xff]  }
 0x1cd   :  { %3233 = vmatpush1.bf16.msra.mxu1 %v8415_v23  ;;  %v2058_v0 = vpop.f32.mrf.mxu0 }
 0x1ce   :  { %v2171_v37 = vpop.f32.mrf.mxu1  ;;  %v10553_v36 = vpack.c.bf16 %v2240_v3, %v2236_v13  ;;  %v2241_v42 = vmax.f32 %v2166_v18, 0.0  ;;  %v2059_v25 = vadd.f32 %v2058_v0, %v10437_v48  ;;  %v2170_v35 = vadd.f32 %v2169_v9, %v2057_v15  ;;  %3667 = vmatpush1.bf16.msra.mxu0 %v8418_v26  ;;  %3234 = vmatprep.subr.bf16.mxu1 %v8423_v7  ;;  %v8441_v15 = vld [vmem:[#allocation4 + $0x314] ss:$8 sps:$4 sm:$0xff]   ;;  %v8444_v18 = vld [vmem:[#allocation4 + $0x404] ss:$8 sps:$4 sm:$0xff]  }
 0x1cf   :  { %v2060_v51 = vpop.f32.mrf.mxu0  ;;  %3668 = vmatprep.subr.bf16.mxu0 %v8426_v57 }
 0x1d0   :  { %v2173_v40 = vpop.f32.mrf.mxu1  ;;  %v10556_v17 = vpack.c.bf16 %v2241_v42, %v2237_v24  ;;  %v2061_v58 = vadd.f32 %v2060_v51, %v10442_v20  ;;  %v2172_v14 = vadd.f32 %v2171_v37, %v2059_v25  ;;  %v2244_v59 = vmax.f32 %v2170_v35, 0.0  ;;  %v8439_v37 = vld [vmem:[#allocation4 + $0x310] ss:$8 sps:$4 sm:$0xff]   ;;  %v8442_v35 = vld [vmem:[#allocation4 + $0x400] ss:$8 sps:$4 sm:$0xff]  }
 0x1d1   :  { %3235 = vmatpush1.bf16.msra.mxu1 %v8421_v34  ;;  %v2062_v5 = vpop.f32.mrf.mxu0  ;;  %v8450_v51 = vld [vmem:[#allocation4 + $0x4f4] ss:$8 sps:$4 sm:$0xff]  }
 0x1d2   :  { %v2175_v27 = vpop.f32.mrf.mxu1  ;;  %v2063_v48 = vadd.f32 %v2062_v5, %v10445_v49  ;;  %v2174_v21 = vadd.f32 %v2173_v40, %v2061_v58  ;;  %3669 = vmatpush1.bf16.msra.mxu0 %v8424_v30  ;;  %3236 = vmatprep.subr.bf16.mxu1 %v8429_v44  ;;  %v2245_v63 = vmax.f32 %v2172_v14, 0.0 }
 0x1d3   :  { %v2066_v23 = vpop.f32.mrf.mxu0  ;;  %3670 = vmatprep.subr.bf16.mxu0 %v8432_v52  ;;  %v8447_v52 = vld [vmem:[#allocation4 + $0x304] ss:$8 sps:$4 sm:$0xff]  }
 0x1d4   :  { %v2179_v45 = vpop.f32.mrf.mxu1  ;;  %v2248_v60 = vmax.f32 %v2174_v21, 0.0  ;;  %v2067_v20 = vadd.f32 %v2066_v23, %v10453_v54  ;;  %v2176_v26 = vadd.f32 %v2175_v27, %v2063_v48  ;;  %v8445_v27 = vld [vmem:[#allocation4 + $0x300] ss:$8 sps:$4 sm:$0xff]  }
 0x1d5   :  { %3237 = vmatpush1.bf16.msra.mxu1 %v8427_v41  ;;  %v2068_v7 = vpop.f32.mrf.mxu0 }
 0x1d6   :  { %v2181_v57 = vpop.f32.mrf.mxu1  ;;  %v10561_v49 = vpack.c.bf16 %v2248_v60, %v2244_v59  ;;  %v2249_v9 = vmax.f32 %v2176_v26, 0.0  ;;  %v2069_v13 = vadd.f32 %v2068_v7, %v10459_v8  ;;  %v2180_v3 = vadd.f32 %v2179_v45, %v2067_v20  ;;  %3671 = vmatpush1.bf16.msra.mxu0 %v8430_v47  ;;  %3238 = vmatprep.subr.bf16.mxu1 %v8435_v22  ;;  %v8448_v22 = vld [vmem:[#allocation4 + $0x4f0] ss:$8 sps:$4 sm:$0xff]   ;;  %v8453_v59 = vld [vmem:[#allocation4 + $0x3f4] ss:$8 sps:$4 sm:$0xff]  }
 0x1d7   :  { %v2070_v34 = vpop.f32.mrf.mxu0  ;;  %3672 = vmatprep.subr.bf16.mxu0 %v8438_v53  ;;  %v8456_v60 = vld [vmem:[#allocation4 + $0x4e4] ss:$8 sps:$4 sm:$0xff]  }
 0x1d8   :  { %v2183_v54 = vpop.f32.mrf.mxu1  ;;  %v10564_v24 = vpack.c.bf16 %v2249_v9, %v2245_v63  ;;  %v2071_v0 = vadd.f32 %v2070_v34, %v10464_v46  ;;  %v2182_v30 = vadd.f32 %v2181_v57, %v2069_v13  ;;  %v2252_v41 = vmax.f32 %v2180_v3, 0.0  ;;  %v8451_v63 = vld [vmem:[#allocation4 + $0x3f0] ss:$8 sps:$4 sm:$0xff]   ;;  %v8454_v9 = vld [vmem:[#allocation4 + $0x4e0] ss:$8 sps:$4 sm:$0xff]  }
 0x1d9   :  { %3239 = vmatpush1.bf16.msra.mxu1 %v8433_v62  ;;  %v2072_v42 = vpop.f32.mrf.mxu0  ;;  %v8459_v3 = vld [vmem:[#allocation4 + $0x3e4] ss:$8 sps:$4 sm:$0xff]  }
 0x1da   :  { %v2185_v25 = vpop.f32.mrf.mxu1  ;;  %v2073_v8 = vadd.f32 %v2072_v42, %v10467_v1  ;;  %v2184_v44 = vadd.f32 %v2183_v54, %v2071_v0  ;;  %3673 = vmatpush1.bf16.msra.mxu0 %v8436_v10  ;;  %3240 = vmatprep.subr.bf16.mxu1 %v8441_v15  ;;  %v2253_v47 = vmax.f32 %v2182_v30, 0.0  ;;  %v8462_v15 = vld [vmem:[#allocation4 + $0x4d4] ss:$8 sps:$4 sm:$0xff]   ;;  %v8457_v30 = vld [vmem:[#allocation4 + $0x3e0] ss:$8 sps:$4 sm:$0xff]  }
 0x1db   :  { %v2076_v40 = vpop.f32.mrf.mxu0  ;;  %3674 = vmatprep.subr.bf16.mxu0 %v8444_v18 }
 0x1dc   :  { %v2189_v58 = vpop.f32.mrf.mxu1  ;;  %v2256_v14 = vmax.f32 %v2184_v44, 0.0  ;;  %v2077_v46 = vadd.f32 %v2076_v40, %v10473_v56  ;;  %v2186_v5 = vadd.f32 %v2185_v25, %v2073_v8  ;;  %v8460_v8 = vld [vmem:[#allocation4 + $0x4d0] ss:$8 sps:$4 sm:$0xff]   ;;  %v8465_v40 = vld [vmem:[#allocation4 + $0x3d4] ss:$8 sps:$4 sm:$0xff]  }
 0x1dd   :  { %3241 = vmatpush1.bf16.msra.mxu1 %v8439_v37  ;;  %v2078_v48 = vpop.f32.mrf.mxu0 }
 0x1de   :  { %v2191_v21 = vpop.f32.mrf.mxu1  ;;  %v10569_v1 = vpack.c.bf16 %v2256_v14, %v2252_v41  ;;  %v2257_v53 = vmax.f32 %v2186_v5, 0.0  ;;  %v2079_v23 = vadd.f32 %v2078_v48, %v10479_v38  ;;  %v2190_v45 = vadd.f32 %v2189_v58, %v2077_v46  ;;  %3675 = vmatpush1.bf16.msra.mxu0 %v8442_v35  ;;  %3242 = vmatprep.subr.bf16.mxu1 %v8447_v52  ;;  %v8468_v58 = vld [vmem:[#allocation4 + $0x4c4] ss:$8 sps:$4 sm:$0xff]   ;;  %v8463_v5 = vld [vmem:[#allocation4 + $0x3d0] ss:$8 sps:$4 sm:$0xff]  }
 0x1df   :  { %v2080_v20 = vpop.f32.mrf.mxu0  ;;  %3676 = vmatprep.subr.bf16.mxu0 %v8450_v51 }
 0x1e0   :  { %v2193_v56 = vpop.f32.mrf.mxu1  ;;  %v10572_v26 = vpack.c.bf16 %v2257_v53, %v2253_v47  ;;  %v2081_v62 = vadd.f32 %v2080_v20, %v10483_v31  ;;  %v2192_v7 = vadd.f32 %v2191_v21, %v2079_v23  ;;  %v2260_v54 = vmax.f32 %v2190_v45, 0.0  ;;  %v8466_v21 = vld [vmem:[#allocation4 + $0x4c0] ss:$8 sps:$4 sm:$0xff]   ;;  %v8471_v53 = vld [vmem:[#allocation4 + $0x3c4] ss:$8 sps:$4 sm:$0xff]  }
 0x1e1   :  { %3243 = vmatpush1.bf16.msra.mxu1 %v8445_v27  ;;  %v2082_v57 = vpop.f32.mrf.mxu0  ;;  %v8474_v23 = vld [vmem:[#allocation4 + $0x4b4] ss:$8 sps:$4 sm:$0xff]  }
 0x1e2   :  { %v2195_v10 = vpop.f32.mrf.mxu1  ;;  %v2083_v38 = vadd.f32 %v2082_v57, %v10487_v32  ;;  %v2194_v13 = vadd.f32 %v2193_v56, %v2081_v62  ;;  %3677 = vmatpush2.bf16.msra.mxu0 %v8448_v22  ;;  %3244 = vmatprep.subr.bf16.mxu1 %v8453_v59  ;;  %v2261_v42 = vmax.f32 %v2192_v7, 0.0  ;;  %v8469_v62 = vld [vmem:[#allocation4 + $0x3c0] ss:$8 sps:$4 sm:$0xff]  }
 0x1e3   :  { %v2086_v18 = vpop.f32.mrf.mxu0  ;;  %3678 = vmatprep.subr.bf16.mxu0 %v8456_v60 }
 0x1e4   :  { %v2199_v34 = vpop.f32.mrf.mxu1  ;;  %v2264_v0 = vmax.f32 %v2194_v13, 0.0  ;;  %v2087_v31 = vadd.f32 %v2086_v18, %v10493_v43  ;;  %v2196_v37 = vadd.f32 %v2195_v10, %v2083_v38  ;;  %v8472_v10 = vld [vmem:[#allocation4 + $0x4b0] ss:$8 sps:$4 sm:$0xff]  }
 0x1e5   :  { %3245 = vmatpush2.bf16.msra.mxu1 %v8451_v63  ;;  %v2088_v25 = vpop.f32.mrf.mxu0 }
 0x1e6   :  { %v2201_v35 = vpop.f32.mrf.mxu1  ;;  %v10577_v32 = vpack.c.bf16 %v2264_v0, %v2260_v54  ;;  %v2265_v44 = vmax.f32 %v2196_v37, 0.0  ;;  %v2089_v52 = vadd.f32 %v2088_v25, %v10499_v12  ;;  %v2200_v51 = vadd.f32 %v2199_v34, %v2087_v31  ;;  %3679 = vmatpush2.bf16.msra.mxu0 %v8454_v9  ;;  %3246 = vmatprep.subr.bf16.mxu1 %v8459_v3  ;;  %v8477_v3 = vld [vmem:[#allocation4 + $0x3b4] ss:$8 sps:$4 sm:$0xff]   ;;  %v8475_v0 = vld [vmem:[#allocation4 + $0x3b0] ss:$8 sps:$4 sm:$0xff]  }
 0x1e7   :  { %v2090_v41 = vpop.f32.mrf.mxu0  ;;  %3680 = vmatprep.subr.bf16.mxu0 %v8462_v15  ;;  %v8480_v15 = vld [vmem:[#allocation4 + $0x4a4] ss:$8 sps:$4 sm:$0xff]  }
 0x1e8   :  { %v2203_v43 = vpop.f32.mrf.mxu1  ;;  %v10580_v14 = vpack.c.bf16 %v2265_v44, %v2261_v42  ;;  %v2091_v46 = vadd.f32 %v2090_v41, %v10503_v50  ;;  %v2202_v27 = vadd.f32 %v2201_v35, %v2089_v52  ;;  %v2268_v60 = vmax.f32 %v2200_v51, 0.0  ;;  %v8483_v35 = vld [vmem:[#allocation4 + $0x3a4] ss:$8 sps:$4 sm:$0xff]   ;;  %v8481_v44 = vld [vmem:[#allocation4 + $0x3a0] ss:$8 sps:$4 sm:$0xff]  }
 0x1e9   :  { %3247 = vmatpush2.bf16.msra.mxu1 %v8457_v30  ;;  %v2092_v47 = vpop.f32.mrf.mxu0  ;;  %v8478_v30 = vld [vmem:[#allocation4 + $0x4a0] ss:$8 sps:$4 sm:$0xff]  }
 0x1ea   :  { %v2205_v48 = vpop.f32.mrf.mxu1  ;;  %v2093_v12 = vadd.f32 %v2092_v47, %v10507_v33  ;;  %v2204_v22 = vadd.f32 %v2203_v43, %v2091_v46  ;;  %3681 = vmatpush2.bf16.msra.mxu0 %v8460_v8  ;;  %3248 = vmatprep.subr.bf16.mxu1 %v8465_v40  ;;  %v2269_v63 = vmax.f32 %v2202_v27, 0.0  ;;  %v8486_v8 = vld [vmem:[#allocation4 + $0x494] ss:$8 sps:$4 sm:$0xff]   ;;  %v8487_v27 = vld [vmem:[#allocation4 + $0x390] ss:$8 sps:$4 sm:$0xff]  }
 0x1eb   :  { %v2096_v45 = vpop.f32.mrf.mxu0  ;;  %3682 = vmatprep.subr.bf16.mxu0 %v8468_v58  ;;  %v8484_v58 = vld [vmem:[#allocation4 + $0x490] ss:$8 sps:$4 sm:$0xff]   ;;  %v8490_v47 = vld [vmem:[#allocation4 + $0x480] ss:$8 sps:$4 sm:$0xff]  }
 0x1ec   :  { %v2209_v59 = vpop.f32.mrf.mxu1  ;;  %v2272_v20 = vmax.f32 %v2204_v22, 0.0  ;;  %v2097_v50 = vadd.f32 %v2096_v45, %v10513_v28  ;;  %v2206_v56 = vadd.f32 %v2205_v48, %v2093_v12  ;;  %v8495_v48 = vld [vmem:[#allocation4 + $0x384] ss:$8 sps:$4 sm:$0xff]   ;;  %v8493_v12 = vld [vmem:[#allocation4 + $0x380] ss:$8 sps:$4 sm:$0xff]  }
 0x1ed   :  { %3249 = vmatpush2.bf16.msra.mxu1 %v8463_v5  ;;  %v2098_v7 = vpop.f32.mrf.mxu0  ;;  %v8496_v22 = vld [vmem:[#allocation4 + $0x670] ss:$8 sps:$4 sm:$0xff]  }
 0x1ee   :  { %v2211_v57 = vpop.f32.mrf.mxu1  ;;  %v10585_v33 = vpack.c.bf16 %v2272_v20, %v2268_v60  ;;  %v2273_v9 = vmax.f32 %v2206_v56, 0.0  ;;  %v2099_v38 = vadd.f32 %v2098_v7, %v10519_v29  ;;  %v2210_v13 = vadd.f32 %v2209_v59, %v2097_v50  ;;  %3683 = vmatpush2.bf16.msra.mxu0 %v8466_v21  ;;  %3250 = vmatprep.subr.bf16.mxu1 %v8471_v53  ;;  %v8498_v21 = vld [vmem:[#allocation4 + $0x674] ss:$8 sps:$4 sm:$0xff]   ;;  %v8499_v45 = vld [vmem:[#allocation4 + $0x570] ss:$8 sps:$4 sm:$0xff]  }
 0x1ef   :  { %v2100_v18 = vpop.f32.mrf.mxu0  ;;  %3684 = vmatprep.subr.bf16.mxu0 %v8474_v23  ;;  %v8501_v53 = vld [vmem:[#allocation4 + $0x574] ss:$8 sps:$4 sm:$0xff]   ;;  %v8504_v23 = vld [vmem:[#allocation4 + $0x664] ss:$8 sps:$4 sm:$0xff]   ;;  %v8502_v59 = vld [vmem:[#allocation4 + $0x660] ss:$8 sps:$4 sm:$0xff]  }
 0x1f0   :  { %v2213_v28 = vpop.f32.mrf.mxu1  ;;  %v10588_v34 = vpack.c.bf16 %v2273_v9, %v2269_v63  ;;  %v2101_v54 = vadd.f32 %v2100_v18, %v10523_v2  ;;  %v2212_v42 = vadd.f32 %v2211_v57, %v2099_v38  ;;  %v2276_v52 = vmax.f32 %v2210_v13, 0.0  ;;  %v8489_v2 = vld [vmem:[#allocation4 + $0x394] ss:$8 sps:$4 sm:$0xff]   ;;  %v8507_v60 = vld [vmem:[#allocation4 + $0x564] ss:$8 sps:$4 sm:$0xff]  }
 0x1f1   :  { %3251 = vmatpush2.bf16.msra.mxu1 %v8469_v62  ;;  %v2102_v31 = vpop.f32.mrf.mxu0  ;;  %v8510_v20 = vld [vmem:[#allocation4 + $0x654] ss:$8 sps:$4 sm:$0xff]   ;;  %v8505_v50 = vld [vmem:[#allocation4 + $0x560] ss:$8 sps:$4 sm:$0xff]   ;;  %v8508_v56 = vld [vmem:[#allocation4 + $0x650] ss:$8 sps:$4 sm:$0xff]  }
 0x1f2   :  { %v2215_v37 = vpop.f32.mrf.mxu1  ;;  %v2103_v29 = vadd.f32 %v2102_v31, %v10527_v55  ;;  %v2214_v25 = vadd.f32 %v2213_v28, %v2101_v54  ;;  %3685 = vmatpush2.bf16.msra.mxu0 %v8472_v10  ;;  %3252 = vmatprep.subr.bf16.mxu1 %v8477_v3  ;;  %v2277_v41 = vmax.f32 %v2212_v42, 0.0  ;;  %v8492_v55 = vld [vmem:[#allocation4 + $0x484] ss:$8 sps:$4 sm:$0xff]   ;;  %v8513_v62 = vld [vmem:[#allocation4 + $0x554] ss:$8 sps:$4 sm:$0xff]  }
 0x1f3   :  { %3686 = vmatprep.subr.bf16.mxu0 %v8480_v15  ;;  %v8511_v63 = vld [vmem:[#allocation4 + $0x550] ss:$8 sps:$4 sm:$0xff]   ;;  %v8519_v7 = vld [vmem:[#allocation4 + $0x544] ss:$8 sps:$4 sm:$0xff]   ;;  %v8522_v57 = vld [vmem:[#allocation4 + $0x634] ss:$8 sps:$4 sm:$0xff]  }
 0x1f4   :  { %v2280_v51 = vmax.f32 %v2214_v25, 0.0  ;;  %v2216_v40 = vadd.f32 %v2215_v37, %v2103_v29  ;;  %v8525_v10 = vld [vmem:[#allocation4 + $0x534] ss:$8 sps:$4 sm:$0xff]   ;;  %v8528_v9 = vld [vmem:[#allocation4 + $0x624] ss:$8 sps:$4 sm:$0xff]  }
 0x1f5   :  { %3253 = vmatpush2.bf16.msra.mxu1 %v8475_v0  ;;  %v8523_v38 = vld [vmem:[#allocation4 + $0x530] ss:$8 sps:$4 sm:$0xff]   ;;  %v8526_v13 = vld [vmem:[#allocation4 + $0x620] ss:$8 sps:$4 sm:$0xff]   ;;  %v8531_v3 = vld [vmem:[#allocation4 + $0x524] ss:$8 sps:$4 sm:$0xff]  }
 0x1f6   :  { %v10592_v43 = vpack.c.bf16 %v2280_v51, %v2276_v52  ;;  %v2281_v46 = vmax.f32 %v2216_v40, 0.0  ;;  %3687 = vmatpush2.bf16.msra.mxu0 %v8478_v30  ;;  %3254 = vmatprep.subr.bf16.mxu1 %v8483_v35  ;;  %v8534_v15 = vld [vmem:[#allocation4 + $0x614] ss:$8 sps:$4 sm:$0xff]   ;;  %v8529_v18 = vld [vmem:[#allocation4 + $0x520] ss:$8 sps:$4 sm:$0xff]  }
 0x1f7   :  { %3688 = vmatprep.subr.bf16.mxu0 %v8486_v8  ;;  %v8532_v28 = vld [vmem:[#allocation4 + $0x610] ss:$8 sps:$4 sm:$0xff]   ;;  %v8537_v54 = vld [vmem:[#allocation4 + $0x514] ss:$8 sps:$4 sm:$0xff]   ;;  %v8540_v0 = vld [vmem:[#allocation4 + $0x604] ss:$8 sps:$4 sm:$0xff]  }
 0x1f8   :  { %v10594_v5 = vpack.c.bf16 %v2281_v46, %v2277_v41  ;;  %v8535_v31 = vld [vmem:[#allocation4 + $0x510] ss:$8 sps:$4 sm:$0xff]   ;;  %v8538_v37 = vld [vmem:[#allocation4 + $0x600] ss:$8 sps:$4 sm:$0xff]   ;;  %v8543_v30 = vld [vmem:[#allocation4 + $0x504] ss:$8 sps:$4 sm:$0xff]  }
 0x1f9   :  { %3255 = vmatpush2.bf16.msra.mxu1 %v8481_v44  ;;  %v8546_v42 = vld [vmem:[#allocation4 + $0x6f4] ss:$8 sps:$4 sm:$0xff]   ;;  %v8541_v29 = vld [vmem:[#allocation4 + $0x500] ss:$8 sps:$4 sm:$0xff]   ;;  %v8544_v25 = vld [vmem:[#allocation4 + $0x6f0] ss:$8 sps:$4 sm:$0xff]  }
 0x1fa   :  { %3689 = vmatpush2.bf16.msra.mxu0 %v8484_v58  ;;  %3256 = vmatprep.subr.bf16.mxu1 %v8489_v2  ;;  %v8549_v35 = vld [vmem:[#allocation4 + $0x5f4] ss:$8 sps:$4 sm:$0xff]   ;;  %v8552_v8 = vld [vmem:[#allocation4 + $0x6e4] ss:$8 sps:$4 sm:$0xff]   ;;  %v8547_v44 = vld [vmem:[#allocation4 + $0x5f0] ss:$8 sps:$4 sm:$0xff]  }
 0x1fb   :  { %3690 = vmatprep.subr.bf16.mxu0 %v8492_v55  ;;  %v8550_v52 = vld [vmem:[#allocation4 + $0x6e0] ss:$8 sps:$4 sm:$0xff]   ;;  %v8555_v51 = vld [vmem:[#allocation4 + $0x5e4] ss:$8 sps:$4 sm:$0xff]   ;;  %v8558_v40 = vld [vmem:[#allocation4 + $0x6d4] ss:$8 sps:$4 sm:$0xff]  }
 0x1fc   :  { %v8553_v58 = vld [vmem:[#allocation4 + $0x5e0] ss:$8 sps:$4 sm:$0xff]   ;;  %v8556_v2 = vld [vmem:[#allocation4 + $0x6d0] ss:$8 sps:$4 sm:$0xff]   ;;  %v8561_v41 = vld [vmem:[#allocation4 + $0x5d4] ss:$8 sps:$4 sm:$0xff]  }
 0x1fd   :  { %3257 = vmatpush2.bf16.msra.mxu1 %v8487_v27  ;;  %v8564_v46 = vld [vmem:[#allocation4 + $0x6c4] ss:$8 sps:$4 sm:$0xff]   ;;  %v8559_v55 = vld [vmem:[#allocation4 + $0x5d0] ss:$8 sps:$4 sm:$0xff]   ;;  %v8562_v27 = vld [vmem:[#allocation4 + $0x6c0] ss:$8 sps:$4 sm:$0xff]  }
 0x1fe   :  { %3691 = vmatpush2.bf16.msra.mxu0 %v8490_v47  ;;  %3258 = vmatprep.subr.bf16.mxu1 %v8495_v48  ;;  %v8567_v47 = vld [vmem:[#allocation4 + $0x5c4] ss:$8 sps:$4 sm:$0xff]   ;;  %v8570_v48 = vld [vmem:[#allocation4 + $0x6b4] ss:$8 sps:$4 sm:$0xff]  }
 0x1ff   :  { %4135 = vmatprep.subr.bf16.mxu0 %v8498_v21  ;;  %v8565_v21 = vld [vmem:[#allocation4 + $0x5c0] ss:$8 sps:$4 sm:$0xff]  }
 0x201   :  { %3259 = vmatpush2.bf16.msra.mxu1 %v8493_v12  ;;  %3693 = vmatmul.mubr.bf16.vlgmr.msra.gmra.mxu0 %v10427_v61  ;;  %v8516_v61 = vld [vmem:[#allocation4 + $0x644] ss:$8 sps:$4 sm:$0xff]   ;;  %v8568_v12 = vld [vmem:[#allocation4 + $0x6b0] ss:$8 sps:$4 sm:$0xff]  }
 0x202   :  { %4136 = vmatpush1.bf16.msra.mxu0 %v8496_v22  ;;  %4167 = vmatprep.mubr.bf16.mxu0 %v10455_v6  ;;  %v8514_v6 = vld [vmem:[#allocation4 + $0x640] ss:$8 sps:$4 sm:$0xff]   ;;  %v8573_v22 = vld [vmem:[#allocation4 + $0x5b4] ss:$8 sps:$4 sm:$0xff]  }
 0x203   :  { %3703 = vmatprep.subr.bf16.mxu1 %v8501_v53  ;;  %4137 = vmatprep.subr.bf16.mxu0 %v8504_v23  ;;  %v8576_v53 = vld [vmem:[#allocation4 + $0x6a4] ss:$8 sps:$4 sm:$0xff]   ;;  %v8571_v23 = vld [vmem:[#allocation4 + $0x5b0] ss:$8 sps:$4 sm:$0xff]  }
 0x204   :  { %3261 = vmatmul.mubr.bf16.vlgmr.msra.gmra.mxu1 %v10547_v16  ;;  %v8517_v16 = vld [vmem:[#allocation4 + $0x540] ss:$8 sps:$4 sm:$0xff]  }
 0x205   :  { %3704 = vmatpush1.bf16.msra.mxu1 %v8499_v45  ;;  %3735 = vmatprep.mubr.bf16.mxu1 %v10556_v17  ;;  %v8520_v17 = vld [vmem:[#allocation4 + $0x630] ss:$8 sps:$4 sm:$0xff]   ;;  %v8574_v45 = vld [vmem:[#allocation4 + $0x6a0] ss:$8 sps:$4 sm:$0xff]  }
 0x206   :  { %4138 = vmatpush1.bf16.msra.mxu0 %v8502_v59  ;;  %3705 = vmatprep.subr.bf16.mxu1 %v8507_v60  ;;  %v8579_v59 = vld [vmem:[#allocation4 + $0x5a4] ss:$8 sps:$4 sm:$0xff]   ;;  %v8582_v60 = vld [vmem:[#allocation4 + $0x694] ss:$8 sps:$4 sm:$0xff]  }
 0x207   :  { %4139 = vmatprep.subr.bf16.mxu0 %v8510_v20  ;;  %v8577_v20 = vld [vmem:[#allocation4 + $0x5a0] ss:$8 sps:$4 sm:$0xff]  }
 0x209   :  { %3706 = vmatpush1.bf16.msra.mxu1 %v8505_v50  ;;  %v8580_v50 = vld [vmem:[#allocation4 + $0x690] ss:$8 sps:$4 sm:$0xff]  }
 0x20a   :  { %4140 = vmatpush1.bf16.msra.mxu0 %v8508_v56  ;;  %3707 = vmatprep.subr.bf16.mxu1 %v8513_v62  ;;  %v8585_v56 = vld [vmem:[#allocation4 + $0x594] ss:$8 sps:$4 sm:$0xff]   ;;  %v8588_v62 = vld [vmem:[#allocation4 + $0x684] ss:$8 sps:$4 sm:$0xff]  }
 0x20b   :  { %4141 = vmatprep.subr.bf16.mxu0 %v8516_v61  ;;  %v8583_v61 = vld [vmem:[#allocation4 + $0x590] ss:$8 sps:$4 sm:$0xff]  }
 0x20d   :  { %3708 = vmatpush1.bf16.msra.mxu1 %v8511_v63  ;;  %v8586_v63 = vld [vmem:[#allocation4 + $0x680] ss:$8 sps:$4 sm:$0xff]  }
 0x20e   :  { %4142 = vmatpush1.bf16.msra.mxu0 %v8514_v6  ;;  %3709 = vmatprep.subr.bf16.mxu1 %v8519_v7  ;;  %v8591_v6 = vld [vmem:[#allocation4 + $0x584] ss:$8 sps:$4 sm:$0xff]   ;;  %v8594_v7 = vld [vmem:[#allocation4 + $0x874] ss:$8 sps:$4 sm:$0xff]  }
 0x20f   :  { %4143 = vmatprep.subr.bf16.mxu0 %v8522_v57  ;;  %v8589_v57 = vld [vmem:[#allocation4 + $0x580] ss:$8 sps:$4 sm:$0xff]  }
 0x211   :  { %3710 = vmatpush1.bf16.msra.mxu1 %v8517_v16  ;;  %v8592_v16 = vld [vmem:[#allocation4 + $0x870] ss:$8 sps:$4 sm:$0xff]  }
 0x212   :  { %4144 = vmatpush1.bf16.msra.mxu0 %v8520_v17  ;;  %3711 = vmatprep.subr.bf16.mxu1 %v8525_v10  ;;  %v8597_v17 = vld [vmem:[#allocation4 + $0x774] ss:$8 sps:$4 sm:$0xff]   ;;  %v8600_v10 = vld [vmem:[#allocation4 + $0x864] ss:$8 sps:$4 sm:$0xff]  }
 0x213   :  { %4145 = vmatprep.subr.bf16.mxu0 %v8528_v9  ;;  %v8595_v9 = vld [vmem:[#allocation4 + $0x770] ss:$8 sps:$4 sm:$0xff]  }
 0x215   :  { %3712 = vmatpush1.bf16.msra.mxu1 %v8523_v38  ;;  %v8598_v38 = vld [vmem:[#allocation4 + $0x860] ss:$8 sps:$4 sm:$0xff]  }
 0x216   :  { %4146 = vmatpush1.bf16.msra.mxu0 %v8526_v13  ;;  %3713 = vmatprep.subr.bf16.mxu1 %v8531_v3  ;;  %v8603_v13 = vld [vmem:[#allocation4 + $0x764] ss:$8 sps:$4 sm:$0xff]   ;;  %v8606_v3 = vld [vmem:[#allocation4 + $0x854] ss:$8 sps:$4 sm:$0xff]  }
 0x217   :  { %4147 = vmatprep.subr.bf16.mxu0 %v8534_v15  ;;  %v8601_v15 = vld [vmem:[#allocation4 + $0x760] ss:$8 sps:$4 sm:$0xff]  }
 0x219   :  { %3714 = vmatpush1.bf16.msra.mxu1 %v8529_v18  ;;  %v8604_v18 = vld [vmem:[#allocation4 + $0x850] ss:$8 sps:$4 sm:$0xff]  }
 0x21a   :  { %4148 = vmatpush1.bf16.msra.mxu0 %v8532_v28  ;;  %3715 = vmatprep.subr.bf16.mxu1 %v8537_v54  ;;  %v8609_v28 = vld [vmem:[#allocation4 + $0x754] ss:$8 sps:$4 sm:$0xff]   ;;  %v8607_v54 = vld [vmem:[#allocation4 + $0x750] ss:$8 sps:$4 sm:$0xff]  }
 0x21b   :  { %4149 = vmatprep.subr.bf16.mxu0 %v8540_v0  ;;  %v8615_v0 = vld [vmem:[#allocation4 + $0x744] ss:$8 sps:$4 sm:$0xff]  }
 0x21d   :  { %3716 = vmatpush1.bf16.msra.mxu1 %v8535_v31  ;;  %v8618_v31 = vld [vmem:[#allocation4 + $0x834] ss:$8 sps:$4 sm:$0xff]  }
 0x21e   :  { %4150 = vmatpush1.bf16.msra.mxu0 %v8538_v37  ;;  %3717 = vmatprep.subr.bf16.mxu1 %v8543_v30  ;;  %v8621_v37 = vld [vmem:[#allocation4 + $0x734] ss:$8 sps:$4 sm:$0xff]   ;;  %v8624_v30 = vld [vmem:[#allocation4 + $0x824] ss:$8 sps:$4 sm:$0xff]  }
 0x21f   :  { %4151 = vmatprep.subr.bf16.mxu0 %v8546_v42  ;;  %v8619_v42 = vld [vmem:[#allocation4 + $0x730] ss:$8 sps:$4 sm:$0xff]  }
 0x221   :  { %3718 = vmatpush1.bf16.msra.mxu1 %v8541_v29  ;;  %v8622_v29 = vld [vmem:[#allocation4 + $0x820] ss:$8 sps:$4 sm:$0xff]  }
 0x222   :  { %4152 = vmatpush2.bf16.msra.mxu0 %v8544_v25  ;;  %3719 = vmatprep.subr.bf16.mxu1 %v8549_v35  ;;  %v8627_v25 = vld [vmem:[#allocation4 + $0x724] ss:$8 sps:$4 sm:$0xff]   ;;  %v8630_v35 = vld [vmem:[#allocation4 + $0x814] ss:$8 sps:$4 sm:$0xff]  }
 0x223   :  { %4153 = vmatprep.subr.bf16.mxu0 %v8552_v8  ;;  %v8625_v8 = vld [vmem:[#allocation4 + $0x720] ss:$8 sps:$4 sm:$0xff]  }
 0x225   :  { %3720 = vmatpush2.bf16.msra.mxu1 %v8547_v44  ;;  %v8628_v44 = vld [vmem:[#allocation4 + $0x810] ss:$8 sps:$4 sm:$0xff]  }
 0x226   :  { %4154 = vmatpush2.bf16.msra.mxu0 %v8550_v52  ;;  %3721 = vmatprep.subr.bf16.mxu1 %v8555_v51  ;;  %v8633_v52 = vld [vmem:[#allocation4 + $0x714] ss:$8 sps:$4 sm:$0xff]   ;;  %v8636_v51 = vld [vmem:[#allocation4 + $0x804] ss:$8 sps:$4 sm:$0xff]  }
 0x227   :  { %4155 = vmatprep.subr.bf16.mxu0 %v8558_v40  ;;  %v8631_v40 = vld [vmem:[#allocation4 + $0x710] ss:$8 sps:$4 sm:$0xff]  }
 0x229   :  { %3722 = vmatpush2.bf16.msra.mxu1 %v8553_v58  ;;  %v8634_v58 = vld [vmem:[#allocation4 + $0x800] ss:$8 sps:$4 sm:$0xff]  }
 0x22a   :  { %4156 = vmatpush2.bf16.msra.mxu0 %v8556_v2  ;;  %3723 = vmatprep.subr.bf16.mxu1 %v8561_v41  ;;  %v8639_v2 = vld [vmem:[#allocation4 + $0x704] ss:$8 sps:$4 sm:$0xff]   ;;  %v8642_v41 = vld [vmem:[#allocation4 + $0x8f4] ss:$8 sps:$4 sm:$0xff]  }
 0x22b   :  { %4157 = vmatprep.subr.bf16.mxu0 %v8564_v46  ;;  %v8637_v46 = vld [vmem:[#allocation4 + $0x700] ss:$8 sps:$4 sm:$0xff]  }
 0x22d   :  { %3724 = vmatpush2.bf16.msra.mxu1 %v8559_v55  ;;  %v8640_v55 = vld [vmem:[#allocation4 + $0x8f0] ss:$8 sps:$4 sm:$0xff]  }
 0x22e   :  { %4158 = vmatpush2.bf16.msra.mxu0 %v8562_v27  ;;  %3725 = vmatprep.subr.bf16.mxu1 %v8567_v47  ;;  %v8645_v27 = vld [vmem:[#allocation4 + $0x7f4] ss:$8 sps:$4 sm:$0xff]   ;;  %v8648_v47 = vld [vmem:[#allocation4 + $0x8e4] ss:$8 sps:$4 sm:$0xff]  }
 0x22f   :  { %4159 = vmatprep.subr.bf16.mxu0 %v8570_v48  ;;  %v8643_v48 = vld [vmem:[#allocation4 + $0x7f0] ss:$8 sps:$4 sm:$0xff]  }
 0x231   :  { %3726 = vmatpush2.bf16.msra.mxu1 %v8565_v21  ;;  %v8646_v21 = vld [vmem:[#allocation4 + $0x8e0] ss:$8 sps:$4 sm:$0xff]  }
 0x232   :  { %4160 = vmatpush2.bf16.msra.mxu0 %v8568_v12  ;;  %3727 = vmatprep.subr.bf16.mxu1 %v8573_v22  ;;  %v8651_v12 = vld [vmem:[#allocation4 + $0x7e4] ss:$8 sps:$4 sm:$0xff]   ;;  %v8654_v22 = vld [vmem:[#allocation4 + $0x8d4] ss:$8 sps:$4 sm:$0xff]  }
 0x233   :  { %4161 = vmatprep.subr.bf16.mxu0 %v8576_v53  ;;  %v8649_v53 = vld [vmem:[#allocation4 + $0x7e0] ss:$8 sps:$4 sm:$0xff]  }
 0x235   :  { %3728 = vmatpush2.bf16.msra.mxu1 %v8571_v23  ;;  %v8652_v23 = vld [vmem:[#allocation4 + $0x8d0] ss:$8 sps:$4 sm:$0xff]  }
 0x236   :  { %4162 = vmatpush2.bf16.msra.mxu0 %v8574_v45  ;;  %3729 = vmatprep.subr.bf16.mxu1 %v8579_v59  ;;  %v8657_v45 = vld [vmem:[#allocation4 + $0x7d4] ss:$8 sps:$4 sm:$0xff]   ;;  %v8660_v59 = vld [vmem:[#allocation4 + $0x8c4] ss:$8 sps:$4 sm:$0xff]  }
 0x237   :  { %4163 = vmatprep.subr.bf16.mxu0 %v8582_v60  ;;  %v8655_v60 = vld [vmem:[#allocation4 + $0x7d0] ss:$8 sps:$4 sm:$0xff]  }
 0x239   :  { %3730 = vmatpush2.bf16.msra.mxu1 %v8577_v20  ;;  %v8658_v20 = vld [vmem:[#allocation4 + $0x8c0] ss:$8 sps:$4 sm:$0xff]  }
 0x23a   :  { %4164 = vmatpush2.bf16.msra.mxu0 %v8580_v50  ;;  %3731 = vmatprep.subr.bf16.mxu1 %v8585_v56  ;;  %v8663_v50 = vld [vmem:[#allocation4 + $0x7c4] ss:$8 sps:$4 sm:$0xff]   ;;  %v8666_v56 = vld [vmem:[#allocation4 + $0x8b4] ss:$8 sps:$4 sm:$0xff]  }
 0x23b   :  { %4165 = vmatprep.subr.bf16.mxu0 %v8588_v62  ;;  %v8661_v62 = vld [vmem:[#allocation4 + $0x7c0] ss:$8 sps:$4 sm:$0xff]  }
 0x23d   :  { %3732 = vmatpush2.bf16.msra.mxu1 %v8583_v61  ;;  %v8664_v61 = vld [vmem:[#allocation4 + $0x8b0] ss:$8 sps:$4 sm:$0xff]  }
 0x23e   :  { %4166 = vmatpush2.bf16.msra.mxu0 %v8586_v63  ;;  %3733 = vmatprep.subr.bf16.mxu1 %v8591_v6  ;;  %v8669_v63 = vld [vmem:[#allocation4 + $0x7b4] ss:$8 sps:$4 sm:$0xff]   ;;  %v8672_v6 = vld [vmem:[#allocation4 + $0x8a4] ss:$8 sps:$4 sm:$0xff]  }
 0x23f   :  { %4610 = vmatprep.subr.bf16.mxu0 %v8594_v7  ;;  %v8667_v7 = vld [vmem:[#allocation4 + $0x7b0] ss:$8 sps:$4 sm:$0xff]  }
 0x241   :  { %3734 = vmatpush2.bf16.msra.mxu1 %v8589_v57  ;;  %4168 = vmatmul.mubr.bf16.vlgmr.msra.gmra.mxu0 %v10449_v19  ;;  %v8612_v19 = vld [vmem:[#allocation4 + $0x844] ss:$8 sps:$4 sm:$0xff]   ;;  %v8670_v57 = vld [vmem:[#allocation4 + $0x8a0] ss:$8 sps:$4 sm:$0xff]  }
 0x242   :  { %4611 = vmatpush1.bf16.msra.mxu0 %v8592_v16  ;;  %4642 = vmatprep.mubr.bf16.mxu0 %v10475_v11  ;;  %v8610_v11 = vld [vmem:[#allocation4 + $0x840] ss:$8 sps:$4 sm:$0xff]   ;;  %v8675_v16 = vld [vmem:[#allocation4 + $0x7a4] ss:$8 sps:$4 sm:$0xff]  }
 0x243   :  { %4178 = vmatprep.subr.bf16.mxu1 %v8597_v17  ;;  %4612 = vmatprep.subr.bf16.mxu0 %v8600_v10  ;;  %v8678_v17 = vld [vmem:[#allocation4 + $0x894] ss:$8 sps:$4 sm:$0xff]   ;;  %v8673_v10 = vld [vmem:[#allocation4 + $0x7a0] ss:$8 sps:$4 sm:$0xff]  }
 0x244   :  { %3736 = vmatmul.mubr.bf16.vlgmr.msra.gmra.mxu1 %v10553_v36  ;;  %v8613_v36 = vld [vmem:[#allocation4 + $0x740] ss:$8 sps:$4 sm:$0xff]  }
 0x245   :  { %4179 = vmatpush1.bf16.msra.mxu1 %v8595_v9  ;;  %4210 = vmatprep.mubr.bf16.mxu1 %v10564_v24  ;;  %v8616_v24 = vld [vmem:[#allocation4 + $0x830] ss:$8 sps:$4 sm:$0xff]  }
 0x246   :  { %4613 = vmatpush1.bf16.msra.mxu0 %v8598_v38  ;;  %4180 = vmatprep.subr.bf16.mxu1 %v8603_v13  ;;  %v8676_v9 = vld [vmem:[#allocation4 + $0x890] ss:$8 sps:$4 sm:$0xff]   ;;  %v8681_v38 = vld [vmem:[#allocation4 + $0x794] ss:$8 sps:$4 sm:$0xff]   ;;  %v8684_v13 = vld [vmem:[#allocation4 + $0x884] ss:$8 sps:$4 sm:$0xff]  }
 0x247   :  { %4614 = vmatprep.subr.bf16.mxu0 %v8606_v3  ;;  %v8679_v3 = vld [vmem:[#allocation4 + $0x790] ss:$8 sps:$4 sm:$0xff]  }
 0x249   :  { %4181 = vmatpush1.bf16.msra.mxu1 %v8601_v15  ;;  %v8682_v15 = vld [vmem:[#allocation4 + $0x880] ss:$8 sps:$4 sm:$0xff]  }
 0x24a   :  { %4615 = vmatpush1.bf16.msra.mxu0 %v8604_v18  ;;  %4182 = vmatprep.subr.bf16.mxu1 %v8609_v28  ;;  %v8687_v18 = vld [vmem:[#allocation4 + $0x784] ss:$8 sps:$4 sm:$0xff]   ;;  %v8690_v28 = vld [vmem:[#allocation4 + $0xa74] ss:$8 sps:$4 sm:$0xff]  }
 0x24b   :  { %4616 = vmatprep.subr.bf16.mxu0 %v8612_v19  ;;  %v8685_v19 = vld [vmem:[#allocation4 + $0x780] ss:$8 sps:$4 sm:$0xff]  }
 0x24d   :  { %4183 = vmatpush1.bf16.msra.mxu1 %v8607_v54  ;;  %v8688_v54 = vld [vmem:[#allocation4 + $0xa70] ss:$8 sps:$4 sm:$0xff]  }
 0x24e   :  { %4617 = vmatpush1.bf16.msra.mxu0 %v8610_v11  ;;  %4184 = vmatprep.subr.bf16.mxu1 %v8615_v0  ;;  %v8693_v11 = vld [vmem:[#allocation4 + $0x974] ss:$8 sps:$4 sm:$0xff]   ;;  %v8696_v0 = vld [vmem:[#allocation4 + $0xa64] ss:$8 sps:$4 sm:$0xff]  }
 0x24f   :  { %4618 = vmatprep.subr.bf16.mxu0 %v8618_v31  ;;  %v8691_v31 = vld [vmem:[#allocation4 + $0x970] ss:$8 sps:$4 sm:$0xff]  }
 0x251   :  { %4185 = vmatpush1.bf16.msra.mxu1 %v8613_v36  ;;  %v8694_v36 = vld [vmem:[#allocation4 + $0xa60] ss:$8 sps:$4 sm:$0xff]  }
 0x252   :  { %4619 = vmatpush1.bf16.msra.mxu0 %v8616_v24  ;;  %4186 = vmatprep.subr.bf16.mxu1 %v8621_v37  ;;  %v8699_v24 = vld [vmem:[#allocation4 + $0x964] ss:$8 sps:$4 sm:$0xff]   ;;  %v8702_v37 = vld [vmem:[#allocation4 + $0xa54] ss:$8 sps:$4 sm:$0xff]  }
 0x253   :  { %4620 = vmatprep.subr.bf16.mxu0 %v8624_v30  ;;  %v8697_v30 = vld [vmem:[#allocation4 + $0x960] ss:$8 sps:$4 sm:$0xff]  }
 0x255   :  { %4187 = vmatpush1.bf16.msra.mxu1 %v8619_v42  ;;  %v8700_v42 = vld [vmem:[#allocation4 + $0xa50] ss:$8 sps:$4 sm:$0xff]  }
 0x256   :  { %4621 = vmatpush1.bf16.msra.mxu0 %v8622_v29  ;;  %4188 = vmatprep.subr.bf16.mxu1 %v8627_v25  ;;  %v8705_v29 = vld [vmem:[#allocation4 + $0x954] ss:$8 sps:$4 sm:$0xff]   ;;  %v8703_v25 = vld [vmem:[#allocation4 + $0x950] ss:$8 sps:$4 sm:$0xff]  }
 0x257   :  { %4622 = vmatprep.subr.bf16.mxu0 %v8630_v35  ;;  %v8711_v35 = vld [vmem:[#allocation4 + $0x944] ss:$8 sps:$4 sm:$0xff]  }
 0x259   :  { %4189 = vmatpush1.bf16.msra.mxu1 %v8625_v8  ;;  %v8714_v8 = vld [vmem:[#allocation4 + $0xa34] ss:$8 sps:$4 sm:$0xff]  }
 0x25a   :  { %4623 = vmatpush1.bf16.msra.mxu0 %v8628_v44  ;;  %4190 = vmatprep.subr.bf16.mxu1 %v8633_v52  ;;  %v8717_v44 = vld [vmem:[#allocation4 + $0x934] ss:$8 sps:$4 sm:$0xff]   ;;  %v8720_v52 = vld [vmem:[#allocation4 + $0xa24] ss:$8 sps:$4 sm:$0xff]  }
 0x25b   :  { %4624 = vmatprep.subr.bf16.mxu0 %v8636_v51  ;;  %v8715_v51 = vld [vmem:[#allocation4 + $0x930] ss:$8 sps:$4 sm:$0xff]  }
 0x25d   :  { %4191 = vmatpush1.bf16.msra.mxu1 %v8631_v40  ;;  %v8718_v40 = vld [vmem:[#allocation4 + $0xa20] ss:$8 sps:$4 sm:$0xff]  }
 0x25e   :  { %4625 = vmatpush1.bf16.msra.mxu0 %v8634_v58  ;;  %4192 = vmatprep.subr.bf16.mxu1 %v8639_v2  ;;  %v8723_v58 = vld [vmem:[#allocation4 + $0x924] ss:$8 sps:$4 sm:$0xff]   ;;  %v8726_v2 = vld [vmem:[#allocation4 + $0xa14] ss:$8 sps:$4 sm:$0xff]  }
 0x25f   :  { %4626 = vmatprep.subr.bf16.mxu0 %v8642_v41  ;;  %v8721_v41 = vld [vmem:[#allocation4 + $0x920] ss:$8 sps:$4 sm:$0xff]  }
 0x261   :  { %4193 = vmatpush1.bf16.msra.mxu1 %v8637_v46  ;;  %v8724_v46 = vld [vmem:[#allocation4 + $0xa10] ss:$8 sps:$4 sm:$0xff]  }
 0x262   :  { %4627 = vmatpush2.bf16.msra.mxu0 %v8640_v55  ;;  %4194 = vmatprep.subr.bf16.mxu1 %v8645_v27  ;;  %v8729_v55 = vld [vmem:[#allocation4 + $0x914] ss:$8 sps:$4 sm:$0xff]   ;;  %v8732_v27 = vld [vmem:[#allocation4 + $0xa04] ss:$8 sps:$4 sm:$0xff]  }
 0x263   :  { %4628 = vmatprep.subr.bf16.mxu0 %v8648_v47  ;;  %v8727_v47 = vld [vmem:[#allocation4 + $0x910] ss:$8 sps:$4 sm:$0xff]  }
 0x265   :  { %4195 = vmatpush2.bf16.msra.mxu1 %v8643_v48  ;;  %v8730_v48 = vld [vmem:[#allocation4 + $0xa00] ss:$8 sps:$4 sm:$0xff]  }
 0x266   :  { %4629 = vmatpush2.bf16.msra.mxu0 %v8646_v21  ;;  %4196 = vmatprep.subr.bf16.mxu1 %v8651_v12  ;;  %v8735_v21 = vld [vmem:[#allocation4 + $0x904] ss:$8 sps:$4 sm:$0xff]   ;;  %v8738_v12 = vld [vmem:[#allocation4 + $0xaf4] ss:$8 sps:$4 sm:$0xff]  }
 0x267   :  { %4630 = vmatprep.subr.bf16.mxu0 %v8654_v22  ;;  %v8733_v22 = vld [vmem:[#allocation4 + $0x900] ss:$8 sps:$4 sm:$0xff]  }
 0x269   :  { %4197 = vmatpush2.bf16.msra.mxu1 %v8649_v53  ;;  %v8736_v53 = vld [vmem:[#allocation4 + $0xaf0] ss:$8 sps:$4 sm:$0xff]  }
 0x26a   :  { %4631 = vmatpush2.bf16.msra.mxu0 %v8652_v23  ;;  %4198 = vmatprep.subr.bf16.mxu1 %v8657_v45  ;;  %v8741_v23 = vld [vmem:[#allocation4 + $0x9f4] ss:$8 sps:$4 sm:$0xff]   ;;  %v8744_v45 = vld [vmem:[#allocation4 + $0xae4] ss:$8 sps:$4 sm:$0xff]  }
 0x26b   :  { %4632 = vmatprep.subr.bf16.mxu0 %v8660_v59  ;;  %v8739_v59 = vld [vmem:[#allocation4 + $0x9f0] ss:$8 sps:$4 sm:$0xff]  }
 0x26d   :  { %4199 = vmatpush2.bf16.msra.mxu1 %v8655_v60  ;;  %v8742_v60 = vld [vmem:[#allocation4 + $0xae0] ss:$8 sps:$4 sm:$0xff]  }
 0x26e   :  { %4633 = vmatpush2.bf16.msra.mxu0 %v8658_v20  ;;  %4200 = vmatprep.subr.bf16.mxu1 %v8663_v50  ;;  %v8747_v20 = vld [vmem:[#allocation4 + $0x9e4] ss:$8 sps:$4 sm:$0xff]   ;;  %v8750_v50 = vld [vmem:[#allocation4 + $0xad4] ss:$8 sps:$4 sm:$0xff]  }
 0x26f   :  { %4634 = vmatprep.subr.bf16.mxu0 %v8666_v56  ;;  %v8745_v56 = vld [vmem:[#allocation4 + $0x9e0] ss:$8 sps:$4 sm:$0xff]  }
 0x271   :  { %4201 = vmatpush2.bf16.msra.mxu1 %v8661_v62  ;;  %v8748_v62 = vld [vmem:[#allocation4 + $0xad0] ss:$8 sps:$4 sm:$0xff]  }
 0x272   :  { %4635 = vmatpush2.bf16.msra.mxu0 %v8664_v61  ;;  %4202 = vmatprep.subr.bf16.mxu1 %v8669_v63  ;;  %v8753_v61 = vld [vmem:[#allocation4 + $0x9d4] ss:$8 sps:$4 sm:$0xff]   ;;  %v8756_v63 = vld [vmem:[#allocation4 + $0xac4] ss:$8 sps:$4 sm:$0xff]  }
 0x273   :  { %4636 = vmatprep.subr.bf16.mxu0 %v8672_v6  ;;  %v8751_v6 = vld [vmem:[#allocation4 + $0x9d0] ss:$8 sps:$4 sm:$0xff]  }
 0x275   :  { %4203 = vmatpush2.bf16.msra.mxu1 %v8667_v7  ;;  %v8754_v7 = vld [vmem:[#allocation4 + $0xac0] ss:$8 sps:$4 sm:$0xff]  }
 0x276   :  { %4637 = vmatpush2.bf16.msra.mxu0 %v8670_v57  ;;  %4204 = vmatprep.subr.bf16.mxu1 %v8675_v16  ;;  %v8759_v57 = vld [vmem:[#allocation4 + $0x9c4] ss:$8 sps:$4 sm:$0xff]   ;;  %v8762_v16 = vld [vmem:[#allocation4 + $0xab4] ss:$8 sps:$4 sm:$0xff]  }
 0x277   :  { %4638 = vmatprep.subr.bf16.mxu0 %v8678_v17  ;;  %v8757_v17 = vld [vmem:[#allocation4 + $0x9c0] ss:$8 sps:$4 sm:$0xff]  }
 0x279   :  { %4205 = vmatpush2.bf16.msra.mxu1 %v8673_v10  ;;  %v8760_v10 = vld [vmem:[#allocation4 + $0xab0] ss:$8 sps:$4 sm:$0xff]  }
 0x27a   :  { %4639 = vmatpush2.bf16.msra.mxu0 %v8676_v9  ;;  %4206 = vmatprep.subr.bf16.mxu1 %v8681_v38  ;;  %v8765_v9 = vld [vmem:[#allocation4 + $0x9b4] ss:$8 sps:$4 sm:$0xff]   ;;  %v8768_v38 = vld [vmem:[#allocation4 + $0xaa4] ss:$8 sps:$4 sm:$0xff]  }
 0x27b   :  { %4640 = vmatprep.subr.bf16.mxu0 %v8684_v13  ;;  %v8763_v13 = vld [vmem:[#allocation4 + $0x9b0] ss:$8 sps:$4 sm:$0xff]  }
 0x27d   :  { %4207 = vmatpush2.bf16.msra.mxu1 %v8679_v3  ;;  %v8766_v3 = vld [vmem:[#allocation4 + $0xaa0] ss:$8 sps:$4 sm:$0xff]  }
 0x27e   :  { %4641 = vmatpush2.bf16.msra.mxu0 %v8682_v15  ;;  %4208 = vmatprep.subr.bf16.mxu1 %v8687_v18  ;;  %v8771_v15 = vld [vmem:[#allocation4 + $0x9a4] ss:$8 sps:$4 sm:$0xff]   ;;  %v8774_v18 = vld [vmem:[#allocation4 + $0xa94] ss:$8 sps:$4 sm:$0xff]  }
 0x27f   :  { %5085 = vmatprep.subr.bf16.mxu0 %v8690_v28  ;;  %v8769_v28 = vld [vmem:[#allocation4 + $0x9a0] ss:$8 sps:$4 sm:$0xff]  }
 0x281   :  { %4209 = vmatpush2.bf16.msra.mxu1 %v8685_v19  ;;  %4643 = vmatmul.mubr.bf16.vlgmr.msra.gmra.mxu0 %v10469_v39  ;;  %v8708_v39 = vld [vmem:[#allocation4 + $0xa44] ss:$8 sps:$4 sm:$0xff]   ;;  %v8772_v19 = vld [vmem:[#allocation4 + $0xa90] ss:$8 sps:$4 sm:$0xff]  }
 0x282   :  { %5086 = vmatpush1.bf16.msra.mxu0 %v8688_v54  ;;  %5117 = vmatprep.mubr.bf16.mxu0 %v10495_v4  ;;  %v8706_v4 = vld [vmem:[#allocation4 + $0xa40] ss:$8 sps:$4 sm:$0xff]   ;;  %v8777_v54 = vld [vmem:[#allocation4 + $0x994] ss:$8 sps:$4 sm:$0xff]  }
 0x283   :  { %4653 = vmatprep.subr.bf16.mxu1 %v8693_v11  ;;  %5087 = vmatprep.subr.bf16.mxu0 %v8696_v0  ;;  %v8780_v11 = vld [vmem:[#allocation4 + $0xa84] ss:$8 sps:$4 sm:$0xff]   ;;  %v8775_v0 = vld [vmem:[#allocation4 + $0x990] ss:$8 sps:$4 sm:$0xff]  }
 0x284   :  { %4211 = vmatmul.mubr.bf16.vlgmr.msra.gmra.mxu1 %v10561_v49  ;;  %v8709_v49 = vld [vmem:[#allocation4 + $0x940] ss:$8 sps:$4 sm:$0xff]  }
 0x285   :  { %4654 = vmatpush1.bf16.msra.mxu1 %v8691_v31  ;;  %4685 = vmatprep.mubr.bf16.mxu1 %v10572_v26  ;;  %v8712_v26 = vld [vmem:[#allocation4 + $0xa30] ss:$8 sps:$4 sm:$0xff]   ;;  %v8778_v31 = vld [vmem:[#allocation4 + $0xa80] ss:$8 sps:$4 sm:$0xff]  }
 0x286   :  { %5088 = vmatpush1.bf16.msra.mxu0 %v8694_v36  ;;  %4655 = vmatprep.subr.bf16.mxu1 %v8699_v24  ;;  %v8783_v36 = vld [vmem:[#allocation4 + $0x984] ss:$8 sps:$4 sm:$0xff]   ;;  %v8786_v24 = vld [vmem:[#allocation4 + $0xc74] ss:$8 sps:$4 sm:$0xff]  }
 0x287   :  { %5089 = vmatprep.subr.bf16.mxu0 %v8702_v37  ;;  %v8781_v37 = vld [vmem:[#allocation4 + $0x980] ss:$8 sps:$4 sm:$0xff]  }
 0x289   :  { %4656 = vmatpush1.bf16.msra.mxu1 %v8697_v30  ;;  %v8784_v30 = vld [vmem:[#allocation4 + $0xc70] ss:$8 sps:$4 sm:$0xff]  }
 0x28a   :  { %5090 = vmatpush1.bf16.msra.mxu0 %v8700_v42  ;;  %4657 = vmatprep.subr.bf16.mxu1 %v8705_v29  ;;  %v8789_v42 = vld [vmem:[#allocation4 + $0xb74] ss:$8 sps:$4 sm:$0xff]   ;;  %v8792_v29 = vld [vmem:[#allocation4 + $0xc64] ss:$8 sps:$4 sm:$0xff]  }
 0x28b   :  { %5091 = vmatprep.subr.bf16.mxu0 %v8708_v39  ;;  %v10984_v39 = vld [vmem:[#allocation15_spill] sm:$0xff] }
 0x28d   :  { %4658 = vmatpush1.bf16.msra.mxu1 %v8703_v25  ;;  %v8787_v25 = vld [vmem:[#allocation4 + $0xb70] ss:$8 sps:$4 sm:$0xff]  }
 0x28e   :  { %5092 = vmatpush1.bf16.msra.mxu0 %v8706_v4  ;;  %4659 = vmatprep.subr.bf16.mxu1 %v8711_v35  ;;  %v10985_v4 = vld [vmem:[#allocation17_spill] sm:$0xff]  ;;  %v8790_v35 = vld [vmem:[#allocation4 + $0xc60] ss:$8 sps:$4 sm:$0xff]  }
 0x28f   :  { %5093 = vmatprep.subr.bf16.mxu0 %v8714_v8  ;;  %v8795_v8 = vld [vmem:[#allocation4 + $0xb64] ss:$8 sps:$4 sm:$0xff]  }
 0x291   :  { %4660 = vmatpush1.bf16.msra.mxu1 %v8709_v49  ;;  %v8798_v49 = vld [vmem:[#allocation4 + $0xc54] ss:$8 sps:$4 sm:$0xff]  }
 0x292   :  { %5094 = vmatpush1.bf16.msra.mxu0 %v8712_v26  ;;  %4661 = vmatprep.subr.bf16.mxu1 %v8717_v44  ;;  %v8793_v26 = vld [vmem:[#allocation4 + $0xb60] ss:$8 sps:$4 sm:$0xff]   ;;  %v8796_v44 = vld [vmem:[#allocation4 + $0xc50] ss:$8 sps:$4 sm:$0xff]  }
 0x293   :  { %5095 = vmatprep.subr.bf16.mxu0 %v8720_v52  ;;  %v8801_v52 = vld [vmem:[#allocation4 + $0xb54] ss:$8 sps:$4 sm:$0xff]  }
 0x295   :  { %4662 = vmatpush1.bf16.msra.mxu1 %v8715_v51  ;;  %v8804_v51 = vld [vmem:[#allocation4 + $0xc44] ss:$8 sps:$4 sm:$0xff]  }
 0x296   :  { %5096 = vmatpush1.bf16.msra.mxu0 %v8718_v40  ;;  %4663 = vmatprep.subr.bf16.mxu1 %v8723_v58  ;;  %v8799_v40 = vld [vmem:[#allocation4 + $0xb50] ss:$8 sps:$4 sm:$0xff]   ;;  %v8802_v58 = vld [vmem:[#allocation4 + $0xc40] ss:$8 sps:$4 sm:$0xff]  }
 0x297   :  { %5097 = vmatprep.subr.bf16.mxu0 %v8726_v2  ;;  %v8807_v2 = vld [vmem:[#allocation4 + $0xb44] ss:$8 sps:$4 sm:$0xff]  }
 0x299   :  { %4664 = vmatpush1.bf16.msra.mxu1 %v8721_v41  ;;  %v8810_v41 = vld [vmem:[#allocation4 + $0xc34] ss:$8 sps:$4 sm:$0xff]  }
 0x29a   :  { %5098 = vmatpush1.bf16.msra.mxu0 %v8724_v46  ;;  %4665 = vmatprep.subr.bf16.mxu1 %v8729_v55  ;;  %v8813_v46 = vld [vmem:[#allocation4 + $0xb34] ss:$8 sps:$4 sm:$0xff]   ;;  %v8816_v55 = vld [vmem:[#allocation4 + $0xc24] ss:$8 sps:$4 sm:$0xff]  }
 0x29b   :  { %5099 = vmatprep.subr.bf16.mxu0 %v8732_v27  ;;  %v8811_v27 = vld [vmem:[#allocation4 + $0xb30] ss:$8 sps:$4 sm:$0xff]  }
 0x29d   :  { %4666 = vmatpush1.bf16.msra.mxu1 %v8727_v47  ;;  %v8814_v47 = vld [vmem:[#allocation4 + $0xc20] ss:$8 sps:$4 sm:$0xff]  }
 0x29e   :  { %5100 = vmatpush1.bf16.msra.mxu0 %v8730_v48  ;;  %4667 = vmatprep.subr.bf16.mxu1 %v8735_v21  ;;  %v8819_v48 = vld [vmem:[#allocation4 + $0xb24] ss:$8 sps:$4 sm:$0xff]   ;;  %v8822_v21 = vld [vmem:[#allocation4 + $0xc14] ss:$8 sps:$4 sm:$0xff]  }
 0x29f   :  { %5101 = vmatprep.subr.bf16.mxu0 %v8738_v12  ;;  %v8817_v12 = vld [vmem:[#allocation4 + $0xb20] ss:$8 sps:$4 sm:$0xff]  }
 0x2a1   :  { %4668 = vmatpush1.bf16.msra.mxu1 %v8733_v22  ;;  %v8820_v22 = vld [vmem:[#allocation4 + $0xc10] ss:$8 sps:$4 sm:$0xff]  }
 0x2a2   :  { %5102 = vmatpush2.bf16.msra.mxu0 %v8736_v53  ;;  %4669 = vmatprep.subr.bf16.mxu1 %v8741_v23  ;;  %v8825_v53 = vld [vmem:[#allocation4 + $0xb14] ss:$8 sps:$4 sm:$0xff]   ;;  %v8828_v23 = vld [vmem:[#allocation4 + $0xc04] ss:$8 sps:$4 sm:$0xff]  }
 0x2a3   :  { %5103 = vmatprep.subr.bf16.mxu0 %v8744_v45  ;;  %v8823_v45 = vld [vmem:[#allocation4 + $0xb10] ss:$8 sps:$4 sm:$0xff]  }
 0x2a5   :  { %4670 = vmatpush2.bf16.msra.mxu1 %v8739_v59  ;;  %v8826_v59 = vld [vmem:[#allocation4 + $0xc00] ss:$8 sps:$4 sm:$0xff]  }
 0x2a6   :  { %5104 = vmatpush2.bf16.msra.mxu0 %v8742_v60  ;;  %4671 = vmatprep.subr.bf16.mxu1 %v8747_v20  ;;  %v8831_v60 = vld [vmem:[#allocation4 + $0xb04] ss:$8 sps:$4 sm:$0xff]   ;;  %v8834_v20 = vld [vmem:[#allocation4 + $0xcf4] ss:$8 sps:$4 sm:$0xff]  }
 0x2a7   :  { %5105 = vmatprep.subr.bf16.mxu0 %v8750_v50  ;;  %v8829_v50 = vld [vmem:[#allocation4 + $0xb00] ss:$8 sps:$4 sm:$0xff]  }
 0x2a9   :  { %4672 = vmatpush2.bf16.msra.mxu1 %v8745_v56  ;;  %v8832_v56 = vld [vmem:[#allocation4 + $0xcf0] ss:$8 sps:$4 sm:$0xff]  }
 0x2aa   :  { %5106 = vmatpush2.bf16.msra.mxu0 %v8748_v62  ;;  %4673 = vmatprep.subr.bf16.mxu1 %v8753_v61  ;;  %v8837_v62 = vld [vmem:[#allocation4 + $0xbf4] ss:$8 sps:$4 sm:$0xff]   ;;  %v8840_v61 = vld [vmem:[#allocation4 + $0xce4] ss:$8 sps:$4 sm:$0xff]  }
 0x2ab   :  { %5107 = vmatprep.subr.bf16.mxu0 %v8756_v63  ;;  %v8835_v63 = vld [vmem:[#allocation4 + $0xbf0] ss:$8 sps:$4 sm:$0xff]  }
 0x2ad   :  { %4674 = vmatpush2.bf16.msra.mxu1 %v8751_v6  ;;  %v8838_v6 = vld [vmem:[#allocation4 + $0xce0] ss:$8 sps:$4 sm:$0xff]  }
 0x2ae   :  { %5108 = vmatpush2.bf16.msra.mxu0 %v8754_v7  ;;  %4675 = vmatprep.subr.bf16.mxu1 %v8759_v57  ;;  %v8843_v7 = vld [vmem:[#allocation4 + $0xbe4] ss:$8 sps:$4 sm:$0xff]   ;;  %v8846_v57 = vld [vmem:[#allocation4 + $0xcd4] ss:$8 sps:$4 sm:$0xff]  }
 0x2af   :  { %5109 = vmatprep.subr.bf16.mxu0 %v8762_v16  ;;  %v8841_v16 = vld [vmem:[#allocation4 + $0xbe0] ss:$8 sps:$4 sm:$0xff]  }
 0x2b1   :  { %4676 = vmatpush2.bf16.msra.mxu1 %v8757_v17  ;;  %v8844_v17 = vld [vmem:[#allocation4 + $0xcd0] ss:$8 sps:$4 sm:$0xff]  }
 0x2b2   :  { %5110 = vmatpush2.bf16.msra.mxu0 %v8760_v10  ;;  %4677 = vmatprep.subr.bf16.mxu1 %v8765_v9  ;;  %v8849_v10 = vld [vmem:[#allocation4 + $0xbd4] ss:$8 sps:$4 sm:$0xff]   ;;  %v8852_v9 = vld [vmem:[#allocation4 + $0xcc4] ss:$8 sps:$4 sm:$0xff]  }
 0x2b3   :  { %5111 = vmatprep.subr.bf16.mxu0 %v8768_v38  ;;  %v8847_v38 = vld [vmem:[#allocation4 + $0xbd0] ss:$8 sps:$4 sm:$0xff]  }
 0x2b5   :  { %4678 = vmatpush2.bf16.msra.mxu1 %v8763_v13  ;;  %v8850_v13 = vld [vmem:[#allocation4 + $0xcc0] ss:$8 sps:$4 sm:$0xff]  }
 0x2b6   :  { %5112 = vmatpush2.bf16.msra.mxu0 %v8766_v3  ;;  %4679 = vmatprep.subr.bf16.mxu1 %v8771_v15  ;;  %v8855_v3 = vld [vmem:[#allocation4 + $0xbc4] ss:$8 sps:$4 sm:$0xff]   ;;  %v8858_v15 = vld [vmem:[#allocation4 + $0xcb4] ss:$8 sps:$4 sm:$0xff]  }
 0x2b7   :  { %5113 = vmatprep.subr.bf16.mxu0 %v8774_v18  ;;  %v8853_v18 = vld [vmem:[#allocation4 + $0xbc0] ss:$8 sps:$4 sm:$0xff]  }
 0x2b9   :  { %4680 = vmatpush2.bf16.msra.mxu1 %v8769_v28  ;;  %v8856_v28 = vld [vmem:[#allocation4 + $0xcb0] ss:$8 sps:$4 sm:$0xff]  }
 0x2ba   :  { %5114 = vmatpush2.bf16.msra.mxu0 %v8772_v19  ;;  %4681 = vmatprep.subr.bf16.mxu1 %v8777_v54  ;;  %v8861_v19 = vld [vmem:[#allocation4 + $0xbb4] ss:$8 sps:$4 sm:$0xff]   ;;  %v8864_v54 = vld [vmem:[#allocation4 + $0xca4] ss:$8 sps:$4 sm:$0xff]  }
 0x2bb   :  { %5115 = vmatprep.subr.bf16.mxu0 %v8780_v11  ;;  %v8859_v11 = vld [vmem:[#allocation4 + $0xbb0] ss:$8 sps:$4 sm:$0xff]  }
 0x2bd   :  { %4682 = vmatpush2.bf16.msra.mxu1 %v8775_v0  ;;  %v8862_v0 = vld [vmem:[#allocation4 + $0xca0] ss:$8 sps:$4 sm:$0xff]  }
 0x2be   :  { %5116 = vmatpush2.bf16.msra.mxu0 %v8778_v31  ;;  %4683 = vmatprep.subr.bf16.mxu1 %v8783_v36  ;;  %v8867_v31 = vld [vmem:[#allocation4 + $0xba4] ss:$8 sps:$4 sm:$0xff]   ;;  %v8870_v36 = vld [vmem:[#allocation4 + $0xc94] ss:$8 sps:$4 sm:$0xff]  }
 0x2bf   :  { %5560 = vmatprep.subr.bf16.mxu0 %v8786_v24  ;;  %v8865_v24 = vld [vmem:[#allocation4 + $0xba0] ss:$8 sps:$4 sm:$0xff]  }
 0x2c1   :  { %4684 = vmatpush2.bf16.msra.mxu1 %v8781_v37  ;;  %5118 = vmatmul.mubr.bf16.vlgmr.msra.gmra.mxu0 %v10984_v39  ;;  %v8868_v37 = vld [vmem:[#allocation4 + $0xc90] ss:$8 sps:$4 sm:$0xff]   ;;  %v8874_v39 = vld [vmem:[#allocation4 + $0xc80] ss:$8 sps:$4 sm:$0xff]  }
 0x2c2   :  { %5561 = vmatpush1.bf16.msra.mxu0 %v8784_v30  ;;  %5592 = vmatprep.mubr.bf16.mxu0 %v10985_v4  ;;  %v8873_v30 = vld [vmem:[#allocation4 + $0xb94] ss:$8 sps:$4 sm:$0xff]  }
 0x2c3   :  { %5128 = vmatprep.subr.bf16.mxu1 %v8789_v42  ;;  %5562 = vmatprep.subr.bf16.mxu0 %v8792_v29  ;;  %v8876_v42 = vld [vmem:[#allocation4 + $0xc84] ss:$8 sps:$4 sm:$0xff]   ;;  %v8871_v29 = vld [vmem:[#allocation4 + $0xb90] ss:$8 sps:$4 sm:$0xff]   ;;  %v8882_v4 = vld [vmem:[#allocation4 + $0xe74] ss:$8 sps:$4 sm:$0xff]  }
 0x2c4   :  { %4686 = vmatmul.mubr.bf16.vlgmr.msra.gmra.mxu1 %v10569_v1  ;;  %v8805_v1 = vld [vmem:[#allocation4 + $0xb40] ss:$8 sps:$4 sm:$0xff]  }
 0x2c5   :  { %5129 = vmatpush1.bf16.msra.mxu1 %v8787_v25  ;;  %5160 = vmatprep.mubr.bf16.mxu1 %v10580_v14  ;;  %v8808_v14 = vld [vmem:[#allocation4 + $0xc30] ss:$8 sps:$4 sm:$0xff]   ;;  %v8879_v25 = vld [vmem:[#allocation4 + $0xb84] ss:$8 sps:$4 sm:$0xff]  }
 0x2c6   :  { %5563 = vmatpush1.bf16.msra.mxu0 %v8790_v35  ;;  %5130 = vmatprep.subr.bf16.mxu1 %v8795_v8  ;;  %v8877_v35 = vld [vmem:[#allocation4 + $0xb80] ss:$8 sps:$4 sm:$0xff]   ;;  %v8880_v8 = vld [vmem:[#allocation4 + $0xe70] ss:$8 sps:$4 sm:$0xff]  }
 0x2c7   :  { %5564 = vmatprep.subr.bf16.mxu0 %v8798_v49  ;;  %v8885_v49 = vld [vmem:[#allocation4 + $0xd74] ss:$8 sps:$4 sm:$0xff]  }
 0x2c9   :  { %5131 = vmatpush1.bf16.msra.mxu1 %v8793_v26  ;;  %v8888_v26 = vld [vmem:[#allocation4 + $0xe64] ss:$8 sps:$4 sm:$0xff]  }
 0x2ca   :  { %5565 = vmatpush1.bf16.msra.mxu0 %v8796_v44  ;;  %5132 = vmatprep.subr.bf16.mxu1 %v8801_v52  ;;  %v10986_v44 = vld [vmem:[#allocation16_spill] sm:$0xff]  ;;  %v8883_v52 = vld [vmem:[#allocation4 + $0xd70] ss:$8 sps:$4 sm:$0xff]  }
 0x2cb   :  { %5566 = vmatprep.subr.bf16.mxu0 %v8804_v51  ;;  %v10987_v51 = vld [vmem:[#allocation19_spill] sm:$0xff] }
 0x2cd   :  { %5133 = vmatpush1.bf16.msra.mxu1 %v8799_v40  ;;  %v8886_v40 = vld [vmem:[#allocation4 + $0xe60] ss:$8 sps:$4 sm:$0xff]  }
 0x2ce   :  { %5567 = vmatpush1.bf16.msra.mxu0 %v8802_v58  ;;  %5134 = vmatprep.subr.bf16.mxu1 %v8807_v2  ;;  %v8891_v58 = vld [vmem:[#allocation4 + $0xd64] ss:$8 sps:$4 sm:$0xff]   ;;  %v8894_v2 = vld [vmem:[#allocation4 + $0xe54] ss:$8 sps:$4 sm:$0xff]  }
 0x2cf   :  { %5568 = vmatprep.subr.bf16.mxu0 %v8810_v41  ;;  %v8889_v41 = vld [vmem:[#allocation4 + $0xd60] ss:$8 sps:$4 sm:$0xff]  }
 0x2d1   :  { %5135 = vmatpush1.bf16.msra.mxu1 %v8805_v1  ;;  %v8892_v1 = vld [vmem:[#allocation4 + $0xe50] ss:$8 sps:$4 sm:$0xff]  }
 0x2d2   :  { %5569 = vmatpush1.bf16.msra.mxu0 %v8808_v14  ;;  %5136 = vmatprep.subr.bf16.mxu1 %v8813_v46  ;;  %v8897_v14 = vld [vmem:[#allocation4 + $0xd54] ss:$8 sps:$4 sm:$0xff]   ;;  %v8900_v46 = vld [vmem:[#allocation4 + $0xe44] ss:$8 sps:$4 sm:$0xff]  }
 0x2d3   :  { %5570 = vmatprep.subr.bf16.mxu0 %v8816_v55  ;;  %v8895_v55 = vld [vmem:[#allocation4 + $0xd50] ss:$8 sps:$4 sm:$0xff]  }
 0x2d5   :  { %5137 = vmatpush1.bf16.msra.mxu1 %v8811_v27  ;;  %v8898_v27 = vld [vmem:[#allocation4 + $0xe40] ss:$8 sps:$4 sm:$0xff]  }
 0x2d6   :  { %5571 = vmatpush1.bf16.msra.mxu0 %v8814_v47  ;;  %5138 = vmatprep.subr.bf16.mxu1 %v8819_v48  ;;  %v8903_v47 = vld [vmem:[#allocation4 + $0xd44] ss:$8 sps:$4 sm:$0xff]   ;;  %v8906_v48 = vld [vmem:[#allocation4 + $0xe34] ss:$8 sps:$4 sm:$0xff]  }
 0x2d7   :  { %5572 = vmatprep.subr.bf16.mxu0 %v8822_v21  ;;  %v8909_v21 = vld [vmem:[#allocation4 + $0xd34] ss:$8 sps:$4 sm:$0xff]  }
 0x2d9   :  { %5139 = vmatpush1.bf16.msra.mxu1 %v8817_v12  ;;  %v8912_v12 = vld [vmem:[#allocation4 + $0xe24] ss:$8 sps:$4 sm:$0xff]  }
 0x2da   :  { %5573 = vmatpush1.bf16.msra.mxu0 %v8820_v22  ;;  %5140 = vmatprep.subr.bf16.mxu1 %v8825_v53  ;;  %v8907_v22 = vld [vmem:[#allocation4 + $0xd30] ss:$8 sps:$4 sm:$0xff]   ;;  %v8910_v53 = vld [vmem:[#allocation4 + $0xe20] ss:$8 sps:$4 sm:$0xff]  }
 0x2db   :  { %5574 = vmatprep.subr.bf16.mxu0 %v8828_v23  ;;  %v8915_v23 = vld [vmem:[#allocation4 + $0xd24] ss:$8 sps:$4 sm:$0xff]  }
 0x2dd   :  { %5141 = vmatpush1.bf16.msra.mxu1 %v8823_v45  ;;  %v8918_v45 = vld [vmem:[#allocation4 + $0xe14] ss:$8 sps:$4 sm:$0xff]  }
 0x2de   :  { %5575 = vmatpush1.bf16.msra.mxu0 %v8826_v59  ;;  %5142 = vmatprep.subr.bf16.mxu1 %v8831_v60  ;;  %v8913_v59 = vld [vmem:[#allocation4 + $0xd20] ss:$8 sps:$4 sm:$0xff]   ;;  %v8916_v60 = vld [vmem:[#allocation4 + $0xe10] ss:$8 sps:$4 sm:$0xff]  }
 0x2df   :  { %5576 = vmatprep.subr.bf16.mxu0 %v8834_v20  ;;  %v8921_v20 = vld [vmem:[#allocation4 + $0xd14] ss:$8 sps:$4 sm:$0xff]  }
 0x2e1   :  { %5143 = vmatpush1.bf16.msra.mxu1 %v8829_v50  ;;  %v8924_v50 = vld [vmem:[#allocation4 + $0xe04] ss:$8 sps:$4 sm:$0xff]  }
 0x2e2   :  { %5577 = vmatpush2.bf16.msra.mxu0 %v8832_v56  ;;  %5144 = vmatprep.subr.bf16.mxu1 %v8837_v62  ;;  %v8919_v56 = vld [vmem:[#allocation4 + $0xd10] ss:$8 sps:$4 sm:$0xff]   ;;  %v8922_v62 = vld [vmem:[#allocation4 + $0xe00] ss:$8 sps:$4 sm:$0xff]  }
 0x2e3   :  { %5578 = vmatprep.subr.bf16.mxu0 %v8840_v61  ;;  %v8927_v61 = vld [vmem:[#allocation4 + $0xd04] ss:$8 sps:$4 sm:$0xff]  }
 0x2e5   :  { %5145 = vmatpush2.bf16.msra.mxu1 %v8835_v63  ;;  %v8930_v63 = vld [vmem:[#allocation4 + $0xef4] ss:$8 sps:$4 sm:$0xff]  }
 0x2e6   :  { %5579 = vmatpush2.bf16.msra.mxu0 %v8838_v6  ;;  %5146 = vmatprep.subr.bf16.mxu1 %v8843_v7  ;;  %v8925_v6 = vld [vmem:[#allocation4 + $0xd00] ss:$8 sps:$4 sm:$0xff]   ;;  %v8928_v7 = vld [vmem:[#allocation4 + $0xef0] ss:$8 sps:$4 sm:$0xff]  }
 0x2e7   :  { %5580 = vmatprep.subr.bf16.mxu0 %v8846_v57  ;;  %v8933_v57 = vld [vmem:[#allocation4 + $0xdf4] ss:$8 sps:$4 sm:$0xff]  }
 0x2e9   :  { %5147 = vmatpush2.bf16.msra.mxu1 %v8841_v16  ;;  %v8936_v16 = vld [vmem:[#allocation4 + $0xee4] ss:$8 sps:$4 sm:$0xff]  }
 0x2ea   :  { %5581 = vmatpush2.bf16.msra.mxu0 %v8844_v17  ;;  %5148 = vmatprep.subr.bf16.mxu1 %v8849_v10  ;;  %v8931_v17 = vld [vmem:[#allocation4 + $0xdf0] ss:$8 sps:$4 sm:$0xff]   ;;  %v8934_v10 = vld [vmem:[#allocation4 + $0xee0] ss:$8 sps:$4 sm:$0xff]  }
 0x2eb   :  { %5582 = vmatprep.subr.bf16.mxu0 %v8852_v9  ;;  %v8939_v9 = vld [vmem:[#allocation4 + $0xde4] ss:$8 sps:$4 sm:$0xff]  }
 0x2ed   :  { %5149 = vmatpush2.bf16.msra.mxu1 %v8847_v38  ;;  %v8942_v38 = vld [vmem:[#allocation4 + $0xed4] ss:$8 sps:$4 sm:$0xff]  }
 0x2ee   :  { %5583 = vmatpush2.bf16.msra.mxu0 %v8850_v13  ;;  %5150 = vmatprep.subr.bf16.mxu1 %v8855_v3  ;;  %v8937_v13 = vld [vmem:[#allocation4 + $0xde0] ss:$8 sps:$4 sm:$0xff]   ;;  %v8940_v3 = vld [vmem:[#allocation4 + $0xed0] ss:$8 sps:$4 sm:$0xff]  }
 0x2ef   :  { %5584 = vmatprep.subr.bf16.mxu0 %v8858_v15  ;;  %v8945_v15 = vld [vmem:[#allocation4 + $0xdd4] ss:$8 sps:$4 sm:$0xff]  }
 0x2f1   :  { %5151 = vmatpush2.bf16.msra.mxu1 %v8853_v18  ;;  %v8948_v18 = vld [vmem:[#allocation4 + $0xec4] ss:$8 sps:$4 sm:$0xff]  }
 0x2f2   :  { %5585 = vmatpush2.bf16.msra.mxu0 %v8856_v28  ;;  %5152 = vmatprep.subr.bf16.mxu1 %v8861_v19  ;;  %v8943_v28 = vld [vmem:[#allocation4 + $0xdd0] ss:$8 sps:$4 sm:$0xff]   ;;  %v8946_v19 = vld [vmem:[#allocation4 + $0xec0] ss:$8 sps:$4 sm:$0xff]  }
 0x2f3   :  { %5586 = vmatprep.subr.bf16.mxu0 %v8864_v54  ;;  %v8951_v54 = vld [vmem:[#allocation4 + $0xdc4] ss:$8 sps:$4 sm:$0xff]  }
 0x2f5   :  { %5153 = vmatpush2.bf16.msra.mxu1 %v8859_v11  ;;  %v8954_v11 = vld [vmem:[#allocation4 + $0xeb4] ss:$8 sps:$4 sm:$0xff]  }
 0x2f6   :  { %5587 = vmatpush2.bf16.msra.mxu0 %v8862_v0  ;;  %5154 = vmatprep.subr.bf16.mxu1 %v8867_v31  ;;  %v8949_v0 = vld [vmem:[#allocation4 + $0xdc0] ss:$8 sps:$4 sm:$0xff]   ;;  %v8952_v31 = vld [vmem:[#allocation4 + $0xeb0] ss:$8 sps:$4 sm:$0xff]  }
 0x2f7   :  { %5588 = vmatprep.subr.bf16.mxu0 %v8870_v36  ;;  %v8957_v36 = vld [vmem:[#allocation4 + $0xdb4] ss:$8 sps:$4 sm:$0xff]  }
 0x2f9   :  { %5155 = vmatpush2.bf16.msra.mxu1 %v8865_v24  ;;  %v8960_v24 = vld [vmem:[#allocation4 + $0xea4] ss:$8 sps:$4 sm:$0xff]  }
 0x2fa   :  { %5589 = vmatpush2.bf16.msra.mxu0 %v8868_v37  ;;  %5156 = vmatprep.subr.bf16.mxu1 %v8873_v30  ;;  %v8955_v37 = vld [vmem:[#allocation4 + $0xdb0] ss:$8 sps:$4 sm:$0xff]   ;;  %v8958_v30 = vld [vmem:[#allocation4 + $0xea0] ss:$8 sps:$4 sm:$0xff]  }
 0x2fb   :  { %5590 = vmatprep.subr.bf16.mxu0 %v8876_v42  ;;  %v8963_v42 = vld [vmem:[#allocation4 + $0xda4] ss:$8 sps:$4 sm:$0xff]  }
 0x2fd   :  { %5157 = vmatpush2.bf16.msra.mxu1 %v8871_v29  ;;  %v8966_v29 = vld [vmem:[#allocation4 + $0xe94] ss:$8 sps:$4 sm:$0xff]  }
 0x2fe   :  { %5591 = vmatpush2.bf16.msra.mxu0 %v8874_v39  ;;  %5158 = vmatprep.subr.bf16.mxu1 %v8879_v25  ;;  %v8961_v39 = vld [vmem:[#allocation4 + $0xda0] ss:$8 sps:$4 sm:$0xff]   ;;  %v8964_v25 = vld [vmem:[#allocation4 + $0xe90] ss:$8 sps:$4 sm:$0xff]  }
 0x2ff   :  { %6035 = vmatprep.subr.bf16.mxu0 %v8882_v4  ;;  %v8969_v4 = vld [vmem:[#allocation4 + $0xd94] ss:$8 sps:$4 sm:$0xff]  }
 0x301   :  { %5159 = vmatpush2.bf16.msra.mxu1 %v8877_v35  ;;  %5593 = vmatmul.mubr.bf16.vlgmr.msra.gmra.mxu0 %v10986_v44  ;;  %v8972_v35 = vld [vmem:[#allocation4 + $0xe84] ss:$8 sps:$4 sm:$0xff]   ;;  %v8973_v44 = vld [vmem:[#allocation4 + $0xd80] ss:$8 sps:$4 sm:$0xff]  }
 0x302   :  { %6036 = vmatpush1.bf16.msra.mxu0 %v8880_v8  ;;  %6067 = vmatprep.mubr.bf16.mxu0 %v10987_v51  ;;  %v8967_v8 = vld [vmem:[#allocation4 + $0xd90] ss:$8 sps:$4 sm:$0xff]  }
 0x303   :  { %5603 = vmatprep.subr.bf16.mxu1 %v8885_v49  ;;  %6037 = vmatprep.subr.bf16.mxu0 %v8888_v26  ;;  %v8970_v49 = vld [vmem:[#allocation4 + $0xe80] ss:$8 sps:$4 sm:$0xff]   ;;  %v8975_v26 = vld [vmem:[#allocation4 + $0xd84] ss:$8 sps:$4 sm:$0xff]   ;;  %v10988_v51 = vld [vmem:[#allocation18_spill] sm:$0xff] }
 0x304   :  { %5161 = vmatmul.mubr.bf16.vlgmr.msra.gmra.mxu1 %v10577_v32  ;;  %v8901_v32 = vld [vmem:[#allocation4 + $0xd40] ss:$8 sps:$4 sm:$0xff]  }
 0x305   :  { %5604 = vmatpush1.bf16.msra.mxu1 %v8883_v52  ;;  %5635 = vmatprep.mubr.bf16.mxu1 %v10588_v34  ;;  %v8904_v34 = vld [vmem:[#allocation4 + $0xe30] ss:$8 sps:$4 sm:$0xff]   ;;  %v8978_v52 = vld [vmem:[#allocation4 + $0xf74] ss:$8 sps:$4 sm:$0xff]  }
 0x306   :  { %6038 = vmatpush1.bf16.msra.mxu0 %v8886_v40  ;;  %5605 = vmatprep.subr.bf16.mxu1 %v8891_v58  ;;  %v8976_v40 = vld [vmem:[#allocation4 + $0xf70] ss:$8 sps:$4 sm:$0xff]   ;;  %v8981_v58 = vld [vmem:[#allocation4 + $0xf64] ss:$8 sps:$4 sm:$0xff]  }
 0x307   :  { %6039 = vmatprep.subr.bf16.mxu0 %v8894_v2  ;;  %v8979_v2 = vld [vmem:[#allocation4 + $0xf60] ss:$8 sps:$4 sm:$0xff]  }
 0x309   :  { %5606 = vmatpush1.bf16.msra.mxu1 %v8889_v41  ;;  %v8984_v41 = vld [vmem:[#allocation4 + $0xf54] ss:$8 sps:$4 sm:$0xff]  }
 0x30a   :  { %6040 = vmatpush1.bf16.msra.mxu0 %v8892_v1  ;;  %5607 = vmatprep.subr.bf16.mxu1 %v8897_v14  ;;  %v8982_v1 = vld [vmem:[#allocation4 + $0xf50] ss:$8 sps:$4 sm:$0xff]   ;;  %v8987_v14 = vld [vmem:[#allocation4 + $0xf44] ss:$8 sps:$4 sm:$0xff]  }
 0x30b   :  { %6041 = vmatprep.subr.bf16.mxu0 %v8900_v46  ;;  %v8985_v46 = vld [vmem:[#allocation4 + $0xf40] ss:$8 sps:$4 sm:$0xff]  }
 0x30d   :  { %5608 = vmatpush1.bf16.msra.mxu1 %v8895_v55  ;;  %v8990_v55 = vld [vmem:[#allocation4 + $0xf34] ss:$8 sps:$4 sm:$0xff]  }
 0x30e   :  { %6042 = vmatpush1.bf16.msra.mxu0 %v8898_v27  ;;  %5609 = vmatprep.subr.bf16.mxu1 %v8903_v47  ;;  %v8988_v27 = vld [vmem:[#allocation4 + $0xf30] ss:$8 sps:$4 sm:$0xff]   ;;  %v8993_v47 = vld [vmem:[#allocation4 + $0xf24] ss:$8 sps:$4 sm:$0xff]  }
 0x30f   :  { %6043 = vmatprep.subr.bf16.mxu0 %v8906_v48  ;;  %v8996_v48 = vld [vmem:[#allocation4 + $0xf14] ss:$8 sps:$4 sm:$0xff]  }
 0x311   :  { %5610 = vmatpush1.bf16.msra.mxu1 %v8901_v32  ;;  %v8999_v32 = vld [vmem:[#allocation4 + $0xf04] ss:$8 sps:$4 sm:$0xff]  }
 0x312   :  { %6044 = vmatpush1.bf16.msra.mxu0 %v8904_v34  ;;  %5611 = vmatprep.subr.bf16.mxu1 %v8909_v21  ;;  %v8997_v34 = vld [vmem:[#allocation4 + $0xf00] ss:$8 sps:$4 sm:$0xff]   ;;  %v9002_v21 = vld [vmem:[#allocation4 + $0xff4] ss:$8 sps:$4 sm:$0xff]  }
 0x313   :  { %6045 = vmatprep.subr.bf16.mxu0 %v8912_v12  ;;  %v9000_v12 = vld [vmem:[#allocation4 + $0xff0] ss:$8 sps:$4 sm:$0xff]  }
 0x315   :  { %5612 = vmatpush1.bf16.msra.mxu1 %v8907_v22  ;;  %v9005_v22 = vld [vmem:[#allocation4 + $0xfe4] ss:$8 sps:$4 sm:$0xff]  }
 0x316   :  { %6046 = vmatpush1.bf16.msra.mxu0 %v8910_v53  ;;  %5613 = vmatprep.subr.bf16.mxu1 %v8915_v23  ;;  %v9003_v53 = vld [vmem:[#allocation4 + $0xfe0] ss:$8 sps:$4 sm:$0xff]   ;;  %v9008_v23 = vld [vmem:[#allocation4 + $0xfd4] ss:$8 sps:$4 sm:$0xff]  }
 0x317   :  { %6047 = vmatprep.subr.bf16.mxu0 %v8918_v45  ;;  %v9006_v45 = vld [vmem:[#allocation4 + $0xfd0] ss:$8 sps:$4 sm:$0xff]  }
 0x319   :  { %5614 = vmatpush1.bf16.msra.mxu1 %v8913_v59  ;;  %v9011_v59 = vld [vmem:[#allocation4 + $0xfc4] ss:$8 sps:$4 sm:$0xff]  }
 0x31a   :  { %6048 = vmatpush1.bf16.msra.mxu0 %v8916_v60  ;;  %5615 = vmatprep.subr.bf16.mxu1 %v8921_v20  ;;  %v9009_v60 = vld [vmem:[#allocation4 + $0xfc0] ss:$8 sps:$4 sm:$0xff]   ;;  %v9014_v20 = vld [vmem:[#allocation4 + $0xfb4] ss:$8 sps:$4 sm:$0xff]  }
 0x31b   :  { %6049 = vmatprep.subr.bf16.mxu0 %v8924_v50  ;;  %v9012_v50 = vld [vmem:[#allocation4 + $0xfb0] ss:$8 sps:$4 sm:$0xff]  }
 0x31d   :  { %5616 = vmatpush1.bf16.msra.mxu1 %v8919_v56  ;;  %v9017_v56 = vld [vmem:[#allocation4 + $0xfa4] ss:$8 sps:$4 sm:$0xff]  }
 0x31e   :  { %6050 = vmatpush1.bf16.msra.mxu0 %v8922_v62  ;;  %5617 = vmatprep.subr.bf16.mxu1 %v8927_v61  ;;  %v9015_v62 = vld [vmem:[#allocation4 + $0xfa0] ss:$8 sps:$4 sm:$0xff]   ;;  %v9020_v61 = vld [vmem:[#allocation4 + $0xf94] ss:$8 sps:$4 sm:$0xff]  }
 0x31f   :  { %6051 = vmatprep.subr.bf16.mxu0 %v8930_v63  ;;  %v9018_v63 = vld [vmem:[#allocation4 + $0xf90] ss:$8 sps:$4 sm:$0xff]  }
 0x321   :  { %5618 = vmatpush1.bf16.msra.mxu1 %v8925_v6  ;;  %v9023_v6 = vld [vmem:[#allocation4 + $0xf84] ss:$8 sps:$4 sm:$0xff]  }
 0x322   :  { %6052 = vmatpush2.bf16.msra.mxu0 %v8928_v7  ;;  %5619 = vmatprep.subr.bf16.mxu1 %v8933_v57  ;;  %v9021_v7 = vld [vmem:[#allocation4 + $0xf80] ss:$8 sps:$4 sm:$0xff]   ;;  %v9024_v57 = vld [vmem:[%s10964_s6 + $0x150] ss:$24 sps:$4 sm:$0xff]  }
 0x323   :  { %6053 = vmatprep.subr.bf16.mxu0 %v8936_v16  ;;  %v9026_v16 = vld [vmem:[%s10964_s6 + $0x154] ss:$24 sps:$4 sm:$0xff]  }
 0x325   :  { %5620 = vmatpush2.bf16.msra.mxu1 %v8931_v17  ;;  %v9027_v17 = vld [vmem:[%s10964_s6 + $0x158] ss:$24 sps:$4 sm:$0xff]  }
 0x326   :  { %6054 = vmatpush2.bf16.msra.mxu0 %v8934_v10  ;;  %5621 = vmatprep.subr.bf16.mxu1 %v8939_v9  ;;  %v9029_v10 = vld [vmem:[%s10964_s6 + $0x15c] ss:$24 sps:$4 sm:$0xff]   ;;  %v9035_v9 = vld [vmem:[%s10964_s6 + $0x12c] ss:$24 sps:$4 sm:$0xff]  }
 0x327   :  { %6055 = vmatprep.subr.bf16.mxu0 %v8942_v38  ;;  %v9030_v38 = vld [vmem:[%s10964_s6 + $0x120] ss:$24 sps:$4 sm:$0xff]  }
 0x329   :  { %5622 = vmatpush2.bf16.msra.mxu1 %v8937_v13  ;;  %v9033_v13 = vld [vmem:[%s10964_s6 + $0x128] ss:$24 sps:$4 sm:$0xff]  }
 0x32a   :  { %6056 = vmatpush2.bf16.msra.mxu0 %v8940_v3  ;;  %5623 = vmatprep.subr.bf16.mxu1 %v8945_v15  ;;  %v9038_v3 = vld [vmem:[%s10964_s6 + $0xf4] ss:$24 sps:$4 sm:$0xff]  }
 0x32b   :  { %6057 = vmatprep.subr.bf16.mxu0 %v8948_v18  ;;  %v9041_v15 = vld [vmem:[%s10964_s6 + $0xfc] ss:$24 sps:$4 sm:$0xff]   ;;  %v9036_v18 = vld [vmem:[%s10964_s6 + $0xf0] ss:$24 sps:$4 sm:$0xff]  }
 0x32d   :  { %5624 = vmatpush2.bf16.msra.mxu1 %v8943_v28  ;;  %v9039_v28 = vld [vmem:[%s10964_s6 + $0xf8] ss:$24 sps:$4 sm:$0xff]  }
 0x32e   :  { %6058 = vmatpush2.bf16.msra.mxu0 %v8946_v19  ;;  %5625 = vmatprep.subr.bf16.mxu1 %v8951_v54  ;;  %v9044_v19 = vld [vmem:[%s10964_s6 + $0xc4] ss:$24 sps:$4 sm:$0xff]  }
 0x32f   :  { %6059 = vmatprep.subr.bf16.mxu0 %v8954_v11  ;;  %v9047_v54 = vld [vmem:[%s10964_s6 + $0xcc] ss:$24 sps:$4 sm:$0xff]   ;;  %v9042_v11 = vld [vmem:[%s10964_s6 + $0xc0] ss:$24 sps:$4 sm:$0xff]  }
 0x331   :  { %5626 = vmatpush2.bf16.msra.mxu1 %v8949_v0  ;;  %v9045_v0 = vld [vmem:[%s10964_s6 + $0xc8] ss:$24 sps:$4 sm:$0xff]  }
 0x332   :  { %6060 = vmatpush2.bf16.msra.mxu0 %v8952_v31  ;;  %5627 = vmatprep.subr.bf16.mxu1 %v8957_v36  ;;  %v9050_v31 = vld [vmem:[%s10964_s6 + $0x94] ss:$24 sps:$4 sm:$0xff]  }
 0x333   :  { %6061 = vmatprep.subr.bf16.mxu0 %v8960_v24  ;;  %v9053_v36 = vld [vmem:[%s10964_s6 + $0x9c] ss:$24 sps:$4 sm:$0xff]   ;;  %v9048_v24 = vld [vmem:[%s10964_s6 + $0x90] ss:$24 sps:$4 sm:$0xff]  }
 0x335   :  { %5628 = vmatpush2.bf16.msra.mxu1 %v8955_v37  ;;  %v9051_v37 = vld [vmem:[%s10964_s6 + $0x98] ss:$24 sps:$4 sm:$0xff]  }
 0x336   :  { %6062 = vmatpush2.bf16.msra.mxu0 %v8958_v30  ;;  %5629 = vmatprep.subr.bf16.mxu1 %v8963_v42  ;;  %v9056_v30 = vld [vmem:[%s10964_s6 + $0x64] ss:$24 sps:$4 sm:$0xff]  }
 0x337   :  { %6063 = vmatprep.subr.bf16.mxu0 %v8966_v29  ;;  %v9059_v42 = vld [vmem:[%s10964_s6 + $0x6c] ss:$24 sps:$4 sm:$0xff]   ;;  %v9054_v29 = vld [vmem:[%s10964_s6 + $0x60] ss:$24 sps:$4 sm:$0xff]  }
 0x339   :  { %5630 = vmatpush2.bf16.msra.mxu1 %v8961_v39  ;;  %v9057_v39 = vld [vmem:[%s10964_s6 + $0x68] ss:$24 sps:$4 sm:$0xff]  }
 0x33a   :  { %6064 = vmatpush2.bf16.msra.mxu0 %v8964_v25  ;;  %5631 = vmatprep.subr.bf16.mxu1 %v8969_v4  ;;  %v9062_v25 = vld [vmem:[%s10964_s6 + $0x34] ss:$24 sps:$4 sm:$0xff]  }
 0x33b   :  { %6065 = vmatprep.subr.bf16.mxu0 %v8972_v35  ;;  %v9065_v4 = vld [vmem:[%s10964_s6 + $0x3c] ss:$24 sps:$4 sm:$0xff]   ;;  %v9060_v35 = vld [vmem:[%s10964_s6 + $0x30] ss:$24 sps:$4 sm:$0xff]  }
 0x33d   :  { %5632 = vmatpush2.bf16.msra.mxu1 %v8967_v8  ;;  %v9063_v8 = vld [vmem:[%s10964_s6 + $0x38] ss:$24 sps:$4 sm:$0xff]  }
 0x33e   :  { %6066 = vmatpush2.bf16.msra.mxu0 %v8970_v49  ;;  %5633 = vmatprep.subr.bf16.mxu1 %v8975_v26  ;;  %v9068_v49 = vld [vmem:[%s10964_s6 + $0x4] ss:$24 sps:$4 sm:$0xff]  }
 0x33f   :  { %6743 = vmatprep.subr.bf16.mxu0 %v9026_v16  ;;  %v9071_v26 = vld [vmem:[%s10964_s6 + $0xc] ss:$24 sps:$4 sm:$0xff]   ;;  %v2744_v16 = vpop.f32.mrf.mxu0 }
 0x341   :  { %5634 = vmatpush2.bf16.msra.mxu1 %v8973_v44  ;;  %6068 = vmatmul.mubr.bf16.vlgmr.msra.gmra.mxu0 %v10988_v51  ;;  %v9066_v44 = vld [vmem:[%s10964_s6] ss:$24 sps:$4 sm:$0xff]   ;;  %v9074_v51 = vld [vmem:[%s10964_s6 + $0x2d4] ss:$24 sps:$4 sm:$0xff]  }
 0x342   :  { %6078 = vmatprep.subr.bf16.mxu1 %v8978_v52  ;;  %6744 = vmatpush1.bf16.msra.mxu0 %v9024_v57  ;;  %v9069_v52 = vld [vmem:[%s10964_s6 + $0x8] ss:$24 sps:$4 sm:$0xff]   ;;  %v9122_v57 = vld [vmem:[%s10964_s6 + $0x164] ss:$24 sps:$4 sm:$0xff]  }
 0x344   :  { %5636 = vmatmul.mubr.bf16.vlgmr.msra.gmra.mxu1 %v10585_v33  ;;  %v8991_v33 = vld [vmem:[#allocation4 + $0xf20] ss:$8 sps:$4 sm:$0xff]  }
 0x345   :  { %6079 = vmatpush1.bf16.msra.mxu1 %v8976_v40  ;;  %6110 = vmatprep.mubr.bf16.mxu1 %v10594_v5  ;;  %v8994_v5 = vld [vmem:[#allocation4 + $0xf10] ss:$8 sps:$4 sm:$0xff]  }
 0x346   :  { %6080 = vmatprep.subr.bf16.mxu1 %v8981_v58  ;;  %v9077_v40 = vld [vmem:[%s10964_s6 + $0x2dc] ss:$24 sps:$4 sm:$0xff]   ;;  %v9072_v58 = vld [vmem:[%s10964_s6 + $0x2d0] ss:$24 sps:$4 sm:$0xff]  }
 0x349   :  { %6081 = vmatpush1.bf16.msra.mxu1 %v8979_v2  ;;  %v9075_v2 = vld [vmem:[%s10964_s6 + $0x2d8] ss:$24 sps:$4 sm:$0xff]  }
 0x34a   :  { %6082 = vmatprep.subr.bf16.mxu1 %v8984_v41  ;;  %v9080_v41 = vld [vmem:[%s10964_s6 + $0x2a4] ss:$24 sps:$4 sm:$0xff]  }
 0x34d   :  { %6083 = vmatpush1.bf16.msra.mxu1 %v8982_v1  ;;  %v9083_v1 = vld [vmem:[%s10964_s6 + $0x2ac] ss:$24 sps:$4 sm:$0xff]  }
 0x34e   :  { %6084 = vmatprep.subr.bf16.mxu1 %v8987_v14  ;;  %v9078_v14 = vld [vmem:[%s10964_s6 + $0x2a0] ss:$24 sps:$4 sm:$0xff]  }
 0x351   :  { %6085 = vmatpush1.bf16.msra.mxu1 %v8985_v46  ;;  %v9081_v46 = vld [vmem:[%s10964_s6 + $0x2a8] ss:$24 sps:$4 sm:$0xff]  }
 0x352   :  { %6086 = vmatprep.subr.bf16.mxu1 %v8990_v55  ;;  %v9086_v55 = vld [vmem:[%s10964_s6 + $0x274] ss:$24 sps:$4 sm:$0xff]  }
 0x355   :  { %6087 = vmatpush1.bf16.msra.mxu1 %v8988_v27  ;;  %v9089_v27 = vld [vmem:[%s10964_s6 + $0x27c] ss:$24 sps:$4 sm:$0xff]  }
 0x356   :  { %6088 = vmatprep.subr.bf16.mxu1 %v8993_v47  ;;  %v9084_v47 = vld [vmem:[%s10964_s6 + $0x270] ss:$24 sps:$4 sm:$0xff]  }
 0x359   :  { %6089 = vmatpush1.bf16.msra.mxu1 %v8991_v33  ;;  %v9087_v33 = vld [vmem:[%s10964_s6 + $0x278] ss:$24 sps:$4 sm:$0xff]  }
 0x35a   :  { %6090 = vmatprep.subr.bf16.mxu1 %v8996_v48  ;;  %v9092_v48 = vld [vmem:[%s10964_s6 + $0x244] ss:$24 sps:$4 sm:$0xff]  }
 0x35d   :  { %6091 = vmatpush1.bf16.msra.mxu1 %v8994_v5  ;;  %v9095_v5 = vld [vmem:[%s10964_s6 + $0x24c] ss:$24 sps:$4 sm:$0xff]  }
 0x35e   :  { %6092 = vmatprep.subr.bf16.mxu1 %v8999_v32  ;;  %v9090_v32 = vld [vmem:[%s10964_s6 + $0x240] ss:$24 sps:$4 sm:$0xff]  }
 0x361   :  { %6093 = vmatpush1.bf16.msra.mxu1 %v8997_v34  ;;  %v9093_v34 = vld [vmem:[%s10964_s6 + $0x248] ss:$24 sps:$4 sm:$0xff]  }
 0x362   :  { %6094 = vmatprep.subr.bf16.mxu1 %v9002_v21  ;;  %v9098_v21 = vld [vmem:[%s10964_s6 + $0x214] ss:$24 sps:$4 sm:$0xff]  }
 0x365   :  { %6095 = vmatpush2.bf16.msra.mxu1 %v9000_v12  ;;  %v9096_v12 = vld [vmem:[%s10964_s6 + $0x210] ss:$24 sps:$4 sm:$0xff]  }
 0x366   :  { %6096 = vmatprep.subr.bf16.mxu1 %v9005_v22  ;;  %v9101_v22 = vld [vmem:[%s10964_s6 + $0x21c] ss:$24 sps:$4 sm:$0xff]  }
 0x369   :  { %6097 = vmatpush2.bf16.msra.mxu1 %v9003_v53  ;;  %v9099_v53 = vld [vmem:[%s10964_s6 + $0x218] ss:$24 sps:$4 sm:$0xff]  }
 0x36a   :  { %6098 = vmatprep.subr.bf16.mxu1 %v9008_v23  ;;  %v9104_v23 = vld [vmem:[%s10964_s6 + $0x1e4] ss:$24 sps:$4 sm:$0xff]  }
 0x36d   :  { %6099 = vmatpush2.bf16.msra.mxu1 %v9006_v45  ;;  %v9102_v45 = vld [vmem:[%s10964_s6 + $0x1e0] ss:$24 sps:$4 sm:$0xff]  }
 0x36e   :  { %6100 = vmatprep.subr.bf16.mxu1 %v9011_v59  ;;  %v9107_v59 = vld [vmem:[%s10964_s6 + $0x1ec] ss:$24 sps:$4 sm:$0xff]  }
 0x371   :  { %6101 = vmatpush2.bf16.msra.mxu1 %v9009_v60  ;;  %v9105_v60 = vld [vmem:[%s10964_s6 + $0x1e8] ss:$24 sps:$4 sm:$0xff]  }
 0x372   :  { %6102 = vmatprep.subr.bf16.mxu1 %v9014_v20  ;;  %v9110_v20 = vld [vmem:[%s10964_s6 + $0x1b4] ss:$24 sps:$4 sm:$0xff]  }
 0x375   :  { %6103 = vmatpush2.bf16.msra.mxu1 %v9012_v50  ;;  %v9108_v50 = vld [vmem:[%s10964_s6 + $0x1b0] ss:$24 sps:$4 sm:$0xff]  }
 0x376   :  { %6104 = vmatprep.subr.bf16.mxu1 %v9017_v56  ;;  %v9113_v56 = vld [vmem:[%s10964_s6 + $0x1bc] ss:$24 sps:$4 sm:$0xff]  }
 0x379   :  { %6105 = vmatpush2.bf16.msra.mxu1 %v9015_v62  ;;  %v9111_v62 = vld [vmem:[%s10964_s6 + $0x1b8] ss:$24 sps:$4 sm:$0xff]  }
 0x37a   :  { %6106 = vmatprep.subr.bf16.mxu1 %v9020_v61  ;;  %v9116_v61 = vld [vmem:[%s10964_s6 + $0x184] ss:$24 sps:$4 sm:$0xff]  }
 0x37d   :  { %6107 = vmatpush2.bf16.msra.mxu1 %v9018_v63  ;;  %v9114_v63 = vld [vmem:[%s10964_s6 + $0x180] ss:$24 sps:$4 sm:$0xff]  }
 0x37e   :  { %6108 = vmatprep.subr.bf16.mxu1 %v9023_v6  ;;  %v9119_v6 = vld [vmem:[%s10964_s6 + $0x18c] ss:$24 sps:$4 sm:$0xff]  }
 0x381   :  { %6109 = vmatpush2.bf16.msra.mxu1 %v9021_v7  ;;  %v9117_v7 = vld [vmem:[%s10964_s6 + $0x188] ss:$24 sps:$4 sm:$0xff]  }
 0x382   :  { %6786 = vmatprep.subr.bf16.mxu1 %v9029_v10  ;;  %v2787_v10 = vpop.f32.mrf.mxu1 }
 0x384   :  { %6111 = vmatmul.mubr.bf16.vlgmr.msra.gmra.mxu1 %v10592_v43  ;;  %v9032_v43 = vld [vmem:[%s10964_s6 + $0x124] ss:$24 sps:$4 sm:$0xff]  }
 0x385   :  { %6787 = vmatpush1.bf16.msra.mxu1 %v9027_v17  ;;  %6745 = vmatprep.subr.bf16.mxu0 %v9032_v43  ;;  %v2746_v17 = vpop.f32.mrf.mxu0 }
 0x386   :  { %6788 = vmatprep.subr.bf16.mxu1 %v9035_v9  ;;  %6746 = vmatpush1.bf16.msra.mxu0 %v9030_v38  ;;  %v2789_v9 = vpop.f32.mrf.mxu1 }
 0x387   :  { %6747 = vmatprep.subr.bf16.mxu0 %v9038_v3  ;;  %v2748_v43 = vpop.f32.mrf.mxu0 }
 0x388   :  { %v2791_v3 = vpop.f32.mrf.mxu1 }
 0x389   :  { %6789 = vmatpush1.bf16.msra.mxu1 %v9033_v13  ;;  %v2750_v38 = vpop.f32.mrf.mxu0 }
 0x38a   :  { %6790 = vmatprep.subr.bf16.mxu1 %v9041_v15  ;;  %6748 = vmatpush1.bf16.msra.mxu0 %v9036_v18  ;;  %v2793_v18 = vpop.f32.mrf.mxu1 }
 0x38b   :  { %6749 = vmatprep.subr.bf16.mxu0 %v9044_v19  ;;  %v3219_v13 = vpop.f32.mrf.mxu0 }
 0x38d   :  { %6791 = vmatpush1.bf16.msra.mxu1 %v9039_v28  ;;  %v3221_v15 = vpop.f32.mrf.mxu0  ;;  %v3262_v28 = vpop.f32.mrf.mxu1 }
 0x38e   :  { %6792 = vmatprep.subr.bf16.mxu1 %v9047_v54  ;;  %6750 = vmatpush1.bf16.msra.mxu0 %v9042_v11 }
 0x38f   :  { %6751 = vmatprep.subr.bf16.mxu0 %v9050_v31  ;;  %v3223_v19 = vpop.f32.mrf.mxu0  ;;  %v3264_v54 = vpop.f32.mrf.mxu1 }
 0x391   :  { %6793 = vmatpush1.bf16.msra.mxu1 %v9045_v0  ;;  %v3225_v11 = vpop.f32.mrf.mxu0  ;;  %v3266_v31 = vpop.f32.mrf.mxu1 }
 0x392   :  { %6794 = vmatprep.subr.bf16.mxu1 %v9053_v36  ;;  %6752 = vmatpush1.bf16.msra.mxu0 %v9048_v24 }
 0x393   :  { %6753 = vmatprep.subr.bf16.mxu0 %v9056_v30  ;;  %v3694_v0 = vpop.f32.mrf.mxu0  ;;  %v3268_v24 = vpop.f32.mrf.mxu1 }
 0x395   :  { %6795 = vmatpush1.bf16.msra.mxu1 %v9051_v37  ;;  %v3696_v36 = vpop.f32.mrf.mxu0  ;;  %v3737_v37 = vpop.f32.mrf.mxu1 }
 0x396   :  { %6796 = vmatprep.subr.bf16.mxu1 %v9059_v42  ;;  %6754 = vmatpush1.bf16.msra.mxu0 %v9054_v29 }
 0x397   :  { %6755 = vmatprep.subr.bf16.mxu0 %v9062_v25  ;;  %v3698_v30 = vpop.f32.mrf.mxu0  ;;  %v3739_v42 = vpop.f32.mrf.mxu1 }
 0x399   :  { %6797 = vmatpush1.bf16.msra.mxu1 %v9057_v39  ;;  %v3700_v29 = vpop.f32.mrf.mxu0  ;;  %v3741_v25 = vpop.f32.mrf.mxu1 }
 0x39a   :  { %6798 = vmatprep.subr.bf16.mxu1 %v9065_v4  ;;  %6756 = vmatpush1.bf16.msra.mxu0 %v9060_v35 }
 0x39b   :  { %6757 = vmatprep.subr.bf16.mxu0 %v9068_v49  ;;  %v4169_v39 = vpop.f32.mrf.mxu0  ;;  %v3743_v35 = vpop.f32.mrf.mxu1 }
 0x39d   :  { %6799 = vmatpush1.bf16.msra.mxu1 %v9063_v8  ;;  %v4171_v4 = vpop.f32.mrf.mxu0  ;;  %v4212_v8 = vpop.f32.mrf.mxu1 }
 0x39e   :  { %6800 = vmatprep.subr.bf16.mxu1 %v9071_v26  ;;  %6758 = vmatpush1.bf16.msra.mxu0 %v9066_v44 }
 0x39f   :  { %6759 = vmatprep.subr.bf16.mxu0 %v9074_v51  ;;  %v4173_v49 = vpop.f32.mrf.mxu0  ;;  %v4214_v26 = vpop.f32.mrf.mxu1 }
 0x3a1   :  { %6801 = vmatpush1.bf16.msra.mxu1 %v9069_v52  ;;  %v4175_v44 = vpop.f32.mrf.mxu0  ;;  %v4216_v51 = vpop.f32.mrf.mxu1 }
 0x3a2   :  { %6802 = vmatprep.subr.bf16.mxu1 %v9077_v40  ;;  %6760 = vmatpush2.bf16.msra.mxu0 %v9072_v58 }
 0x3a3   :  { %6761 = vmatprep.subr.bf16.mxu0 %v9080_v41  ;;  %v4644_v52 = vpop.f32.mrf.mxu0  ;;  %v4218_v58 = vpop.f32.mrf.mxu1 }
 0x3a5   :  { %6803 = vmatpush2.bf16.msra.mxu1 %v9075_v2  ;;  %v4646_v40 = vpop.f32.mrf.mxu0  ;;  %v4687_v2 = vpop.f32.mrf.mxu1 }
 0x3a6   :  { %6804 = vmatprep.subr.bf16.mxu1 %v9083_v1  ;;  %6762 = vmatpush2.bf16.msra.mxu0 %v9078_v14 }
 0x3a7   :  { %6763 = vmatprep.subr.bf16.mxu0 %v9086_v55  ;;  %v4648_v41 = vpop.f32.mrf.mxu0  ;;  %v4689_v1 = vpop.f32.mrf.mxu1 }
 0x3a9   :  { %6805 = vmatpush2.bf16.msra.mxu1 %v9081_v46  ;;  %v4650_v14 = vpop.f32.mrf.mxu0  ;;  %v4691_v55 = vpop.f32.mrf.mxu1 }
 0x3aa   :  { %6806 = vmatprep.subr.bf16.mxu1 %v9089_v27  ;;  %6764 = vmatpush2.bf16.msra.mxu0 %v9084_v47 }
 0x3ab   :  { %6765 = vmatprep.subr.bf16.mxu0 %v9092_v48  ;;  %v5119_v46 = vpop.f32.mrf.mxu0  ;;  %v4693_v47 = vpop.f32.mrf.mxu1 }
 0x3ad   :  { %6807 = vmatpush2.bf16.msra.mxu1 %v9087_v33  ;;  %v5121_v27 = vpop.f32.mrf.mxu0 }
 0x3ae   :  { %6808 = vmatprep.subr.bf16.mxu1 %v9095_v5  ;;  %6766 = vmatpush2.bf16.msra.mxu0 %v9090_v32 }
 0x3af   :  { %6767 = vmatprep.subr.bf16.mxu0 %v9098_v21  ;;  %v5123_v48 = vpop.f32.mrf.mxu0 }
 0x3b1   :  { %6809 = vmatpush2.bf16.msra.mxu1 %v9093_v34  ;;  %v5125_v32 = vpop.f32.mrf.mxu0 }
 0x3b2   :  { %6768 = vmatpush2.bf16.msra.mxu0 %v9096_v12  ;;  %6810 = vmatprep.subr.bf16.mxu1 %v9101_v22 }
 0x3b3   :  { %6769 = vmatprep.subr.bf16.mxu0 %v9104_v23 }
 0x3b5   :  { %6811 = vmatpush2.bf16.msra.mxu1 %v9099_v53  ;;  %v2314_v53 = vld [vmem:[#allocation6] sm:$0x3] }
 0x3b6   :  { %6770 = vmatpush2.bf16.msra.mxu0 %v9102_v45  ;;  %6812 = vmatprep.subr.bf16.mxu1 %v9107_v59  ;;  %v10989_v45 = vld [vmem:[#allocation14_spill] sm:$0xff] }
 0x3b7   :  { %6771 = vmatprep.subr.bf16.mxu0 %v9110_v20  ;;  %v2323_v59 = vrot.slane %v2314_v53, %v10989_v45  ;;  %v10990_v20 = vld [vmem:[#allocation13_spill] sm:$0xff] }
 0x3b9   :  { %6813 = vmatpush2.bf16.msra.mxu1 %v9105_v60  ;;  %v2790_v60 = vadd.f32 %v2789_v9, %v2746_v17  ;;  %v3267_v9 = vadd.f32 %v3266_v31, %v3223_v19  ;;  %v3740_v17 = vadd.f32 %v3739_v42, %v3696_v36  ;;  %v4217_v42 = vadd.f32 %v4216_v51, %v4173_v49 }
 0x3ba   :  { %6772 = vmatpush2.bf16.msra.mxu0 %v9108_v50  ;;  %6814 = vmatprep.subr.bf16.mxu1 %v9113_v56  ;;  %v2319_v50 = vrot.slane %v2314_v53, %v10990_v20  ;;  %v2788_v56 = vadd.f32 %v2787_v10, %v2744_v16  ;;  %v3269_v53 = vadd.f32 %v3268_v24, %v3225_v11 }
 0x3bb   :  { %6773 = vmatprep.subr.bf16.mxu0 %v9116_v61  ;;  %v2792_v61 = vadd.f32 %v2791_v3, %v2748_v43  ;;  %v2797_v45 = vadd.f32 %v2790_v60, %v2323_v59  ;;  %v3738_v10 = vadd.f32 %v3737_v37, %v3694_v0  ;;  %v4219_v0 = vadd.f32 %v4218_v58, %v4175_v44 }
 0x3bc   :  { %v2796_v20 = vadd.f32 %v2788_v56, %v2319_v50  ;;  %v4690_v56 = vadd.f32 %v4689_v1, %v4646_v40  ;;  %v4688_v37 = vadd.f32 %v4687_v2, %v4644_v52 }
 0x3bd   :  { %6815 = vmatpush2.bf16.msra.mxu1 %v9111_v62  ;;  %v2798_v3 = vadd.f32 %v2792_v61, %v2319_v50 }
 0x3be   :  { %6774 = vmatpush2.bf16.msra.mxu0 %v9114_v63  ;;  %6816 = vmatprep.subr.bf16.mxu1 %v9119_v6  ;;  %v3265_v63 = vadd.f32 %v3264_v54, %v3221_v15  ;;  %v2794_v6 = vadd.f32 %v2793_v18, %v2750_v38  ;;  %v3742_v15 = vadd.f32 %v3741_v25, %v3698_v30 }
 0x3bf   :  { %6829 = vmatprep.subr.bf16.mxu0 %v9122_v57  ;;  %v4215_v54 = vadd.f32 %v4214_v26, %v4171_v4  ;;  %v3273_v31 = vadd.f32 %v3267_v9, %v2798_v3  ;;  %v4694_v4 = vadd.f32 %v4693_v47, %v4650_v14 }
 0x3c0   :  { %v3272_v43 = vadd.f32 %v3265_v63, %v2797_v45  ;;  %v2799_v18 = vadd.f32 %v2794_v6, %v2323_v59  ;;  %v4692_v45 = vadd.f32 %v4691_v55, %v4648_v41 }
 0x3c1   :  { %6817 = vmatpush2.bf16.msra.mxu1 %v9117_v7  ;;  %v5594_v34 = vpop.f32.mrf.mxu0  ;;  %v3263_v7 = vadd.f32 %v3262_v28, %v3219_v13  ;;  %v3744_v13 = vadd.f32 %v3743_v35, %v3700_v29  ;;  %v4213_v28 = vadd.f32 %v4212_v8, %v4169_v39  ;;  %v3748_v50 = vadd.f32 %v3742_v15, %v3273_v31  ;;  %v9131_v31 = vld [vmem:[%s10964_s6 + $0xd4] ss:$24 sps:$4 sm:$0xff]  }
 0x3c2   :  { %v3747_v36 = vadd.f32 %v3740_v17, %v3272_v43  ;;  %v3274_v11 = vadd.f32 %v3269_v53, %v2799_v18  ;;  %v9120_v18 = vld [vmem:[%s10964_s6 + $0x160] ss:$24 sps:$4 sm:$0xff]  }
 0x3c3   :  { %v5596_v12 = vpop.f32.mrf.mxu0  ;;  %v3271_v38 = vadd.f32 %v3263_v7, %v2796_v20  ;;  %v4223_v35 = vadd.f32 %v4217_v42, %v3748_v50  ;;  %v9134_v42 = vld [vmem:[%s10964_s6 + $0xa4] ss:$24 sps:$4 sm:$0xff]   ;;  %v9143_v50 = vld [vmem:[%s10964_s6 + $0x14] ss:$24 sps:$4 sm:$0xff]  }
 0x3c4   :  { %v5162_v33 = vpop.f32.mrf.mxu1  ;;  %v4222_v61 = vadd.f32 %v4215_v54, %v3747_v36  ;;  %v3749_v30 = vadd.f32 %v3744_v13, %v3274_v11  ;;  %v9125_v13 = vld [vmem:[%s10964_s6 + $0x134] ss:$24 sps:$4 sm:$0xff]   ;;  %v9129_v36 = vld [vmem:[%s10964_s6 + $0xd0] ss:$24 sps:$4 sm:$0xff]  }
 0x3c5   :  { %v5598_v62 = vpop.f32.mrf.mxu0  ;;  %v3746_v24 = vadd.f32 %v3738_v10, %v3271_v38  ;;  %v5163_v26 = vadd.f32 %v5162_v33, %v5119_v46  ;;  %v4698_v44 = vadd.f32 %v4692_v45, %v4223_v35  ;;  %v9276_v10 = vmov -1.0   ;;  %v9137_v11 = vld [vmem:[%s10964_s6 + $0x74] ss:$24 sps:$4 sm:$0xff]   ;;  %v9146_v45 = vld [vmem:[%s10964_s6 + $0x2e4] ss:$24 sps:$4 sm:$0xff]  }
 0x3c6   :  { %v5164_v5 = vpop.f32.mrf.mxu1  ;;  %v4697_v8 = vadd.f32 %v4690_v56, %v4222_v61  ;;  %v4224_v49 = vadd.f32 %v4219_v0, %v3749_v30  ;;  %v9132_v56 = vld [vmem:[%s10964_s6 + $0xa0] ss:$24 sps:$4 sm:$0xff]   ;;  %v9140_v0 = vld [vmem:[%s10964_s6 + $0x44] ss:$24 sps:$4 sm:$0xff]   ;;  %v9141_v61 = vld [vmem:[%s10964_s6 + $0x10] ss:$24 sps:$4 sm:$0xff]  }
 0x3c7   :  { %v5600_v16 = vpop.f32.mrf.mxu0  ;;  %v5165_v63 = vadd.f32 %v5164_v5, %v5121_v27  ;;  %v4221_v25 = vadd.f32 %v4213_v28, %v3746_v24  ;;  %v9123_v28 = vld [vmem:[%s10964_s6 + $0x130] ss:$24 sps:$4 sm:$0xff]   ;;  %v9149_v30 = vld [vmem:[%s10964_s6 + $0x2b4] ss:$24 sps:$4 sm:$0xff]   ;;  %v9158_v35 = vld [vmem:[%s10964_s6 + $0x224] ss:$24 sps:$4 sm:$0xff]  }
 0x3c8   :  { %v5166_v21 = vpop.f32.mrf.mxu1  ;;  %v4699_v41 = vadd.f32 %v4694_v4, %v4224_v49  ;;  %v9135_v24 = vld [vmem:[%s10964_s6 + $0x70] ss:$24 sps:$4 sm:$0xff]   ;;  %v9152_v4 = vld [vmem:[%s10964_s6 + $0x284] ss:$24 sps:$4 sm:$0xff]  }
 0x3c9   :  { %v5167_v59 = vadd.f32 %v5166_v21, %v5123_v48  ;;  %v4696_v51 = vadd.f32 %v4688_v37, %v4221_v25  ;;  %v5172_v52 = vadd.f32 %v5165_v63, %v4697_v8  ;;  %v9138_v37 = vld [vmem:[%s10964_s6 + $0x40] ss:$24 sps:$4 sm:$0xff]   ;;  %v9147_v25 = vld [vmem:[%s10964_s6 + $0x2b0] ss:$24 sps:$4 sm:$0xff]   ;;  %v9164_v49 = vld [vmem:[%s10964_s6 + $0x1c4] ss:$24 sps:$4 sm:$0xff]  }
 0x3ca   :  { %v5168_v22 = vpop.f32.mrf.mxu1  ;;  %v9144_v63 = vld [vmem:[%s10964_s6 + $0x2e0] ss:$24 sps:$4 sm:$0xff]  }
 0x3cb   :  { %v5169_v58 = vadd.f32 %v5168_v22, %v5125_v32  ;;  %v5171_v55 = vadd.f32 %v5163_v26, %v4696_v51  ;;  %v5173_v46 = vadd.f32 %v5167_v59, %v4698_v44  ;;  %v9150_v26 = vld [vmem:[%s10964_s6 + $0x280] ss:$24 sps:$4 sm:$0xff]   ;;  %v9161_v59 = vld [vmem:[%s10964_s6 + $0x1f4] ss:$24 sps:$4 sm:$0xff]   ;;  %v10915_v44 = vld [vmem:[#allocation7] sm:$0x3f] }
 0x3cc   :  { %v9156_v8 = vld [vmem:[%s10964_s6 + $0x220] ss:$24 sps:$4 sm:$0xff]  }
 0x3cd   :  { %v5174_v21 = vadd.f32 %v5169_v58, %v4699_v41  ;;  %v9162_v51 = vld [vmem:[%s10964_s6 + $0x1c0] ss:$24 sps:$4 sm:$0xff]   ;;  %v6873_v58 = vld [vmem:[%s10959_s1 + $0x8] sm:$0xff] }
 0x401   :  { %v6069_v60 = vpop.f32.mrf.mxu0 }
 0x403   :  { %v6071_v29 = vpop.f32.mrf.mxu0 }
 0x404   :  { %v5637_v23 = vpop.f32.mrf.mxu1 }
 0x405   :  { %v5638_v40 = vadd.f32 %v5637_v23, %v5594_v34  ;;  %v6073_v27 = vpop.f32.mrf.mxu0 }
 0x406   :  { %v5639_v57 = vpop.f32.mrf.mxu1 }
 0x407   :  { %v5640_v20 = vadd.f32 %v5639_v57, %v5596_v12  ;;  %v5646_v7 = vadd.f32 %v5638_v40, %v5171_v55  ;;  %v6075_v23 = vpop.f32.mrf.mxu0  ;;  %v9167_v40 = vld [vmem:[%s10964_s6 + $0x194] ss:$24 sps:$4 sm:$0xff]  }
 0x408   :  { %v5641_v19 = vpop.f32.mrf.mxu1  ;;  %v10992_v55 = vld [vmem:[#allocation12_spill] sm:$0xff] }
 0x409   :  { %v5642_v2 = vadd.f32 %v5641_v19, %v5598_v62  ;;  %v5647_v47 = vadd.f32 %v5640_v20, %v5172_v52  ;;  %v9126_v19 = vld [vmem:[%s10964_s6 + $0x100] ss:$24 sps:$4 sm:$0xff]   ;;  %v9159_v20 = vld [vmem:[%s10964_s6 + $0x1f0] ss:$24 sps:$4 sm:$0xff]   ;;  %vm6921_vm4 = vcmp.lt.s32.totalorder %v10992_v55, 2 }
 0x40a   :  { %v5643_v39 = vpop.f32.mrf.mxu1  ;;  %v6872_v52 = vld [vmem:[%s10959_s1] sm:$0xff] }
 0x40b   :  { %v5644_v33 = vadd.f32 %v5643_v39, %v5600_v16  ;;  %v5648_v12 = vadd.f32 %v5642_v2, %v5173_v46  ;;  %v9153_v39 = vld [vmem:[%s10964_s6 + $0x250] ss:$24 sps:$4 sm:$0xff]   ;;  %v10991_v2 = vld [vmem:[#allocation13_spill] sm:$0xff]  ;;  %v6880_v46 = vunpack.c.l.bf16 %v6873_v58 }
 0x40c   :  { %v6236_v41 = vrot.slane %v10915_v44, %v10991_v2 }
 0x40d   :  { %v5649_v32 = vadd.f32 %v5644_v33, %v5174_v21 }
 0x444   :  { %v6112_v1 = vpop.f32.mrf.mxu1 }
 0x445   :  { %v6113_v5 = vadd.f32 %v6112_v1, %v6069_v60  ;;  %v9128_v60 = vld [vmem:[%s10964_s6 + $0x104] ss:$24 sps:$4 sm:$0xff]   ;;  %v9165_v1 = vld [vmem:[%s10964_s6 + $0x190] ss:$24 sps:$4 sm:$0xff]  }
 0x446   :  { %v6114_v14 = vpop.f32.mrf.mxu1 }
 0x447   :  { %v6115_v6 = vadd.f32 %v6114_v14, %v6071_v29  ;;  %v6121_v9 = vadd.f32 %v6113_v5, %v5646_v7  ;;  %v9155_v29 = vld [vmem:[%s10964_s6 + $0x254] ss:$24 sps:$4 sm:$0xff]   ;;  %v6878_v14 = vunpack.c.l.bf16 %v6872_v52 }
 0x448   :  { %v6116_v48 = vpop.f32.mrf.mxu1 }
 0x449   :  { %v6122_v57 = vadd.f32 %v6115_v6, %v5647_v47  ;;  %v6117_v34 = vadd.f32 %v6116_v48, %v6073_v27  ;;  %vm6125_vm2 = vcmp.ge.f32.partialorder %v6121_v9, 0.0  ;;  %v10993_v27 = vsub.s32 2, %v10992_v55  ;;  %v10994_v47 = vld [vmem:[#allocation14_spill] sm:$0xff] }
 0x44a   :  { %v6118_v17 = vpop.f32.mrf.mxu1  ;;  %v6129_v15 = vsel %vm6125_vm2, 1.0, %v9276_v10  ;;  %v6240_v33 = vrot.slane %v10915_v44, %v10994_v47  ;;  %v10995_v6 = vsub.s32 3, %v10992_v55 }
 0x44b   :  { %v6123_v22 = vadd.f32 %v6117_v34, %v5648_v12  ;;  %v6119_v62 = vadd.f32 %v6118_v17, %v6075_v23  ;;  %vm6126_vm0 = vcmp.ge.f32.partialorder %v6122_v57, 0.0  ;;  %v6244_v5 = vrot.slane %v10915_v44, %v10993_v27 }
 0x44c   :  { %v6130_v16 = vsel %vm6126_vm0, 1.0, %v9276_v10  ;;  %v6248_v7 = vrot.slane %v10915_v44, %v10995_v6  ;;  %v6879_v34 = vunpack.c.h.bf16 %v6872_v52  ;;  %v6881_v23 = vunpack.c.h.bf16 %v6873_v58 }
 0x44d   :  { %vm6127_vm1 = vcmp.ge.f32.partialorder %v6123_v22, 0.0  ;;  %v6124_v53 = vadd.f32 %v6119_v62, %v5649_v32  ;;  %v6255_v6 = vsub.s32 5, %v10992_v55 }
 0x44e   :  { %v6131_v3 = vsel %vm6127_vm1, 1.0, %v9276_v10 }
 0x44f   :  { %vm6128_vm3 = vcmp.ge.f32.partialorder %v6124_v53, 0.0  ;;  %v10820_v38 = vpack.c.bf16 %v6131_v3, %v6129_v15 }
 0x450   :  { %v6132_v43 = vsel %vm6128_vm3, 1.0, %v9276_v10 }
 0x451   :  { %v6134_v54 = vpack.c.bf16 %v6132_v43, %v6130_v16 }
 0x453   :  { %6775 = vmatprep.mubr.bf16.mxu0 %v6134_v54  ;;  %6818 = vmatprep.mubr.bf16.mxu1 %v6134_v54 }
 0x454   :  { %6776 = vmatmul.mubr.bf16.vlgmr.msra.gmra.mxu0 %v10820_v38  ;;  %6819 = vmatmul.mubr.bf16.vlgmr.msra.gmra.mxu1 %v10820_v38 }
 0x455   :  { %6830 = vmatpush1.bf16.msra.mxu0 %v9120_v18  ;;  %6861 = vmatprep.mubr.bf16.mxu0 %v6134_v54 }
 0x456   :  { %6831 = vmatprep.subr.bf16.mxu0 %v9125_v13 }
 0x459   :  { %6832 = vmatpush1.bf16.msra.mxu0 %v9123_v28 }
 0x45a   :  { %6833 = vmatprep.subr.bf16.mxu0 %v9128_v60 }
 0x45d   :  { %6834 = vmatpush1.bf16.msra.mxu0 %v9126_v19 }
 0x45e   :  { %6835 = vmatprep.subr.bf16.mxu0 %v9131_v31 }
 0x461   :  { %6836 = vmatpush1.bf16.msra.mxu0 %v9129_v36 }
 0x462   :  { %6837 = vmatprep.subr.bf16.mxu0 %v9134_v42 }
 0x465   :  { %6838 = vmatpush1.bf16.msra.mxu0 %v9132_v56 }
 0x466   :  { %6839 = vmatprep.subr.bf16.mxu0 %v9137_v11 }
 0x469   :  { %6840 = vmatpush1.bf16.msra.mxu0 %v9135_v24 }
 0x46a   :  { %6841 = vmatprep.subr.bf16.mxu0 %v9140_v0 }
 0x46d   :  { %6842 = vmatpush1.bf16.msra.mxu0 %v9138_v37 }
 0x46e   :  { %6843 = vmatprep.subr.bf16.mxu0 %v9143_v50  ;;  %v9277_v50 = vmov 1966171168  }
 0x471   :  { %6844 = vmatpush1.bf16.msra.mxu0 %v9141_v61  ;;  %v6991_v61 = vunpack.c.l.s4 %v9277_v50 }
 0x472   :  { %6845 = vmatprep.subr.bf16.mxu0 %v9146_v45 }
 0x475   :  { %6846 = vmatpush2.bf16.msra.mxu0 %v9144_v63 }
 0x476   :  { %6847 = vmatprep.subr.bf16.mxu0 %v9149_v30 }
 0x479   :  { %6848 = vmatpush2.bf16.msra.mxu0 %v9147_v25 }
 0x47a   :  { %6849 = vmatprep.subr.bf16.mxu0 %v9152_v4 }
 0x47d   :  { %6850 = vmatpush2.bf16.msra.mxu0 %v9150_v26 }
 0x47e   :  { %6851 = vmatprep.subr.bf16.mxu0 %v9155_v29 }
 0x481   :  { %6852 = vmatpush2.bf16.msra.mxu0 %v9153_v39 }
 0x482   :  { %6853 = vmatprep.subr.bf16.mxu0 %v9158_v35  ;;  %v6992_v35 = vunpack.c.0.s8 %v6991_v61 }
 0x485   :  { %6854 = vmatpush2.bf16.msra.mxu0 %v9156_v8 }
 0x486   :  { %6855 = vmatprep.subr.bf16.mxu0 %v9161_v59 }
 0x489   :  { %6856 = vmatpush2.bf16.msra.mxu0 %v9159_v20 }
 0x48a   :  { %6857 = vmatprep.subr.bf16.mxu0 %v9164_v49 }
 0x48d   :  { %6858 = vmatpush2.bf16.msra.mxu0 %v9162_v51 }
 0x48e   :  { %6859 = vmatprep.subr.bf16.mxu0 %v9167_v40 }
 0x491   :  { %6860 = vmatpush2.bf16.msra.mxu0 %v9165_v1  ;;  %v6995_v1 = vsub.s32 %v6992_v35, %v10992_v55 }
 0x494   :  { %6862 = vmatmul.mubr.bf16.vlgmr.msra.gmra.mxu0 %v10820_v38 }
 0x514   :  { %v6777_v48 = vpop.f32.mrf.mxu0  ;;  %v6820_v21 = vpop.f32.mrf.mxu1 }
 0x515   :  { %v6778_v12 = vadd.f32 %v6777_v48, %v6236_v41  ;;  %v6821_v57 = vadd.f32 %v6820_v21, %v6244_v5 }
 0x516   :  { %v6779_v9 = vpop.f32.mrf.mxu0  ;;  %v6822_v17 = vpop.f32.mrf.mxu1 }
 0x517   :  { %v6890_v32 = vsub.f32 %v6778_v12, %v6878_v14  ;;  %v6892_v22 = vsub.f32 %v6821_v57, %v6880_v46  ;;  %v6780_v62 = vadd.f32 %v6779_v9, %v6240_v33  ;;  %v6823_v53 = vadd.f32 %v6822_v17, %v6248_v7  ;;  %v6874_v7 = vld [vmem:[%s10959_s1 + $0x10] sm:$0xff] }
 0x518   :  { %v6781_v10 = vpop.f32.mrf.mxu0  ;;  %v6824_v3 = vpop.f32.mrf.mxu1  ;;  %v6251_v33 = vsub.s32 4, %v10992_v55  ;;  %v6882_v21 = vunpack.c.l.bf16 %v6874_v7  ;;  %v6256_v12 = vrot.slane %v10915_v44, %v6255_v6 }
 0x519   :  { %v6902_v16 = vand.u32 2147483647, %v6890_v32  ;;  %v6904_v43 = vand.u32 2147483647, %v6892_v22  ;;  %v6891_v15 = vsub.f32 %v6780_v62, %v6879_v34  ;;  %v6893_v54 = vsub.f32 %v6823_v53, %v6881_v23 }
 0x51a   :  { %v6783_v18 = vpop.f32.mrf.mxu0  ;;  %v6826_v38 = vpop.f32.mrf.mxu1  ;;  %v6252_v48 = vrot.slane %v10915_v44, %v6251_v33  ;;  %v6883_v23 = vunpack.c.h.bf16 %v6874_v7 }
 0x51b   :  { %v6927_v13 = vsel %vm6921_vm4, %v6902_v16, 0.0  ;;  %v6929_v28 = vsel %vm6921_vm4, %v6904_v43, 0.0  ;;  %v6903_v60 = vand.u32 2147483647, %v6891_v15  ;;  %v6905_v19 = vand.u32 2147483647, %v6893_v54 }
 0x51c   :  { %v6940_v31 = vrot.slane %v6927_v13, 4  ;;  %v6954_v36 = vrot.slane %v6929_v28, 4 }
 0x51d   :  { %v6928_v42 = vsel %vm6921_vm4, %v6903_v60, 0.0  ;;  %v6930_v56 = vsel %vm6921_vm4, %v6905_v19, 0.0 }
 0x51e   :  { %v6941_v11 = vadd.f32 %v6940_v31, %v6927_v13  ;;  %v6955_v24 = vadd.f32 %v6954_v36, %v6929_v28  ;;  %v6947_v0 = vrot.slane %v6928_v42, 4  ;;  %v6961_v37 = vrot.slane %v6930_v56, 4 }
 0x520   :  { %v6942_v45 = vrot.slane %v6941_v11, 2  ;;  %v6956_v63 = vrot.slane %v6955_v24, 2  ;;  %v6948_v30 = vadd.f32 %v6947_v0, %v6928_v42  ;;  %v6962_v25 = vadd.f32 %v6961_v37, %v6930_v56 }
 0x521   :  { %v10996_v37 = vlaneseq }
 0x522   :  { %v6943_v4 = vadd.f32 %v6942_v45, %v6941_v11  ;;  %v6957_v26 = vadd.f32 %v6956_v63, %v6955_v24  ;;  %v6949_v29 = vrot.slane %v6948_v30, 2  ;;  %v6963_v39 = vrot.slane %v6962_v25, 2 }
 0x523   :  { %vm7030_vm5 = vcmp.lt.s32.totalorder %v10996_v37, 768 }
 0x524   :  { %v6944_v8 = vrot.slane %v6943_v4, 1  ;;  %v6958_v59 = vrot.slane %v6957_v26, 1  ;;  %v6950_v20 = vadd.f32 %v6949_v29, %v6948_v30  ;;  %v6964_v49 = vadd.f32 %v6963_v39, %v6962_v25 }
 0x526   :  { %v6951_v51 = vrot.slane %v6950_v20, 1  ;;  %v6965_v40 = vrot.slane %v6964_v49, 1  ;;  %v6945_v52 = vadd.f32 %v6944_v8, %v6943_v4  ;;  %v6959_v58 = vadd.f32 %v6958_v59, %v6957_v26 }
 0x528   :  { %v6952_v2 = vadd.f32 %v6951_v51, %v6950_v20  ;;  %v6966_v41 = vadd.f32 %v6965_v40, %v6964_v49 }
 0x52a   :  { %v6987_v27 = vcombine.low %v6945_v52, %v6952_v2  ;;  %v6988_v5 = vcombine.low %v6959_v58, %v6966_v41 }
 0x52c   :  { %v6996_v14 = vrot.slane %v6987_v27, %v6995_v1  ;;  %v7003_v46 = vrot.slane %v6988_v5, %v6995_v1 }
 0x52e   :  { %v7011_v47 = vcombine.low %v6996_v14, %v7003_v46 }
 0x530   :  { %v7018_v24 = vrot.slane %v7011_v47, %v6995_v1 }
 0x554   :  { %v6863_v57 = vpop.f32.mrf.mxu0 }
 0x555   :  { %v6864_v34 = vadd.f32 %v6863_v57, %v6252_v48 }
 0x556   :  { %v6865_v9 = vpop.f32.mrf.mxu0 }
 0x557   :  { %v6894_v17 = vsub.f32 %v6864_v34, %v6882_v21  ;;  %v6866_v32 = vadd.f32 %v6865_v9, %v6256_v12 }
 0x558   :  { %v6867_v22 = vpop.f32.mrf.mxu0 }
 0x559   :  { %v6906_v62 = vand.u32 2147483647, %v6894_v17  ;;  %v6895_v53 = vsub.f32 %v6866_v32, %v6883_v23 }
 0x55a   :  { %v6869_v10 = vpop.f32.mrf.mxu0 }
 0x55b   :  { %v6931_v3 = vsel %vm6921_vm4, %v6906_v62, 0.0  ;;  %v6907_v16 = vand.u32 2147483647, %v6895_v53 }
 0x55c   :  { %v6968_v43 = vrot.slane %v6931_v3, 4 }
 0x55d   :  { %v6932_v15 = vsel %vm6921_vm4, %v6907_v16, 0.0 }
 0x55e   :  { %v6969_v54 = vadd.f32 %v6968_v43, %v6931_v3  ;;  %v6975_v44 = vrot.slane %v6932_v15, 4 }
 0x560   :  { %v6970_v18 = vrot.slane %v6969_v54, 2  ;;  %v6976_v38 = vadd.f32 %v6975_v44, %v6932_v15 }
 0x562   :  { %v6971_v13 = vadd.f32 %v6970_v18, %v6969_v54  ;;  %v6977_v28 = vrot.slane %v6976_v38, 2 }
 0x564   :  { %v6972_v60 = vrot.slane %v6971_v13, 1  ;;  %v6978_v19 = vadd.f32 %v6977_v28, %v6976_v38 }
 0x566   :  { %v6979_v31 = vrot.slane %v6978_v19, 1  ;;  %v6973_v36 = vadd.f32 %v6972_v60, %v6971_v13 }
 0x568   :  { %v6980_v42 = vadd.f32 %v6979_v31, %v6978_v19 }
 0x56a   :  { %v6989_v56 = vcombine.low %v6973_v36, %v6980_v42 }
 0x56c   :  { %v7010_v11 = vrot.slane %v6989_v56, %v6995_v1 }
 0x56e   :  { %v7025_v0 = vrot.slane %v7010_v11, %v6995_v1 }
 0x570   :  { %v7026_v50 = vcombine.low %v7018_v24, %v7025_v0 }
 0x572   :  { %7032 = vst.msk [vmem:[%s10966_s8] sm:$0x3f] %vm7030_vm5, %v7026_v50 }
 0x573   :  { %7037 = vsyncpa [#allocation3], 1 }
 0x574   :  { %7038 = vsyncpa [#allocation5], 1 }
 0x575   :  { %7039 = vsyncpa [#allocation8], 1 }

</bundles_post_ra>
